<compile_context>
chip_gen: v7x
topology: tpu7x:2x2x1
jax: 0.10.0
libtpu: 0.0.40
codegen_flags: <defaults>
</compile_context>

<pallas_src>
import jax
import jax.numpy as jnp
from jax.experimental import pallas as pl
from jax.experimental.pallas import tpu as pltpu

LN_EPS = 1e-5
_LANE = 128
_INV_SQRT2 = 0.7071067811865476


def _round_up(n, m):
    return ((n + m - 1) // m) * m


def _pad2(a, r, c):
    return jnp.pad(a, ((0, r - a.shape[0]), (0, c - a.shape[1])))


def _choose_batch_block(B, Cp, Pp, itemsize=4, target_bytes=2 << 20, max_bt=8):
    """Pick how many batch elements to process per grid step."""
    per_slab = Cp * Pp * itemsize
    bt = max(1, min(B, max_bt, max(1, target_bytes // per_slab)))
    # keep at least 2 grid iterations when possible (v7x: feed both TensorCores)
    while bt > 1 and B // bt < 2:
        bt -= 1
    # keep the batch grid exact
    while B % bt:
        bt -= 1
    return bt


def _make_kernel(Bt, Cp, Pp, P_true):
    """Build the fused Mixer kernel for one (Bt, Cp, Pp) slab."""
    need_pix_mask = (Pp != P_true)
    inv_p = 1.0 / float(P_true)

    def _ln(v):
        # single-pass LayerNorm over the (true) pixel axis; padded columns are
        # zero so the sums are exact with the true divisor P_true.
        s = jnp.sum(v, axis=-1, keepdims=True)
        sq = jnp.sum(v * v, axis=-1, keepdims=True)
        mu = s * inv_p
        var = jnp.maximum(sq * inv_p - mu * mu, 0.0)
        return (v - mu) * jax.lax.rsqrt(var + LN_EPS)

    def _gelu(v):
        # torch.nn.GELU() default: exact erf form
        return 0.5 * v * (1.0 + jax.lax.erf(v * _INV_SQRT2))

    def kernel(x_ref,
               w1c_ref, b1c_ref, w2c_ref, b2c_ref,      # token-mixing MLP (over channels)
               w1pT_ref, b1p_ref, w2pT_ref, b2p_ref,    # channel-mixing MLP (over pixels)
               o_ref):
        x2 = x_ref[...].reshape(Bt * Cp, Pp).astype(jnp.float32)

        # ---------------- token mixing ----------------
        # PyTorch: transpose -> Linear over channels -> transpose back
        # == W1 @ LN(x) + b1[:, None] per batch element (no transposes needed).
        xn = _ln(x2).astype(jnp.bfloat16)
        w1c = w1c_ref[...]
        w2c = w2c_ref[...]
        b1c = b1c_ref[...]
        b2c = b2c_ref[...]
        parts = []
        for bi in range(Bt):                              # static unroll over batch block
            sl = xn[bi * Cp:(bi + 1) * Cp, :]             # (Cp, Pp), aligned static slice
            t = jnp.dot(w1c, sl, preferred_element_type=jnp.float32) + b1c
            t = _gelu(t).astype(jnp.bfloat16)
            t = jnp.dot(w2c, t, preferred_element_type=jnp.float32) + b2c
            parts.append(t)
        h = parts[0] if Bt == 1 else jnp.concatenate(parts, axis=0)
        y = x2 + h                                        # residual (f32)
        if need_pix_mask:
            # zero padded pixel columns so LN2's statistics stay exact
            pix = jax.lax.broadcasted_iota(jnp.int32, (1, Pp), 1) < P_true
            y = jnp.where(pix, y, 0.0)

        # ---------------- channel mixing ----------------
        yn = _ln(y).astype(jnp.bfloat16)
        t = jnp.dot(yn, w1pT_ref[...], preferred_element_type=jnp.float32) + b1p_ref[...]
        t = _gelu(t).astype(jnp.bfloat16)
        t = jnp.dot(t, w2pT_ref[...], preferred_element_type=jnp.float32) + b2p_ref[...]
        out = y + t                                       # residual (f32)

        o_ref[...] = out.reshape(Bt, Cp, Pp).astype(o_ref.dtype)

    return kernel


def mixer_forward(x, params):
    """x: (B, C, P) float32. params: PyTorch-layout Linear weights (out,in) / biases."""
    B, C, P = x.shape
    Cp = _round_up(C, _LANE)
    Pp = _round_up(P, _LANE)
    Bt = _choose_batch_block(B, Cp, Pp)

    # --- zero-pad operands so lane / MXU dims are 128-aligned ---
    xp = jnp.pad(x, ((0, 0), (0, Cp - C), (0, Pp - P)))

    w1c = _pad2(params["mlp1.lin1.w"], Cp, Cp).astype(jnp.bfloat16)
    w2c = _pad2(params["mlp1.lin2.w"], Cp, Cp).astype(jnp.bfloat16)
    b1c = jnp.pad(params["mlp1.lin1.b"], (0, Cp - C)).reshape(Cp, 1).astype(jnp.float32)
    b2c = jnp.pad(params["mlp1.lin2.b"], (0, Cp - C)).reshape(Cp, 1).astype(jnp.float32)

    # channel-mixing MLP computes y @ W^T + b, so ship W^T (zero padded).
    w1pT = _pad2(params["mlp2.lin1.w"].T, Pp, Pp).astype(jnp.bfloat16)
    w2pT = _pad2(params["mlp2.lin2.w"].T, Pp, Pp).astype(jnp.bfloat16)
    b1p = jnp.pad(params["mlp2.lin1.b"], (0, Pp - P)).reshape(1, Pp).astype(jnp.float32)
    b2p = jnp.pad(params["mlp2.lin2.b"], (0, Pp - P)).reshape(1, Pp).astype(jnp.float32)

    kernel = _make_kernel(Bt, Cp, Pp, P)

    # advisory cost for XLA scheduling
    flops = 4 * B * (Cp * Cp * Pp + Cp * Pp * Pp)
    transcendentals = 2 * B * Cp * Pp + 2 * B * Cp
    bytes_accessed = (2 * B * Cp * Pp * 4              # x in + out (f32)
                      + 2 * (Cp * Cp + Pp * Pp) * 2    # bf16 weights
                      + 2 * (Cp + Pp) * 4)             # f32 biases

    # VMEM budget: single-buffered weights + double-buffered in/out slabs,
    # bounded so the request also fits v7x's 64 MiB physical VMEM.
    weight_vmem = 2 * (Cp * Cp + Pp * Pp) * 2 + 2 * (Cp + Pp) * 4
    slab_vmem = Bt * Cp * Pp * 4
    vmem_limit = int(min(64 << 20, max(32 << 20, 2 * weight_vmem + 4 * slab_vmem + (4 << 20))))

    def _call(single_buffer_weights):
        def w_spec(shape):
            idx = lambda b: (0,) * len(shape)
            if single_buffer_weights:
                # grid-invariant operand: one resident VMEM copy is enough.
                return pl.BlockSpec(shape, idx, pipeline_mode=pl.Buffered(1))
            return pl.BlockSpec(shape, idx)

        return pl.pallas_call(
            kernel,
            out_shape=jax.ShapeDtypeStruct((B, Cp, Pp), x.dtype),
            grid=(B // Bt,),
            in_specs=[
                pl.BlockSpec((Bt, Cp, Pp), lambda b: (b, 0, 0)),   # x slab
                w_spec((Cp, Cp)), w_spec((Cp, 1)), w_spec((Cp, Cp)), w_spec((Cp, 1)),
                w_spec((Pp, Pp)), w_spec((1, Pp)), w_spec((Pp, Pp)), w_spec((1, Pp)),
            ],
            out_specs=pl.BlockSpec((Bt, Cp, Pp), lambda b: (b, 0, 0)),
            compiler_params=pltpu.CompilerParams(
                dimension_semantics=("parallel",),
                vmem_limit_bytes=vmem_limit),
            cost_estimate=pl.CostEstimate(
                flops=int(flops),
                transcendentals=int(transcendentals),
                bytes_accessed=int(bytes_accessed)),
        )(xp, w1c, b1c, w2c, b2c, w1pT, b1p, w2pT, b2p)

    try:
        out_p = _call(True)
    except Exception:
        # pl.Buffered(1) not accepted on this jax version -> default buffering.
        out_p = _call(False)

    return out_p[:, :C, :P]


def mixer_reference(x, params):
    """Pure-JAX f32 reference mirroring the PyTorch forward exactly."""
    def ln(v):
        mu = jnp.mean(v, axis=-1, keepdims=True)
        var = jnp.mean((v - mu) ** 2, axis=-1, keepdims=True)
        return (v - mu) / jnp.sqrt(var + LN_EPS)

    def linear(v, w, b):
        return v @ w.T + b

    def gelu(v):
        return 0.5 * v * (1.0 + jax.lax.erf(v / jnp.sqrt(2.0)))

    # token mixing
    prev = x
    y = ln(x)
    y = jnp.swapaxes(y, 1, 2)                                   # (B, P, C)
    y = linear(y, params["mlp1.lin1.w"], params["mlp1.lin1.b"])
    y = gelu(y)
    y = linear(y, params["mlp1.lin2.w"], params["mlp1.lin2.b"])
    y = jnp.swapaxes(y, 1, 2)                                   # (B, C, P)
    x = y + prev
    # channel mixing
    prev = x
    y = ln(x)
    y = linear(y, params["mlp2.lin1.w"], params["mlp2.lin1.b"])
    y = gelu(y)
    y = linear(y, params["mlp2.lin2.w"], params["mlp2.lin2.b"])
    return y + prev


def init_params(key, channels, pixels):
    """Deterministic init mimicking torch.nn.Linear default (uniform +-1/sqrt(fan_in))."""
    keys = jax.random.split(key, 8)

    def lin(kw, kb, dim):
        bound = 1.0 / jnp.sqrt(dim)
        w = jax.random.uniform(kw, (dim, dim), jnp.float32, -bound, bound)
        b = jax.random.uniform(kb, (dim,), jnp.float32, -bound, bound)
        return w, b

    w1c, b1c = lin(keys[0], keys[1], channels)
    w2c, b2c = lin(keys[2], keys[3], channels)
    w1p, b1p = lin(keys[4], keys[5], pixels)
    w2p, b2p = lin(keys[6], keys[7], pixels)
    return {
        "mlp1.lin1.w": w1c, "mlp1.lin1.b": b1c,
        "mlp1.lin2.w": w2c, "mlp1.lin2.b": b2c,
        "mlp2.lin1.w": w1p, "mlp2.lin1.b": b1p,
        "mlp2.lin2.w": w2p, "mlp2.lin2.b": b2p,
    }


if __name__ == "__main__":
    B, C = 2, 4
    patch_w, patch_h = 4, 4
    P = patch_w * patch_h

    root = jax.random.PRNGKey(0)
    k_x, k_p = jax.random.split(root)
    x = jax.random.normal(k_x, (B, C, P), jnp.float32)
    params = init_params(k_p, C, P)

    out = jax.block_until_ready(mixer_forward(x, params))
    ref = mixer_reference(x, params)

    assert out.shape == (B, C, P)
    err = float(jnp.max(jnp.abs(out - ref)))
    # bf16 MXU operands vs f32 reference -> tolerance loosened accordingly
    assert err < 5e-2, f"max abs err {err}"
    print("KERNEL_OK")
</pallas_src>

<mosaic_0001>
module attributes {stable_mosaic.version = 11 : i64} {
  func.func @kernel(%arg0: i32, %arg1: memref<1x128x128xf32, #tpu.memory_space<vmem>>, %arg2: memref<128x128xbf16, #tpu.memory_space<vmem>>, %arg3: memref<128x1xf32, #tpu.memory_space<vmem>>, %arg4: memref<128x128xbf16, #tpu.memory_space<vmem>>, %arg5: memref<128x1xf32, #tpu.memory_space<vmem>>, %arg6: memref<128x128xbf16, #tpu.memory_space<vmem>>, %arg7: memref<1x128xf32, #tpu.memory_space<vmem>>, %arg8: memref<128x128xbf16, #tpu.memory_space<vmem>>, %arg9: memref<1x128xf32, #tpu.memory_space<vmem>>, %arg10: memref<1x128x128xf32, #tpu.memory_space<vmem>>) attributes {dimension_semantics = [#tpu.dimension_semantics<parallel>], iteration_bounds = array<i64: 2>, scalar_prefetch = 0 : i64, scratch_operands = 0 : i64, tpu.core_type = #tpu.core_type<tc>, window_params = [{transform_indices = @transform_0, window_bounds = array<i64: 1, 128, 128>}, {pipeline_mode = #tpu.pipeline_mode<synchronous>, transform_indices = @transform_1, window_bounds = array<i64: 128, 128>}, {pipeline_mode = #tpu.pipeline_mode<synchronous>, transform_indices = @transform_2, window_bounds = array<i64: 128, 1>}, {pipeline_mode = #tpu.pipeline_mode<synchronous>, transform_indices = @transform_3, window_bounds = array<i64: 128, 128>}, {pipeline_mode = #tpu.pipeline_mode<synchronous>, transform_indices = @transform_4, window_bounds = array<i64: 128, 1>}, {pipeline_mode = #tpu.pipeline_mode<synchronous>, transform_indices = @transform_5, window_bounds = array<i64: 128, 128>}, {pipeline_mode = #tpu.pipeline_mode<synchronous>, transform_indices = @transform_6, window_bounds = array<i64: 1, 128>}, {pipeline_mode = #tpu.pipeline_mode<synchronous>, transform_indices = @transform_7, window_bounds = array<i64: 128, 128>}, {pipeline_mode = #tpu.pipeline_mode<synchronous>, transform_indices = @transform_8, window_bounds = array<i64: 1, 128>}, {transform_indices = @transform_9, window_bounds = array<i64: 1, 128, 128>}]} {
    %c0 = arith.constant 0 : index
    %c0_0 = arith.constant 0 : index
    %c0_1 = arith.constant 0 : index
    %0 = vector.load %arg1[%c0, %c0_0, %c0_1] : memref<1x128x128xf32, #tpu.memory_space<vmem>>, vector<1x128x128xf32>
    %1 = vector.shape_cast %0 : vector<1x128x128xf32> to vector<128x128xf32>
    %cst = arith.constant dense<0.000000e+00> : vector<128xf32>
    %2 = vector.multi_reduction <add>, %1, %cst [1] : vector<128x128xf32> to vector<128xf32>
    %3 = vector.shape_cast %2 : vector<128xf32> to vector<128x1xf32>
    %4 = arith.mulf %1, %1 : vector<128x128xf32>
    %cst_2 = arith.constant dense<0.000000e+00> : vector<128xf32>
    %5 = vector.multi_reduction <add>, %4, %cst_2 [1] : vector<128x128xf32> to vector<128xf32>
    %6 = vector.shape_cast %5 : vector<128xf32> to vector<128x1xf32>
    %cst_3 = arith.constant 6.250000e-02 : f32
    %7 = vector.broadcast %cst_3 : f32 to vector<128x1xf32>
    %8 = arith.mulf %3, %7 : vector<128x1xf32>
    %cst_4 = arith.constant 6.250000e-02 : f32
    %9 = vector.broadcast %cst_4 : f32 to vector<128x1xf32>
    %10 = arith.mulf %6, %9 : vector<128x1xf32>
    %11 = arith.mulf %8, %8 : vector<128x1xf32>
    %12 = arith.subf %10, %11 : vector<128x1xf32>
    %cst_5 = arith.constant 0.000000e+00 : f32
    %13 = vector.broadcast %cst_5 : f32 to vector<128x1xf32>
    %14 = arith.maximumf %12, %13 : vector<128x1xf32>
    %15 = vector.broadcast %8 : vector<128x1xf32> to vector<128x128xf32>
    %16 = arith.subf %1, %15 : vector<128x128xf32>
    %cst_6 = arith.constant 9.99999974E-6 : f32
    %17 = vector.broadcast %cst_6 : f32 to vector<128x1xf32>
    %18 = arith.addf %14, %17 : vector<128x1xf32>
    %19 = math.rsqrt %18 : vector<128x1xf32>
    %20 = vector.broadcast %19 : vector<128x1xf32> to vector<128x128xf32>
    %21 = arith.mulf %16, %20 : vector<128x128xf32>
    %22 = arith.truncf %21 : vector<128x128xf32> to vector<128x128xbf16>
    %c0_7 = arith.constant 0 : index
    %c0_8 = arith.constant 0 : index
    %23 = vector.load %arg2[%c0_7, %c0_8] : memref<128x128xbf16, #tpu.memory_space<vmem>>, vector<128x128xbf16>
    %c0_9 = arith.constant 0 : index
    %c0_10 = arith.constant 0 : index
    %24 = vector.load %arg4[%c0_9, %c0_10] : memref<128x128xbf16, #tpu.memory_space<vmem>>, vector<128x128xbf16>
    %c0_11 = arith.constant 0 : index
    %c0_12 = arith.constant 0 : index
    %25 = vector.load %arg3[%c0_11, %c0_12] : memref<128x1xf32, #tpu.memory_space<vmem>>, vector<128x1xf32>
    %c0_13 = arith.constant 0 : index
    %c0_14 = arith.constant 0 : index
    %26 = vector.load %arg5[%c0_13, %c0_14] : memref<128x1xf32, #tpu.memory_space<vmem>>, vector<128x1xf32>
    %cst_15 = arith.constant dense<0.000000e+00> : vector<128x128xf32>
    %27 = tpu.matmul %23, %22, %cst_15 {dimension_numbers = #tpu.dot_dimension_numbers<[1], [0], [0], [1], [0, 0, 1, 1], [], []>} : vector<128x128xbf16>, vector<128x128xbf16>, vector<128x128xf32> -> vector<128x128xf32>
    %28 = vector.broadcast %25 : vector<128x1xf32> to vector<128x128xf32>
    %29 = arith.addf %27, %28 : vector<128x128xf32>
    %cst_16 = arith.constant 5.000000e-01 : f32
    %30 = vector.broadcast %cst_16 : f32 to vector<128x128xf32>
    %31 = arith.mulf %30, %29 : vector<128x128xf32>
    %cst_17 = arith.constant 0.707106769 : f32
    %32 = vector.broadcast %cst_17 : f32 to vector<128x128xf32>
    %33 = arith.mulf %29, %32 : vector<128x128xf32>
    %34 = math.erf %33 : vector<128x128xf32>
    %cst_18 = arith.constant 1.000000e+00 : f32
    %35 = vector.broadcast %cst_18 : f32 to vector<128x128xf32>
    %36 = arith.addf %35, %34 : vector<128x128xf32>
    %37 = arith.mulf %31, %36 : vector<128x128xf32>
    %38 = arith.truncf %37 : vector<128x128xf32> to vector<128x128xbf16>
    %cst_19 = arith.constant dense<0.000000e+00> : vector<128x128xf32>
    %39 = tpu.matmul %24, %38, %cst_19 {dimension_numbers = #tpu.dot_dimension_numbers<[1], [0], [0], [1], [0, 0, 1, 1], [], []>} : vector<128x128xbf16>, vector<128x128xbf16>, vector<128x128xf32> -> vector<128x128xf32>
    %40 = vector.broadcast %26 : vector<128x1xf32> to vector<128x128xf32>
    %41 = arith.addf %39, %40 : vector<128x128xf32>
    %42 = arith.addf %1, %41 : vector<128x128xf32>
    %43 = tpu.iota {dimensions = array<i32: 1>} : vector<1x128xi32>
    %c16_i32 = arith.constant 16 : i32
    %44 = vector.broadcast %c16_i32 : i32 to vector<1x128xi32>
    %45 = arith.cmpi slt, %43, %44 : vector<1x128xi32>
    %cst_20 = arith.constant 0.000000e+00 : f32
    %46 = vector.shape_cast %45 : vector<1x128xi1> to vector<1x128xi1>
    %47 = vector.broadcast %46 : vector<1x128xi1> to vector<128x128xi1>
    %48 = vector.broadcast %cst_20 : f32 to vector<128x128xf32>
    %49 = arith.select %47, %42, %48 : vector<128x128xi1>, vector<128x128xf32>
    %cst_21 = arith.constant dense<0.000000e+00> : vector<128xf32>
    %50 = vector.multi_reduction <add>, %49, %cst_21 [1] : vector<128x128xf32> to vector<128xf32>
    %51 = vector.shape_cast %50 : vector<128xf32> to vector<128x1xf32>
    %52 = arith.mulf %49, %49 : vector<128x128xf32>
    %cst_22 = arith.constant dense<0.000000e+00> : vector<128xf32>
    %53 = vector.multi_reduction <add>, %52, %cst_22 [1] : vector<128x128xf32> to vector<128xf32>
    %54 = vector.shape_cast %53 : vector<128xf32> to vector<128x1xf32>
    %cst_23 = arith.constant 6.250000e-02 : f32
    %55 = vector.broadcast %cst_23 : f32 to vector<128x1xf32>
    %56 = arith.mulf %51, %55 : vector<128x1xf32>
    %cst_24 = arith.constant 6.250000e-02 : f32
    %57 = vector.broadcast %cst_24 : f32 to vector<128x1xf32>
    %58 = arith.mulf %54, %57 : vector<128x1xf32>
    %59 = arith.mulf %56, %56 : vector<128x1xf32>
    %60 = arith.subf %58, %59 : vector<128x1xf32>
    %cst_25 = arith.constant 0.000000e+00 : f32
    %61 = vector.broadcast %cst_25 : f32 to vector<128x1xf32>
    %62 = arith.maximumf %60, %61 : vector<128x1xf32>
    %63 = vector.broadcast %56 : vector<128x1xf32> to vector<128x128xf32>
    %64 = arith.subf %49, %63 : vector<128x128xf32>
    %cst_26 = arith.constant 9.99999974E-6 : f32
    %65 = vector.broadcast %cst_26 : f32 to vector<128x1xf32>
    %66 = arith.addf %62, %65 : vector<128x1xf32>
    %67 = math.rsqrt %66 : vector<128x1xf32>
    %68 = vector.broadcast %67 : vector<128x1xf32> to vector<128x128xf32>
    %69 = arith.mulf %64, %68 : vector<128x128xf32>
    %70 = arith.truncf %69 : vector<128x128xf32> to vector<128x128xbf16>
    %c0_27 = arith.constant 0 : index
    %c0_28 = arith.constant 0 : index
    %71 = vector.load %arg6[%c0_27, %c0_28] : memref<128x128xbf16, #tpu.memory_space<vmem>>, vector<128x128xbf16>
    %cst_29 = arith.constant dense<0.000000e+00> : vector<128x128xf32>
    %72 = tpu.matmul %70, %71, %cst_29 {dimension_numbers = #tpu.dot_dimension_numbers<[1], [0], [0], [1], [0, 0, 1, 1], [], []>} : vector<128x128xbf16>, vector<128x128xbf16>, vector<128x128xf32> -> vector<128x128xf32>
    %c0_30 = arith.constant 0 : index
    %c0_31 = arith.constant 0 : index
    %73 = vector.load %arg7[%c0_30, %c0_31] : memref<1x128xf32, #tpu.memory_space<vmem>>, vector<1x128xf32>
    %74 = vector.broadcast %73 : vector<1x128xf32> to vector<128x128xf32>
    %75 = arith.addf %72, %74 : vector<128x128xf32>
    %cst_32 = arith.constant 5.000000e-01 : f32
    %76 = vector.broadcast %cst_32 : f32 to vector<128x128xf32>
    %77 = arith.mulf %76, %75 : vector<128x128xf32>
    %cst_33 = arith.constant 0.707106769 : f32
    %78 = vector.broadcast %cst_33 : f32 to vector<128x128xf32>
    %79 = arith.mulf %75, %78 : vector<128x128xf32>
    %80 = math.erf %79 : vector<128x128xf32>
    %cst_34 = arith.constant 1.000000e+00 : f32
    %81 = vector.broadcast %cst_34 : f32 to vector<128x128xf32>
    %82 = arith.addf %81, %80 : vector<128x128xf32>
    %83 = arith.mulf %77, %82 : vector<128x128xf32>
    %84 = arith.truncf %83 : vector<128x128xf32> to vector<128x128xbf16>
    %c0_35 = arith.constant 0 : index
    %c0_36 = arith.constant 0 : index
    %85 = vector.load %arg8[%c0_35, %c0_36] : memref<128x128xbf16, #tpu.memory_space<vmem>>, vector<128x128xbf16>
    %cst_37 = arith.constant dense<0.000000e+00> : vector<128x128xf32>
    %86 = tpu.matmul %84, %85, %cst_37 {dimension_numbers = #tpu.dot_dimension_numbers<[1], [0], [0], [1], [0, 0, 1, 1], [], []>} : vector<128x128xbf16>, vector<128x128xbf16>, vector<128x128xf32> -> vector<128x128xf32>
    %c0_38 = arith.constant 0 : index
    %c0_39 = arith.constant 0 : index
    %87 = vector.load %arg9[%c0_38, %c0_39] : memref<1x128xf32, #tpu.memory_space<vmem>>, vector<1x128xf32>
    %88 = vector.broadcast %87 : vector<1x128xf32> to vector<128x128xf32>
    %89 = arith.addf %86, %88 : vector<128x128xf32>
    %90 = arith.addf %49, %89 : vector<128x128xf32>
    %91 = vector.shape_cast %90 : vector<128x128xf32> to vector<1x128x128xf32>
    %c0_40 = arith.constant 0 : index
    %c0_41 = arith.constant 0 : index
    %c0_42 = arith.constant 0 : index
    %92 = vector.load %arg10[%c0_40, %c0_41, %c0_42] : memref<1x128x128xf32, #tpu.memory_space<vmem>>, vector<1x128x128xf32>
    tpu.vector_store %arg10[%c0_40, %c0_41, %c0_42], %91 {strides = array<i32>} : memref<1x128x128xf32, #tpu.memory_space<vmem>>, vector<1x128x128xf32>,
    return
  }
  func.func @transform_0(%arg0: i32) -> (i32, i32, i32) {
    %c0_i32 = arith.constant 0 : i32
    %c0_i32_0 = arith.constant 0 : i32
    %c0_i32_1 = arith.constant 0 : i32
    return %arg0, %c0_i32, %c0_i32_0 : i32, i32, i32
  }
  func.func @transform_1(%arg0: i32) -> (i32, i32) {
    %c0_i32 = arith.constant 0 : i32
    %c0_i32_0 = arith.constant 0 : i32
    %c0_i32_1 = arith.constant 0 : i32
    return %c0_i32, %c0_i32_0 : i32, i32
  }
  func.func @transform_2(%arg0: i32) -> (i32, i32) {
    %c0_i32 = arith.constant 0 : i32
    %c0_i32_0 = arith.constant 0 : i32
    %c0_i32_1 = arith.constant 0 : i32
    return %c0_i32, %c0_i32_0 : i32, i32
  }
  func.func @transform_3(%arg0: i32) -> (i32, i32) {
    %c0_i32 = arith.constant 0 : i32
    %c0_i32_0 = arith.constant 0 : i32
    %c0_i32_1 = arith.constant 0 : i32
    return %c0_i32, %c0_i32_0 : i32, i32
  }
  func.func @transform_4(%arg0: i32) -> (i32, i32) {
    %c0_i32 = arith.constant 0 : i32
    %c0_i32_0 = arith.constant 0 : i32
    %c0_i32_1 = arith.constant 0 : i32
    return %c0_i32, %c0_i32_0 : i32, i32
  }
  func.func @transform_5(%arg0: i32) -> (i32, i32) {
    %c0_i32 = arith.constant 0 : i32
    %c0_i32_0 = arith.constant 0 : i32
    %c0_i32_1 = arith.constant 0 : i32
    return %c0_i32, %c0_i32_0 : i32, i32
  }
  func.func @transform_6(%arg0: i32) -> (i32, i32) {
    %c0_i32 = arith.constant 0 : i32
    %c0_i32_0 = arith.constant 0 : i32
    %c0_i32_1 = arith.constant 0 : i32
    return %c0_i32, %c0_i32_0 : i32, i32
  }
  func.func @transform_7(%arg0: i32) -> (i32, i32) {
    %c0_i32 = arith.constant 0 : i32
    %c0_i32_0 = arith.constant 0 : i32
    %c0_i32_1 = arith.constant 0 : i32
    return %c0_i32, %c0_i32_0 : i32, i32
  }
  func.func @transform_8(%arg0: i32) -> (i32, i32) {
    %c0_i32 = arith.constant 0 : i32
    %c0_i32_0 = arith.constant 0 : i32
    %c0_i32_1 = arith.constant 0 : i32
    return %c0_i32, %c0_i32_0 : i32, i32
  }
  func.func @transform_9(%arg0: i32) -> (i32, i32, i32) {
    %c0_i32 = arith.constant 0 : i32
    %c0_i32_0 = arith.constant 0 : i32
    %c0_i32_1 = arith.constant 0 : i32
    return %arg0, %c0_i32, %c0_i32_0 : i32, i32, i32
  }
}

module attributes {stable_mosaic.version = 11 : i64} {
  func.func @kernel(%arg0: i32, %arg1: memref<1x128x128xf32, #tpu.memory_space<vmem>>, %arg2: memref<128x128xbf16, #tpu.memory_space<vmem>>, %arg3: memref<128x1xf32, #tpu.memory_space<vmem>>, %arg4: memref<128x128xbf16, #tpu.memory_space<vmem>>, %arg5: memref<128x1xf32, #tpu.memory_space<vmem>>, %arg6: memref<128x128xbf16, #tpu.memory_space<vmem>>, %arg7: memref<1x128xf32, #tpu.memory_space<vmem>>, %arg8: memref<128x128xbf16, #tpu.memory_space<vmem>>, %arg9: memref<1x128xf32, #tpu.memory_space<vmem>>, %arg10: memref<1x128x128xf32, #tpu.memory_space<vmem>>) attributes {dimension_semantics = [#tpu.dimension_semantics<parallel>], iteration_bounds = array<i64: 2>, scalar_prefetch = 0 : i64, scratch_operands = 0 : i64, tpu.core_type = #tpu.core_type<tc>, window_params = [{transform_indices = @transform_0, window_bounds = array<i64: 1, 128, 128>}, {pipeline_mode = #tpu.pipeline_mode<synchronous>, transform_indices = @transform_1, window_bounds = array<i64: 128, 128>}, {pipeline_mode = #tpu.pipeline_mode<synchronous>, transform_indices = @transform_2, window_bounds = array<i64: 128, 1>}, {pipeline_mode = #tpu.pipeline_mode<synchronous>, transform_indices = @transform_3, window_bounds = array<i64: 128, 128>}, {pipeline_mode = #tpu.pipeline_mode<synchronous>, transform_indices = @transform_4, window_bounds = array<i64: 128, 1>}, {pipeline_mode = #tpu.pipeline_mode<synchronous>, transform_indices = @transform_5, window_bounds = array<i64: 128, 128>}, {pipeline_mode = #tpu.pipeline_mode<synchronous>, transform_indices = @transform_6, window_bounds = array<i64: 1, 128>}, {pipeline_mode = #tpu.pipeline_mode<synchronous>, transform_indices = @transform_7, window_bounds = array<i64: 128, 128>}, {pipeline_mode = #tpu.pipeline_mode<synchronous>, transform_indices = @transform_8, window_bounds = array<i64: 1, 128>}, {transform_indices = @transform_9, window_bounds = array<i64: 1, 128, 128>}]} {
    %c0 = arith.constant 0 : index
    %c0_0 = arith.constant 0 : index
    %c0_1 = arith.constant 0 : index
    %0 = vector.load %arg1[%c0, %c0_0, %c0_1] : memref<1x128x128xf32, #tpu.memory_space<vmem>>, vector<1x128x128xf32>
    %1 = vector.shape_cast %0 : vector<1x128x128xf32> to vector<128x128xf32>
    %cst = arith.constant dense<0.000000e+00> : vector<128xf32>
    %2 = vector.multi_reduction <add>, %1, %cst [1] : vector<128x128xf32> to vector<128xf32>
    %3 = vector.shape_cast %2 : vector<128xf32> to vector<128x1xf32>
    %4 = arith.mulf %1, %1 : vector<128x128xf32>
    %cst_2 = arith.constant dense<0.000000e+00> : vector<128xf32>
    %5 = vector.multi_reduction <add>, %4, %cst_2 [1] : vector<128x128xf32> to vector<128xf32>
    %6 = vector.shape_cast %5 : vector<128xf32> to vector<128x1xf32>
    %cst_3 = arith.constant 6.250000e-02 : f32
    %7 = vector.broadcast %cst_3 : f32 to vector<128x1xf32>
    %8 = arith.mulf %3, %7 : vector<128x1xf32>
    %cst_4 = arith.constant 6.250000e-02 : f32
    %9 = vector.broadcast %cst_4 : f32 to vector<128x1xf32>
    %10 = arith.mulf %6, %9 : vector<128x1xf32>
    %11 = arith.mulf %8, %8 : vector<128x1xf32>
    %12 = arith.subf %10, %11 : vector<128x1xf32>
    %cst_5 = arith.constant 0.000000e+00 : f32
    %13 = vector.broadcast %cst_5 : f32 to vector<128x1xf32>
    %14 = arith.maximumf %12, %13 : vector<128x1xf32>
    %15 = vector.broadcast %8 : vector<128x1xf32> to vector<128x128xf32>
    %16 = arith.subf %1, %15 : vector<128x128xf32>
    %cst_6 = arith.constant 9.99999974E-6 : f32
    %17 = vector.broadcast %cst_6 : f32 to vector<128x1xf32>
    %18 = arith.addf %14, %17 : vector<128x1xf32>
    %19 = math.rsqrt %18 : vector<128x1xf32>
    %20 = vector.broadcast %19 : vector<128x1xf32> to vector<128x128xf32>
    %21 = arith.mulf %16, %20 : vector<128x128xf32>
    %22 = arith.truncf %21 : vector<128x128xf32> to vector<128x128xbf16>
    %c0_7 = arith.constant 0 : index
    %c0_8 = arith.constant 0 : index
    %23 = vector.load %arg2[%c0_7, %c0_8] : memref<128x128xbf16, #tpu.memory_space<vmem>>, vector<128x128xbf16>
    %c0_9 = arith.constant 0 : index
    %c0_10 = arith.constant 0 : index
    %24 = vector.load %arg4[%c0_9, %c0_10] : memref<128x128xbf16, #tpu.memory_space<vmem>>, vector<128x128xbf16>
    %c0_11 = arith.constant 0 : index
    %c0_12 = arith.constant 0 : index
    %25 = vector.load %arg3[%c0_11, %c0_12] : memref<128x1xf32, #tpu.memory_space<vmem>>, vector<128x1xf32>
    %c0_13 = arith.constant 0 : index
    %c0_14 = arith.constant 0 : index
    %26 = vector.load %arg5[%c0_13, %c0_14] : memref<128x1xf32, #tpu.memory_space<vmem>>, vector<128x1xf32>
    %cst_15 = arith.constant dense<0.000000e+00> : vector<128x128xf32>
    %27 = tpu.matmul %23, %22, %cst_15 {dimension_numbers = #tpu.dot_dimension_numbers<[1], [0], [0], [1], [0, 0, 1, 1], [], []>} : vector<128x128xbf16>, vector<128x128xbf16>, vector<128x128xf32> -> vector<128x128xf32>
    %28 = vector.broadcast %25 : vector<128x1xf32> to vector<128x128xf32>
    %29 = arith.addf %27, %28 : vector<128x128xf32>
    %cst_16 = arith.constant 5.000000e-01 : f32
    %30 = vector.broadcast %cst_16 : f32 to vector<128x128xf32>
    %31 = arith.mulf %30, %29 : vector<128x128xf32>
    %cst_17 = arith.constant 0.707106769 : f32
    %32 = vector.broadcast %cst_17 : f32 to vector<128x128xf32>
    %33 = arith.mulf %29, %32 : vector<128x128xf32>
    %34 = math.erf %33 : vector<128x128xf32>
    %cst_18 = arith.constant 1.000000e+00 : f32
    %35 = vector.broadcast %cst_18 : f32 to vector<128x128xf32>
    %36 = arith.addf %35, %34 : vector<128x128xf32>
    %37 = arith.mulf %31, %36 : vector<128x128xf32>
    %38 = arith.truncf %37 : vector<128x128xf32> to vector<128x128xbf16>
    %cst_19 = arith.constant dense<0.000000e+00> : vector<128x128xf32>
    %39 = tpu.matmul %24, %38, %cst_19 {dimension_numbers = #tpu.dot_dimension_numbers<[1], [0], [0], [1], [0, 0, 1, 1], [], []>} : vector<128x128xbf16>, vector<128x128xbf16>, vector<128x128xf32> -> vector<128x128xf32>
    %40 = vector.broadcast %26 : vector<128x1xf32> to vector<128x128xf32>
    %41 = arith.addf %39, %40 : vector<128x128xf32>
    %42 = arith.addf %1, %41 : vector<128x128xf32>
    %43 = tpu.iota {dimensions = array<i32: 1>} : vector<1x128xi32>
    %c16_i32 = arith.constant 16 : i32
    %44 = vector.broadcast %c16_i32 : i32 to vector<1x128xi32>
    %45 = arith.cmpi slt, %43, %44 : vector<1x128xi32>
    %cst_20 = arith.constant 0.000000e+00 : f32
    %46 = vector.shape_cast %45 : vector<1x128xi1> to vector<1x128xi1>
    %47 = vector.broadcast %46 : vector<1x128xi1> to vector<128x128xi1>
    %48 = vector.broadcast %cst_20 : f32 to vector<128x128xf32>
    %49 = arith.select %47, %42, %48 : vector<128x128xi1>, vector<128x128xf32>
    %cst_21 = arith.constant dense<0.000000e+00> : vector<128xf32>
    %50 = vector.multi_reduction <add>, %49, %cst_21 [1] : vector<128x128xf32> to vector<128xf32>
    %51 = vector.shape_cast %50 : vector<128xf32> to vector<128x1xf32>
    %52 = arith.mulf %49, %49 : vector<128x128xf32>
    %cst_22 = arith.constant dense<0.000000e+00> : vector<128xf32>
    %53 = vector.multi_reduction <add>, %52, %cst_22 [1] : vector<128x128xf32> to vector<128xf32>
    %54 = vector.shape_cast %53 : vector<128xf32> to vector<128x1xf32>
    %cst_23 = arith.constant 6.250000e-02 : f32
    %55 = vector.broadcast %cst_23 : f32 to vector<128x1xf32>
    %56 = arith.mulf %51, %55 : vector<128x1xf32>
    %cst_24 = arith.constant 6.250000e-02 : f32
    %57 = vector.broadcast %cst_24 : f32 to vector<128x1xf32>
    %58 = arith.mulf %54, %57 : vector<128x1xf32>
    %59 = arith.mulf %56, %56 : vector<128x1xf32>
    %60 = arith.subf %58, %59 : vector<128x1xf32>
    %cst_25 = arith.constant 0.000000e+00 : f32
    %61 = vector.broadcast %cst_25 : f32 to vector<128x1xf32>
    %62 = arith.maximumf %60, %61 : vector<128x1xf32>
    %63 = vector.broadcast %56 : vector<128x1xf32> to vector<128x128xf32>
    %64 = arith.subf %49, %63 : vector<128x128xf32>
    %cst_26 = arith.constant 9.99999974E-6 : f32
    %65 = vector.broadcast %cst_26 : f32 to vector<128x1xf32>
    %66 = arith.addf %62, %65 : vector<128x1xf32>
    %67 = math.rsqrt %66 : vector<128x1xf32>
    %68 = vector.broadcast %67 : vector<128x1xf32> to vector<128x128xf32>
    %69 = arith.mulf %64, %68 : vector<128x128xf32>
    %70 = arith.truncf %69 : vector<128x128xf32> to vector<128x128xbf16>
    %c0_27 = arith.constant 0 : index
    %c0_28 = arith.constant 0 : index
    %71 = vector.load %arg6[%c0_27, %c0_28] : memref<128x128xbf16, #tpu.memory_space<vmem>>, vector<128x128xbf16>
    %cst_29 = arith.constant dense<0.000000e+00> : vector<128x128xf32>
    %72 = tpu.matmul %70, %71, %cst_29 {dimension_numbers = #tpu.dot_dimension_numbers<[1], [0], [0], [1], [0, 0, 1, 1], [], []>} : vector<128x128xbf16>, vector<128x128xbf16>, vector<128x128xf32> -> vector<128x128xf32>
    %c0_30 = arith.constant 0 : index
    %c0_31 = arith.constant 0 : index
    %73 = vector.load %arg7[%c0_30, %c0_31] : memref<1x128xf32, #tpu.memory_space<vmem>>, vector<1x128xf32>
    %74 = vector.broadcast %73 : vector<1x128xf32> to vector<128x128xf32>
    %75 = arith.addf %72, %74 : vector<128x128xf32>
    %cst_32 = arith.constant 5.000000e-01 : f32
    %76 = vector.broadcast %cst_32 : f32 to vector<128x128xf32>
    %77 = arith.mulf %76, %75 : vector<128x128xf32>
    %cst_33 = arith.constant 0.707106769 : f32
    %78 = vector.broadcast %cst_33 : f32 to vector<128x128xf32>
    %79 = arith.mulf %75, %78 : vector<128x128xf32>
    %80 = math.erf %79 : vector<128x128xf32>
    %cst_34 = arith.constant 1.000000e+00 : f32
    %81 = vector.broadcast %cst_34 : f32 to vector<128x128xf32>
    %82 = arith.addf %81, %80 : vector<128x128xf32>
    %83 = arith.mulf %77, %82 : vector<128x128xf32>
    %84 = arith.truncf %83 : vector<128x128xf32> to vector<128x128xbf16>
    %c0_35 = arith.constant 0 : index
    %c0_36 = arith.constant 0 : index
    %85 = vector.load %arg8[%c0_35, %c0_36] : memref<128x128xbf16, #tpu.memory_space<vmem>>, vector<128x128xbf16>
    %cst_37 = arith.constant dense<0.000000e+00> : vector<128x128xf32>
    %86 = tpu.matmul %84, %85, %cst_37 {dimension_numbers = #tpu.dot_dimension_numbers<[1], [0], [0], [1], [0, 0, 1, 1], [], []>} : vector<128x128xbf16>, vector<128x128xbf16>, vector<128x128xf32> -> vector<128x128xf32>
    %c0_38 = arith.constant 0 : index
    %c0_39 = arith.constant 0 : index
    %87 = vector.load %arg9[%c0_38, %c0_39] : memref<1x128xf32, #tpu.memory_space<vmem>>, vector<1x128xf32>
    %88 = vector.broadcast %87 : vector<1x128xf32> to vector<128x128xf32>
    %89 = arith.addf %86, %88 : vector<128x128xf32>
    %90 = arith.addf %49, %89 : vector<128x128xf32>
    %91 = vector.shape_cast %90 : vector<128x128xf32> to vector<1x128x128xf32>
    %c0_40 = arith.constant 0 : index
    %c0_41 = arith.constant 0 : index
    %c0_42 = arith.constant 0 : index
    %92 = vector.load %arg10[%c0_40, %c0_41, %c0_42] : memref<1x128x128xf32, #tpu.memory_space<vmem>>, vector<1x128x128xf32>
    tpu.vector_store %arg10[%c0_40, %c0_41, %c0_42], %91 {strides = array<i32>} : memref<1x128x128xf32, #tpu.memory_space<vmem>>, vector<1x128x128xf32>,
    return
  }
  func.func @transform_0(%arg0: i32) -> (i32, i32, i32) {
    %c0_i32 = arith.constant 0 : i32
    %c0_i32_0 = arith.constant 0 : i32
    %c0_i32_1 = arith.constant 0 : i32
    return %arg0, %c0_i32, %c0_i32_0 : i32, i32, i32
  }
  func.func @transform_1(%arg0: i32) -> (i32, i32) {
    %c0_i32 = arith.constant 0 : i32
    %c0_i32_0 = arith.constant 0 : i32
    %c0_i32_1 = arith.constant 0 : i32
    return %c0_i32, %c0_i32_0 : i32, i32
  }
  func.func @transform_2(%arg0: i32) -> (i32, i32) {
    %c0_i32 = arith.constant 0 : i32
    %c0_i32_0 = arith.constant 0 : i32
    %c0_i32_1 = arith.constant 0 : i32
    return %c0_i32, %c0_i32_0 : i32, i32
  }
  func.func @transform_3(%arg0: i32) -> (i32, i32) {
    %c0_i32 = arith.constant 0 : i32
    %c0_i32_0 = arith.constant 0 : i32
    %c0_i32_1 = arith.constant 0 : i32
    return %c0_i32, %c0_i32_0 : i32, i32
  }
  func.func @transform_4(%arg0: i32) -> (i32, i32) {
    %c0_i32 = arith.constant 0 : i32
    %c0_i32_0 = arith.constant 0 : i32
    %c0_i32_1 = arith.constant 0 : i32
    return %c0_i32, %c0_i32_0 : i32, i32
  }
  func.func @transform_5(%arg0: i32) -> (i32, i32) {
    %c0_i32 = arith.constant 0 : i32
    %c0_i32_0 = arith.constant 0 : i32
    %c0_i32_1 = arith.constant 0 : i32
    return %c0_i32, %c0_i32_0 : i32, i32
  }
  func.func @transform_6(%arg0: i32) -> (i32, i32) {
    %c0_i32 = arith.constant 0 : i32
    %c0_i32_0 = arith.constant 0 : i32
    %c0_i32_1 = arith.constant 0 : i32
    return %c0_i32, %c0_i32_0 : i32, i32
  }
  func.func @transform_7(%arg0: i32) -> (i32, i32) {
    %c0_i32 = arith.constant 0 : i32
    %c0_i32_0 = arith.constant 0 : i32
    %c0_i32_1 = arith.constant 0 : i32
    return %c0_i32, %c0_i32_0 : i32, i32
  }
  func.func @transform_8(%arg0: i32) -> (i32, i32) {
    %c0_i32 = arith.constant 0 : i32
    %c0_i32_0 = arith.constant 0 : i32
    %c0_i32_1 = arith.constant 0 : i32
    return %c0_i32, %c0_i32_0 : i32, i32
  }
  func.func @transform_9(%arg0: i32) -> (i32, i32, i32) {
    %c0_i32 = arith.constant 0 : i32
    %c0_i32_0 = arith.constant 0 : i32
    %c0_i32_1 = arith.constant 0 : i32
    return %arg0, %c0_i32, %c0_i32_0 : i32, i32, i32
  }
}

</mosaic_0001>

<bundles_post_ra>
// kernel: tpu_custom_call.1
= control target key start
LH: loop header
LB: loop body
LE: loop exit
PB: predicated region body
PF: predicated region fallthrough
CT: control target
= control target key end

     0   :  { %14 = vsyncpa [#allocation3], 0  ;;  %s3655_s0 = inlined_call_operand.vmem [shape: f32[2,128,128], index: 0, kind: input, shape index: {}]   ;;  %s3656_s1 = inlined_call_operand.hbm [shape: bf16[128,128], index: 1, kind: input, shape index: {}]   ;;  %s3657_s2 = inlined_call_operand.vmem [shape: f32[128,1], index: 2, kind: input, shape index: {}]   ;;  %s3658_s3 = inlined_call_operand.hbm [shape: bf16[128,128], index: 3, kind: input, shape index: {}]   ;;  %s3659_s4 = inlined_call_operand.vmem [shape: f32[128,1], index: 4, kind: input, shape index: {}]   ;;  %s3660_s5 = inlined_call_operand.hbm [shape: bf16[128,128], index: 5, kind: input, shape index: {}]   ;;  %s3661_s6 = inlined_call_operand.vmem [shape: f32[1,128], index: 6, kind: input, shape index: {}]   ;;  %s3662_s7 = inlined_call_operand.hbm [shape: bf16[128,128], index: 7, kind: input, shape index: {}]   ;;  %s3663_s8 = inlined_call_operand.vmem [shape: f32[1,128], index: 8, kind: input, shape index: {}]   ;;  %s3664_s9 = inlined_call_operand.hbm [shape: f32[2,128,128], index: 9, kind: output, shape index: {}]  }
   0x1   :  { %15 = vsyncpa [#allocation6], 0 }
   0x2   :  { %16 = vsyncpa [#allocation9], 0 }
   0x3   :  { %17 = vsyncpa [#allocation4], 0 }
   0x4   :  { %19 = vsyncpa [#allocation4 + $0x1], 0  ;;  %s2842_s30 = smov 0   ;;  %s2844_s10 = smov 0  }
   0x5   :  { %s2846_s11 = smov 0   ;;  %s2848_s12 = smov 0  }
   0x6 LB: > { %3673 = sst [smem:[#allocation15_spill]] %s2768_s30  ;;  %s2863_s13 = sadd.s32 4294967295, %s2780_s12   ;;  %s2780_s12 = sphi %s2848_s12, %s3694_s12   ;;  %s2776_s11 = sphi %s2846_s11, %s3696_s11   ;;  %s2772_s10 = sphi %s2844_s10, %s3698_s10   ;;  %s2768_s30 = sphi %s2842_s30, %s3697_s30  }
   0x7   : > { %3674 = sst [smem:[#allocation16_spill]] %s2776_s11  ;;  %s2083_s14 = sadd.s32 4294967294, %s2780_s12  }
   0x8   : > { %s2867_s15 = sadd.s32 1, %s2780_s12   ;;  %s226_s16 = sadd.s32 1, %s2776_s11 }
   0x9   : > { %3675 = sst [smem:[#allocation17_spill]] %s2867_s15  ;;  %s223_s17 = ssub.s32 %s2780_s12, %s2867_s15 }
   0xa   : > { %p236_p0 = scmp.ne.s32.totalorder %s2776_s11, %s2772_s10  ;;  %p224_p1 = scmp.eq.s32.totalorder %s223_s17, 0 }
   0xb   : > { %p237_p2 = scmp.eq.s32.totalorder %s2863_s13, 1  ;;  %p242_p3 = scmp.ne.s32.totalorder %s2772_s10, %s2768_s30 }
   0xc   : > { %p243_p4 = scmp.eq.s32.totalorder %s2083_s14, 1  ;;  %p2084_p7 = scmp.ge.s32.totalorder %s2780_s12, 1 }
   0xd   : > { %s2878_s18 = scalar_select %p224_p1, %s2776_s11, %s226_s16  }
   0xe   : > { %p2880_p5 = por %p237_p2, %p236_p0  ;;  %p2884_p6 = por %p243_p4, %p242_p3 }
   0xf   : > { %3676 = sst [smem:[#allocation18_spill]] %s2878_s18  ;;  %p250_p8 = scmp.lt.s32.totalorder %s2780_s12, 3 }
  0x10   : > { %s3677_s19 = scalar_select %p2880_p5, 1, 0 }
  0x11   : > { %s3678_s20 = scalar_select %p2884_p6, 1, 0 }
  0x12   : > { %p3665_p9 = scmp.eq.s32.totalorder %s2863_s13, 0  ;;  %p2891_p10 = pnand %p2084_p7, %p250_p8 }
  0x13   : > { %3679 = sst [smem:[#allocation19_spill]] %s3678_s20  ;;  %s2782_s22 = smov [#allocation5]  }
  0x14   : > { %s3680_s21 = scalar_select %p2891_p10, 1, 0 }
  0x15   : > { %p2349_p11 = pneg %p2891_p10  ;;  %s278_s23 = sshll.u32 %s2782_s22, 4  ;;  %s2897_s23 = int_to_ptr.vmem [resolvable:$true] %s278_s23 }
  0x16   : > { %s2783_s25 = smov [#allocation2]   ;;  %s2784_s27 = smov [#allocation7]  }
  0x17   : > { %p2901_p12 = pnand %p3665_p9, %p2349_p11  ;;  %s262_s26 = sshll.u32 %s2783_s25, 4  ;;  %s2905_s26 = int_to_ptr.vmem [resolvable:$true] %s262_s26 }
  0x18   : > { %s2907_s28 = sshll.u32 %s2784_s27, 4  ;;  %s2594_s16 = scalar_lea.hbm %s3658_s3, 1024  ;;  %s295_s28 = int_to_ptr.vmem [resolvable:$true] %s2907_s28 }
  0x19   : > { %p2595_p13 = scmp.ne.s32.totalorder %s3658_s3, %s2594_s16  ;;  %p2917_p0 = pneg %p2901_p12 }
  0x1a   : > { %p2601_p3 = scmp.lt.u32.totalorder %s2594_s16, %s3658_s3 }
  0x1b   : > { %p2597_p1 = pnand %p2917_p0, %p2595_p13 }
  0x1d   : > { %p2598_p2 = pneg %p2597_p1 }
  0x1f   : > { %p2603_p4 = pnand %p2601_p3, %p2598_p2 }
  0x21   : > { %2606 = shalt.err (!%p2603_p4)
}
  0x22   : > { %s2607_s29 = scalar_lea.vmem %s2897_s23, 1024  ;;  %p2615_p9 = scmp.lt.s32.totalorder %s2897_s23, %s2897_s23 }
  0x23   : > { %p2608_p7 = scmp.ne.s32.totalorder %s2897_s23, %s2607_s29  ;;  %p2616_p6 = scmp.lt.s32.totalorder %s2607_s29, %s2607_s29 }
  0x25   : > { %p2610_p8 = pnand %p2608_p7, %p2917_p0  ;;  %p2617_p13 = por %p2616_p6, %p2615_p9 }
  0x27   : > { %p2611_p11 = pneg %p2610_p8 }
  0x29   : > { %p2618_p1 = pnand %p2617_p13, %p2611_p11 }
  0x2b   : > { %2621 = shalt.err (!%p2618_p1)
}
  0x2c   : > { %s2785_s14 = smov 64   ;;  %s2786_s16 = smov 4  }
  0x2d   : > { %2355 = dma.hbm_to_vmem [thread:$0]  (!%p2901_p12), %s3658_s3, 1024, %s2897_s23, [#allocation6], %s2785_s14, %s2785_s14, %s2786_s16  }
  0x2e   : > { %s2622_s29 = scalar_lea.hbm %s3656_s1, 1024 }
  0x2f   : > { %p2623_p6 = scmp.ne.s32.totalorder %s3656_s1, %s2622_s29  ;;  %p2629_p3 = scmp.lt.u32.totalorder %s2622_s29, %s3656_s1 }
  0x31   : > { %p2625_p9 = pnand %p2623_p6, %p2917_p0 }
  0x33   : > { %p2626_p2 = pneg %p2625_p9 }
  0x35   : > { %p2631_p4 = pnand %p2629_p3, %p2626_p2 }
  0x37   : > { %2634 = shalt.err (!%p2631_p4)
}
  0x38   : > { %s2635_s23 = scalar_lea.vmem %s2905_s26, 1024  ;;  %p2643_p13 = scmp.lt.s32.totalorder %s2905_s26, %s2905_s26 }
  0x39   : > { %p2636_p7 = scmp.ne.s32.totalorder %s2905_s26, %s2635_s23  ;;  %p2644_p1 = scmp.lt.s32.totalorder %s2635_s23, %s2635_s23 }
  0x3b   : > { %p2638_p8 = pnand %p2636_p7, %p2917_p0  ;;  %p2645_p6 = por %p2644_p1, %p2643_p13 }
  0x3d   : > { %p2639_p11 = pneg %p2638_p8 }
  0x3f   : > { %p2646_p9 = pnand %p2645_p6, %p2639_p11 }
  0x41   : > { %2649 = shalt.err (!%p2646_p9)
}
  0x42   : > { %2352 = dma.hbm_to_vmem [thread:$0]  (!%p2901_p12), %s3656_s1, 1024, %s2905_s26, [#allocation3], %s2785_s14, %s2785_s14, %s2786_s16  }
  0x43   : > { %s2650_s17 = scalar_lea.hbm %s3660_s5, 1024 }
  0x44   : > { %p2651_p2 = scmp.ne.s32.totalorder %s3660_s5, %s2650_s17  ;;  %p2657_p7 = scmp.lt.u32.totalorder %s2650_s17, %s3660_s5 }
  0x46   : > { %p2653_p3 = pnand %p2651_p2, %p2917_p0 }
  0x48   : > { %p2654_p4 = pneg %p2653_p3 }
  0x4a   : > { %p2659_p8 = pnand %p2657_p7, %p2654_p4 }
  0x4c   : > { %2662 = shalt.err (!%p2659_p8)
}
  0x4d   : > { %s2663_s23 = scalar_lea.vmem %s295_s28, 1024  ;;  %p2671_p6 = scmp.lt.s32.totalorder %s295_s28, %s295_s28 }
  0x4e   : > { %p2664_p11 = scmp.ne.s32.totalorder %s295_s28, %s2663_s23  ;;  %p2672_p9 = scmp.lt.s32.totalorder %s2663_s23, %s2663_s23 }
  0x50   : > { %p2666_p13 = pnand %p2664_p11, %p2917_p0  ;;  %p2673_p5 = por %p2672_p9, %p2671_p6 }
  0x52   : > { %p2667_p1 = pneg %p2666_p13 }
  0x54   : > { %p2674_p10 = pnand %p2673_p5, %p2667_p1 }
  0x56   : > { %2677 = shalt.err (!%p2674_p10)
}
  0x57   : > { %2358 = dma.hbm_to_vmem [thread:$0]  (!%p2901_p12), %s3660_s5, 1024, %s295_s28, [#allocation6], %s2785_s14, %s2785_s14, %s2786_s16  }
  0x58   : > { %s2787_s11 = smov [#allocation8]   ;;  %s2678_s22 = scalar_lea.hbm %s3662_s7, 1024 }
  0x59   : > { %s310_s15 = sshll.u32 %s2787_s11, 4  ;;  %p2679_p5 = scmp.ne.s32.totalorder %s3662_s7, %s2678_s22  ;;  %s311_s15 = int_to_ptr.vmem [resolvable:$true] %s310_s15 }
  0x5a   : > { %p2685_p3 = scmp.lt.u32.totalorder %s2678_s22, %s3662_s7 }
  0x5b   : > { %p2681_p10 = pnand %p2679_p5, %p2917_p0 }
  0x5d   : > { %p2682_p2 = pneg %p2681_p10 }
  0x5f   : > { %p2687_p4 = pnand %p2685_p3, %p2682_p2 }
  0x61   : > { %2690 = shalt.err (!%p2687_p4)
}
  0x62   : > { %s2691_s28 = scalar_lea.vmem %s311_s15, 1024  ;;  %p2699_p13 = scmp.lt.s32.totalorder %s311_s15, %s311_s15 }
  0x63   : > { %p2692_p7 = scmp.ne.s32.totalorder %s311_s15, %s2691_s28  ;;  %p2700_p1 = scmp.lt.s32.totalorder %s2691_s28, %s2691_s28 }
  0x65   : > { %p2694_p8 = pnand %p2692_p7, %p2917_p0  ;;  %p2701_p6 = por %p2700_p1, %p2699_p13 }
  0x67   : > { %p2695_p11 = pneg %p2694_p8 }
  0x69   : > { %p2702_p9 = pnand %p2701_p6, %p2695_p11 }
  0x6b   : > { %2705 = shalt.err (!%p2702_p9)
}
  0x6c   : > { %2361 = dma.hbm_to_vmem [thread:$0]  (!%p2901_p12), %s3662_s7, 1024, %s311_s15, [#allocation9], %s2785_s14, %s2785_s14, %s2786_s16  }
  0x6d   : > { %p3683_p5 = scmp.ne.s32.totalorder %s3680_s21, 0 }
  0x6e   : > { %p3684_p0 = scmp.eq.s32.totalorder (!%p3683_p5), %s2863_s13, 0 }
  0x6f   : > { %337 = sbr.rel (%p3683_p5) target bundleno = 1544 (0x608), region = 56 }
  0x76   : > { %2751 = dma.done.wait (%p3684_p0), [#allocation3], 1024   ;;  %p3685_p10 = pmov %p3684_p0 }
  0x77   : > { %p3686_p2 = pmov %p3684_p0 }
  0x78   : > { %2753 = vsyncadd (%p3685_p10), [#allocation3], 4294966272 }
  0x79   : > { %2755 = dma.done.wait (%p3686_p2), [#allocation6], 2048   ;;  %p3687_p3 = pmov %p3684_p0 }
  0x7a   : > { %p3688_p4 = pmov %p3684_p0 }
  0x7b   : > { %2757 = vsyncadd (%p3687_p3), [#allocation6], 4294965248 }
  0x7c   : > { %2759 = dma.done.wait (%p3688_p4), [#allocation9], 1024   ;;  %p3689_p12 = pmov %p3684_p0 }
  0x7d   : > { %p385_p7 = scmp.lt.s32.totalorder %s2863_s13, 1  ;;  %v2418_v32 = vld [vmem:[#allocation2] sm:$0xff]   ;;  %v672_v33 = vld [vmem:[%s3657_s2 + $0x8] sm:$0xff]  ;;  %v2788_v34 = vmov 0   ;;  %v673_v35 = vld [vmem:[%s3657_s2 + $0x10] sm:$0xff]  ;;  %s382_s15 = sand.u32 1, %s2772_s10  }
  0x7e   : > { %2761 = vsyncadd (%p3689_p12), [#allocation9], 4294966272  ;;  %2219 = vmatprep.mubr.bf16.mxu0 %v2418_v32  ;;  %2417 = vset.pattern.permute.xlu1 %v2788_v34  ;;  %v674_v36 = vld [vmem:[%s3657_s2 + $0x18] sm:$0xff]  ;;  %v675_v37 = vld [vmem:[%s3657_s2 + $0x20] sm:$0xff]  ;;  %s2095_s22 = sshll.u32 %s382_s15, 7  ;;  %s2138_s27 = sshll.u32 %s2863_s13, 11 }
  0x7f   : > { %s386_s18 = scalar_select %p385_p7, %s2863_s13, 1  ;;  %2416 = vset.pattern.permute.xlu0 %v2788_v34  ;;  %v676_v38 = vld [vmem:[%s3657_s2 + $0x28] sm:$0xff]  ;;  %v677_v39 = vld [vmem:[%s3657_s2 + $0x30] sm:$0xff]  ;;  %v678_v40 = vld [vmem:[%s3657_s2 + $0x38] sm:$0xff] }
  0x80   : > { %v671_v41 = vld [vmem:[%s3657_s2] sm:$0xff]  ;;  %v680_v43 = vld [vmem:[%s3657_s2 + $0x48] sm:$0xff]  ;;  %v681_v44 = vld [vmem:[%s3657_s2 + $0x50] sm:$0xff]  ;;  %s3571_s25 = scalar_lea.vmem [#allocation10], %s2095_s22  ;;  %s3604_s26 = scalar_lea.hbm %s3664_s9, %s2138_s27 }
  0x81   : > { %s2137_s21 = sshll.u32 %s386_s18, 7  ;;  %v679_v42 = vld [vmem:[%s3657_s2 + $0x40] sm:$0xff]  ;;  %v682_v45 = vld [vmem:[%s3657_s2 + $0x58] sm:$0xff]  ;;  %v684_v47 = vld [vmem:[%s3657_s2 + $0x68] sm:$0xff]  ;;  %s1980_s29 = sshll.u32 %s3571_s25, 4  ;;  %s3606_s29 = int_to_ptr.vmem [resolvable:$true] %s1980_s29 }
  0x82   : > { %s3029_s16 = scalar_lea.vmem %s3655_s0, %s2137_s21  ;;  %v683_v46 = vld [vmem:[%s3657_s2 + $0x60] sm:$0xff]  ;;  %v685_v50 = vld [vmem:[%s3657_s2 + $0x70] sm:$0xff]  ;;  %v686_v52 = vld [vmem:[%s3657_s2 + $0x78] sm:$0xff]  ;;  %s3614_s13 = scalar_lea.sflag [#allocation4], %s382_s15 }
  0x83   : > { %v3032_v0 = vld [vmem:[%s3029_s16 + $0x18] sm:$0xff]  ;;  %v3035_v1 = vld [vmem:[%s3029_s16] sm:$0xff]  ;;  %v3042_v3 = vld [vmem:[%s3029_s16 + $0x8] sm:$0xff]  ;;  %s2706_s30 = scalar_lea.vmem %s3606_s29, 2048  ;;  %p3690_p11 = scmp.ne.s32.totalorder %s3677_s19, 0 }
  0x84   : > { %413 = vadd.xlane.f32.xlu1 %v3032_v0  ;;  %407 = vadd.xlane.f32.xlu0 %v3035_v1  ;;  %v439_v2 = vmul.f32 %v3035_v1, %v3035_v1  ;;  %v3046_v4 = vld [vmem:[%s3029_s16 + $0x10] sm:$0xff]  ;;  %v440_v5 = vmul.f32 %v3042_v3, %v3042_v3  ;;  %v442_v7 = vmul.f32 %v3032_v0, %v3032_v0  ;;  %v3056_v8 = vld [vmem:[%s3029_s16 + $0x20] sm:$0xff]  ;;  %v3059_v9 = vld [vmem:[%s3029_s16 + $0x28] sm:$0xff]  ;;  %p2707_p8 = scmp.ne.s32.totalorder %s3606_s29, %s2706_s30  ;;  %s2789_s18 = smov [#allocation10]  }
  0x85   : > { %v441_v6 = vmul.f32 %v3046_v4, %v3046_v4  ;;  %v443_v10 = vmul.f32 %v3056_v8, %v3056_v8  ;;  %v444_v11 = vmul.f32 %v3059_v9, %v3059_v9  ;;  %v3068_v12 = vld [vmem:[%s3029_s16 + $0x30] sm:$0xff]  ;;  %v3071_v13 = vld [vmem:[%s3029_s16 + $0x38] sm:$0xff]  ;;  %v3080_v16 = vld [vmem:[%s3029_s16 + $0x40] sm:$0xff]  ;;  %s2710_s21 = sshll.u32 %s2789_s18, 4  ;;  %s2711_s21 = int_to_ptr.vmem [resolvable:$false] %s2710_s21 }
  0x86   : > { %v445_v14 = vmul.f32 %v3068_v12, %v3068_v12  ;;  %v446_v15 = vmul.f32 %v3071_v13, %v3071_v13  ;;  %v3083_v17 = vld [vmem:[%s3029_s16 + $0x48] sm:$0xff]  ;;  %v447_v18 = vmul.f32 %v3080_v16, %v3080_v16  ;;  %v3092_v20 = vld [vmem:[%s3029_s16 + $0x50] sm:$0xff]  ;;  %v3095_v21 = vld [vmem:[%s3029_s16 + $0x58] sm:$0xff]  ;;  %p2708_p13 = pnand %p2707_p8, %p3690_p11  ;;  %s2712_s24 = scalar_lea.vmem %s2711_s21, 4096 }
  0x87   : > { %v448_v19 = vmul.f32 %v3083_v17, %v3083_v17  ;;  %v449_v22 = vmul.f32 %v3092_v20, %v3092_v20  ;;  %v450_v23 = vmul.f32 %v3095_v21, %v3095_v21  ;;  %v3104_v24 = vld [vmem:[%s3029_s16 + $0x60] sm:$0xff]  ;;  %v3107_v25 = vld [vmem:[%s3029_s16 + $0x68] sm:$0xff]  ;;  %v3116_v28 = vld [vmem:[%s3029_s16 + $0x70] sm:$0xff]  ;;  %p2713_p6 = scmp.lt.s32.totalorder %s3606_s29, %s2711_s21  ;;  %p2714_p9 = scmp.lt.s32.totalorder %s2712_s24, %s2706_s30 }
  0x88   : > { %409 = vadd.xlane.f32.xlu0 %v3042_v3  ;;  %455 = vadd.xlane.f32.xlu1 %v439_v2  ;;  %v451_v26 = vmul.f32 %v3104_v24, %v3104_v24  ;;  %v452_v27 = vmul.f32 %v3107_v25, %v3107_v25  ;;  %v3119_v29 = vld [vmem:[%s3029_s16 + $0x78] sm:$0xff]  ;;  %v453_v30 = vmul.f32 %v3116_v28, %v3116_v28  ;;  %v687_v55 = vld [vmem:[%s3659_s4] sm:$0xff]  ;;  %v688_v59 = vld [vmem:[%s3659_s4 + $0x8] sm:$0xff]  ;;  %p2709_p1 = pneg %p2708_p13 }
  0x89   : > { %v454_v31 = vmul.f32 %v3119_v29, %v3119_v29  ;;  %v689_v2 = vld [vmem:[%s3659_s4 + $0x10] sm:$0xff]  ;;  %v692_v32 = vld [vmem:[%s3659_s4 + $0x28] sm:$0xff]  ;;  %p2715_p5 = por %p2714_p9, %p2713_p6 }
  0x8b   : > { %p2716_p0 = pnand %p2715_p5, %p2709_p1 }
  0x8c   : > { %411 = vadd.xlane.f32.xlu0 %v3046_v4  ;;  %457 = vadd.xlane.f32.xlu1 %v440_v5 }
  0x90   : > { %459 = vadd.xlane.f32.xlu0 %v441_v6  ;;  %461 = vadd.xlane.f32.xlu1 %v442_v7 }
  0x94   : > { %415 = vadd.xlane.f32.xlu0 %v3056_v8  ;;  %417 = vadd.xlane.f32.xlu1 %v3059_v9 }
  0x98   : > { %463 = vadd.xlane.f32.xlu0 %v443_v10  ;;  %465 = vadd.xlane.f32.xlu1 %v444_v11  ;;  %v690_v11 = vld [vmem:[%s3659_s4 + $0x18] sm:$0xff] }
  0x9c   : > { %419 = vadd.xlane.f32.xlu0 %v3068_v12  ;;  %421 = vadd.xlane.f32.xlu1 %v3071_v13 }
  0xa0   : > { %467 = vadd.xlane.f32.xlu0 %v445_v14  ;;  %469 = vadd.xlane.f32.xlu1 %v446_v15 }
  0xa4   : > { %423 = vadd.xlane.f32.xlu0 %v3080_v16  ;;  %425 = vadd.xlane.f32.xlu1 %v3083_v17 }
  0xa8   : > { %471 = vadd.xlane.f32.xlu0 %v447_v18  ;;  %473 = vadd.xlane.f32.xlu1 %v448_v19 }
  0xac   : > { %427 = vadd.xlane.f32.xlu0 %v3092_v20  ;;  %429 = vadd.xlane.f32.xlu1 %v3095_v21 }
  0xb0   : > { %475 = vadd.xlane.f32.xlu0 %v449_v22  ;;  %477 = vadd.xlane.f32.xlu1 %v450_v23  ;;  %v691_v23 = vld [vmem:[%s3659_s4 + $0x20] sm:$0xff] }
  0xb4   : > { %431 = vadd.xlane.f32.xlu0 %v3104_v24  ;;  %433 = vadd.xlane.f32.xlu1 %v3107_v25 }
  0xb8   : > { %479 = vadd.xlane.f32.xlu0 %v451_v26  ;;  %481 = vadd.xlane.f32.xlu1 %v452_v27 }
  0xbc   : > { %435 = vadd.xlane.f32.xlu0 %v3116_v28  ;;  %437 = vadd.xlane.f32.xlu1 %v3119_v29 }
  0xc0   : > { %483 = vadd.xlane.f32.xlu0 %v453_v30  ;;  %485 = vadd.xlane.f32.xlu1 %v454_v31 }
  0xd1   : > { %710 = vperm.xlu1 %2417, %v672_v33  }
  0xd5   : > { %715 = vperm.xlu1 %2417, %v673_v35  }
  0xd6   : > { %705 = vperm.xlu0 %2416, %v671_v41  }
  0xd9   : > { %720 = vperm.xlu1 %2417, %v674_v36  }
  0xda   : > { %750 = vperm.xlu0 %2416, %v680_v43  }
  0xdd   : > { %725 = vperm.xlu1 %2417, %v675_v37  }
  0xde   : > { %760 = vperm.xlu0 %2416, %v682_v45  }
  0xe1   : > { %730 = vperm.xlu1 %2417, %v676_v38   ;;  %v693_v38 = vld [vmem:[%s3659_s4 + $0x30] sm:$0xff] }
  0xe2   : > { %770 = vperm.xlu0 %2416, %v684_v47  }
  0xe5   : > { %735 = vperm.xlu1 %2417, %v677_v39  }
  0xe6   : > { %780 = vperm.xlu0 %2416, %v686_v52  }
  0xe9   : > { %740 = vperm.xlu1 %2417, %v678_v40  }
  0xea   : > { %1023 = vperm.xlu0 %2416, %v688_v59  }
  0xed   : > { %745 = vperm.xlu1 %2417, %v679_v42   ;;  %v694_v42 = vld [vmem:[%s3659_s4 + $0x38] sm:$0xff] }
  0xee   : > { %1033 = vperm.xlu0 %2416, %v690_v11  }
  0xf1   : > { %755 = vperm.xlu1 %2417, %v681_v44  }
  0xf2   : > { %1043 = vperm.xlu0 %2416, %v692_v32  }
  0xf5   : > { %765 = vperm.xlu1 %2417, %v683_v46  }
  0xf6   : > { %1053 = vperm.xlu0 %2416, %v694_v42  }
  0xf9   : > { %775 = vperm.xlu1 %2417, %v685_v50  }
  0xfd   : > { %1018 = vperm.xlu1 %2417, %v687_v55  }
 0x101   : > { %1028 = vperm.xlu1 %2417, %v689_v2  }
 0x105   : > { %1038 = vperm.xlu1 %2417, %v691_v23  }
 0x109   : > { %1048 = vperm.xlu1 %2417, %v693_v38  }
 0x111   : > { %v414_v48 = vpop.xlane.xlu1 %413  ;;  %v408_v49 = vpop.xlane.xlu0 %407 }
 0x112   : > { %v3172_v51 = vmul.f32 0.0625, %v408_v49  ;;  %v3187_v61 = vmul.f32 0.0625, %v414_v48  ;;  %v695_v49 = vld [vmem:[%s3659_s4 + $0x40] sm:$0xff] }
 0x113   : > { %1058 = vperm.xlu1 %2417, %v695_v49  }
 0x114   : > { %v519_v56 = vmul.f32 %v3172_v51, %v3172_v51  ;;  %v522_v18 = vmul.f32 %v3187_v61, %v3187_v61  ;;  %v567_v11 = vsub.f32 %v3035_v1, %v3172_v51  ;;  %v570_v38 = vsub.f32 %v3032_v0, %v3187_v61  ;;  %v702_v0 = vld [vmem:[%s3659_s4 + $0x78] sm:$0xff] }
 0x115   : > { %v410_v53 = vpop.xlane.xlu0 %409  ;;  %v456_v54 = vpop.xlane.xlu1 %455 }
 0x116   : > { %v3182_v57 = vmul.f32 0.0625, %v410_v53  ;;  %v503_v58 = vmul.f32 0.0625, %v456_v54  ;;  %v696_v54 = vld [vmem:[%s3659_s4 + $0x48] sm:$0xff] }
 0x117   : > { %1063 = vperm.xlu0 %2416, %v696_v54  }
 0x118   : > { %v535_v60 = vsub.f32 %v503_v58, %v519_v56  ;;  %v520_v5 = vmul.f32 %v3182_v57, %v3182_v57 }
 0x119   : > { %v412_v62 = vpop.xlane.xlu0 %411  ;;  %v458_v63 = vpop.xlane.xlu1 %457 }
 0x11a   : > { %v551_v6 = vmax.f32 %v535_v60, 0.0  ;;  %v3194_v7 = vmul.f32 0.0625, %v412_v62  ;;  %v504_v10 = vmul.f32 0.0625, %v458_v63  ;;  %v697_v60 = vld [vmem:[%s3659_s4 + $0x50] sm:$0xff] }
 0x11b   : > { %1068 = vperm.xlu1 %2417, %v697_v60  }
 0x11c   : > { %v583_v14 = vadd.f32 1e-05, %v551_v6  ;;  %v536_v15 = vsub.f32 %v504_v10, %v520_v5  ;;  %v521_v26 = vmul.f32 %v3194_v7, %v3194_v7  ;;  %v698_v10 = vld [vmem:[%s3659_s4 + $0x58] sm:$0xff]  ;;  %v569_v32 = vsub.f32 %v3046_v4, %v3194_v7 }
 0x11d   : > { %v460_v19 = vpop.xlane.xlu0 %459  ;;  %v462_v22 = vpop.xlane.xlu1 %461  ;;  %1073 = vperm.xlu0 %2416, %v698_v10  }
 0x11e   : > { %v552_v27 = vmax.f32 %v536_v15, 0.0  ;;  %v505_v30 = vmul.f32 0.0625, %v460_v19  ;;  %v506_v31 = vmul.f32 0.0625, %v462_v22  ;;  %2450 = vrsqrt.f32 %v583_v14 }
 0x11f   : > { %v568_v14 = vsub.f32 %v3042_v3, %v3182_v57  ;;  %v700_v57 = vld [vmem:[%s3659_s4 + $0x68] sm:$0xff] }
 0x120   : > { %v584_v33 = vadd.f32 1e-05, %v552_v27  ;;  %v537_v34 = vsub.f32 %v505_v30, %v521_v26  ;;  %v538_v35 = vsub.f32 %v506_v31, %v522_v18  ;;  %v699_v31 = vld [vmem:[%s3659_s4 + $0x60] sm:$0xff] }
 0x121   : > { %v416_v36 = vpop.xlane.xlu0 %415  ;;  %v418_v37 = vpop.xlane.xlu1 %417  ;;  %1078 = vperm.xlu1 %2417, %v699_v31   ;;  %1083 = vperm.xlu0 %2416, %v700_v57  }
 0x122   : > { %2452 = vrsqrt.f32 %v584_v33  ;;  %v553_v39 = vmax.f32 %v537_v34, 0.0  ;;  %v554_v40 = vmax.f32 %v538_v35, 0.0  ;;  %v3212_v41 = vmul.f32 0.0625, %v416_v36 }
 0x123   : > { %v3217_v43 = vmul.f32 0.0625, %v418_v37 }
 0x124   : > { %v585_v44 = vadd.f32 1e-05, %v553_v39  ;;  %v586_v45 = vadd.f32 1e-05, %v554_v40  ;;  %v523_v46 = vmul.f32 %v3212_v41, %v3212_v41 }
 0x125   : > { %v464_v47 = vpop.xlane.xlu0 %463  ;;  %v466_v48 = vpop.xlane.xlu1 %465  ;;  %v524_v50 = vmul.f32 %v3217_v43, %v3217_v43  ;;  %1093 = vperm.xlu0 %2416, %v702_v0  }
 0x126   : > { %2454 = vrsqrt.f32 %v585_v44  ;;  %v507_v52 = vmul.f32 0.0625, %v464_v47  ;;  %v508_v53 = vmul.f32 0.0625, %v466_v48  ;;  %v701_v44 = vld [vmem:[%s3659_s4 + $0x70] sm:$0xff] }
 0x127   : > { %2456 = vrsqrt.f32 %v586_v45  ;;  %1088 = vperm.xlu1 %2417, %v701_v44  }
 0x128   : > { %v539_v55 = vsub.f32 %v507_v52, %v523_v46  ;;  %v540_v56 = vsub.f32 %v508_v53, %v524_v50  ;;  %v2451_v62 = vpop.eup %2450 }
 0x129   : > { %v420_v58 = vpop.xlane.xlu0 %419  ;;  %v422_v59 = vpop.xlane.xlu1 %421  ;;  %v615_v27 = vmul.f32 %v2451_v62, %v567_v11 }
 0x12a   : > { %v555_v63 = vmax.f32 %v539_v55, 0.0  ;;  %v556_v2 = vmax.f32 %v540_v56, 0.0  ;;  %v3232_v5 = vmul.f32 0.0625, %v420_v58  ;;  %v3234_v6 = vmul.f32 0.0625, %v422_v59 }
 0x12b   : > { %v571_v58 = vsub.f32 %v3056_v8, %v3212_v41 }
 0x12c   : > { %v2453_v15 = vpop.eup %2452  ;;  %v587_v18 = vadd.f32 1e-05, %v555_v63  ;;  %v588_v19 = vadd.f32 1e-05, %v556_v2  ;;  %v525_v22 = vmul.f32 %v3232_v5, %v3232_v5  ;;  %v526_v1 = vmul.f32 %v3234_v6, %v3234_v6 }
 0x12d   : > { %v468_v23 = vpop.xlane.xlu0 %467  ;;  %v470_v26 = vpop.xlane.xlu1 %469  ;;  %v616_v30 = vmul.f32 %v2453_v15, %v568_v14  ;;  %v572_v2 = vsub.f32 %v3059_v9, %v3217_v43 }
 0x12e   : > { %2458 = vrsqrt.f32 %v587_v18  ;;  %v509_v3 = vmul.f32 0.0625, %v468_v23  ;;  %v510_v51 = vmul.f32 0.0625, %v470_v26 }
 0x12f   : > { %2460 = vrsqrt.f32 %v588_v19  ;;  %v631_v33 = vpack.c.bf16 %v616_v30, %v615_v27 }
 0x130   : > { %v2455_v34 = vpop.eup %2454  ;;  %v541_v35 = vsub.f32 %v509_v3, %v525_v22  ;;  %v542_v36 = vsub.f32 %v510_v51, %v526_v1  ;;  %v573_v3 = vsub.f32 %v3068_v12, %v3232_v5 }
 0x131   : > { %v2457_v37 = vpop.eup %2456  ;;  %v424_v39 = vpop.xlane.xlu0 %423  ;;  %2203 = vmatprep.subr.bf16.mxu0 %v631_v33  ;;  %v617_v42 = vmul.f32 %v2455_v34, %v569_v32  ;;  %v574_v34 = vsub.f32 %v3071_v13, %v3234_v6 }
 0x132   : > { %v426_v40 = vpop.xlane.xlu1 %425  ;;  %v557_v4 = vmax.f32 %v541_v35, 0.0  ;;  %v558_v7 = vmax.f32 %v542_v36, 0.0  ;;  %v3260_v45 = vmul.f32 0.0625, %v424_v39  ;;  %2204 = vmatpush3.bf16.msra.mxu0 %v631_v33  ;;  %v618_v61 = vmul.f32 %v2457_v37, %v570_v38 }
 0x133   : > { %v3262_v46 = vmul.f32 0.0625, %v426_v40 }
 0x134   : > { %v589_v47 = vadd.f32 1e-05, %v557_v4  ;;  %v590_v48 = vadd.f32 1e-05, %v558_v7  ;;  %v527_v49 = vmul.f32 %v3260_v45, %v3260_v45  ;;  %v632_v52 = vpack.c.bf16 %v618_v61, %v617_v42 }
 0x135   : > { %v472_v50 = vpop.xlane.xlu0 %471  ;;  %v528_v54 = vmul.f32 %v3262_v46, %v3262_v46 }
 0x136   : > { %v474_v53 = vpop.xlane.xlu1 %473  ;;  %2462 = vrsqrt.f32 %v589_v47  ;;  %v511_v55 = vmul.f32 0.0625, %v472_v50  ;;  %2205 = vmatprep.subr.bf16.mxu0 %v632_v52 }
 0x137   : > { %v512_v56 = vmul.f32 0.0625, %v474_v53  ;;  %2464 = vrsqrt.f32 %v590_v48  ;;  %2206 = vmatpush3.bf16.msra.mxu0 %v632_v52  ;;  %v575_v48 = vsub.f32 %v3080_v16, %v3260_v45 }
 0x138   : > { %v2459_v59 = vpop.eup %2458  ;;  %v543_v60 = vsub.f32 %v511_v55, %v527_v49 }
 0x139   : > { %v544_v62 = vsub.f32 %v512_v56, %v528_v54  ;;  %v2461_v63 = vpop.eup %2460  ;;  %v428_v10 = vpop.xlane.xlu0 %427  ;;  %v619_v14 = vmul.f32 %v2459_v59, %v571_v58  ;;  %v576_v54 = vsub.f32 %v3083_v17, %v3262_v46 }
 0x13a   : > { %v430_v11 = vpop.xlane.xlu1 %429  ;;  %v559_v15 = vmax.f32 %v543_v60, 0.0  ;;  %v3275_v19 = vmul.f32 0.0625, %v428_v10  ;;  %v620_v8 = vmul.f32 %v2461_v63, %v572_v2 }
 0x13b   : > { %v560_v18 = vmax.f32 %v544_v62, 0.0  ;;  %v3277_v22 = vmul.f32 0.0625, %v430_v11 }
 0x13c   : > { %v591_v41 = vadd.f32 1e-05, %v559_v15  ;;  %v529_v26 = vmul.f32 %v3275_v19, %v3275_v19  ;;  %v633_v30 = vpack.c.bf16 %v620_v8, %v619_v14  ;;  %v577_v17 = vsub.f32 %v3092_v20, %v3275_v19 }
 0x13d   : > { %v592_v23 = vadd.f32 1e-05, %v560_v18  ;;  %v476_v27 = vpop.xlane.xlu0 %475  ;;  %v530_v9 = vmul.f32 %v3277_v22, %v3277_v22 }
 0x13e   : > { %v478_v31 = vpop.xlane.xlu1 %477  ;;  %2466 = vrsqrt.f32 %v591_v41  ;;  %v513_v43 = vmul.f32 0.0625, %v476_v27  ;;  %2207 = vmatprep.subr.bf16.mxu0 %v633_v30 }
 0x13f   : > { %v514_v1 = vmul.f32 0.0625, %v478_v31  ;;  %2468 = vrsqrt.f32 %v592_v23  ;;  %2208 = vmatpush3.bf16.msra.mxu0 %v633_v30  ;;  %v578_v23 = vsub.f32 %v3095_v21, %v3277_v22 }
 0x140   : > { %v2463_v51 = vpop.eup %2462  ;;  %v545_v57 = vsub.f32 %v513_v43, %v529_v26 }
 0x141   : > { %v546_v32 = vsub.f32 %v514_v1, %v530_v9  ;;  %v2465_v33 = vpop.eup %2464  ;;  %v432_v35 = vpop.xlane.xlu0 %431  ;;  %v621_v37 = vmul.f32 %v2463_v51, %v573_v3 }
 0x142   : > { %v434_v36 = vpop.xlane.xlu1 %433  ;;  %v561_v38 = vmax.f32 %v545_v57, 0.0  ;;  %v3287_v40 = vmul.f32 0.0625, %v432_v35  ;;  %v622_v12 = vmul.f32 %v2465_v33, %v574_v34 }
 0x143   : > { %v562_v39 = vmax.f32 %v546_v32, 0.0  ;;  %v3289_v42 = vmul.f32 0.0625, %v434_v36 }
 0x144   : > { %v593_v5 = vadd.f32 1e-05, %v561_v38  ;;  %v531_v4 = vmul.f32 %v3287_v40, %v3287_v40  ;;  %v634_v0 = vpack.c.bf16 %v622_v12, %v621_v37  ;;  %v579_v20 = vsub.f32 %v3104_v24, %v3287_v40  ;;  %v2419_v12 = vld [vmem:[#allocation2 + $0x8] sm:$0xff]  }
 0x145   : > { %v594_v44 = vadd.f32 1e-05, %v562_v39  ;;  %v480_v7 = vpop.xlane.xlu0 %479  ;;  %v532_v13 = vmul.f32 %v3289_v42, %v3289_v42  ;;  %v580_v21 = vsub.f32 %v3107_v25, %v3289_v42  ;;  %v2421_v25 = vld [vmem:[#allocation2 + $0x18] sm:$0xff]   ;;  %v2422_v42 = vld [vmem:[#allocation2 + $0x20] sm:$0xff]  }
 0x146   : > { %v482_v61 = vpop.xlane.xlu1 %481  ;;  %2470 = vrsqrt.f32 %v593_v5  ;;  %v515_v6 = vmul.f32 0.0625, %v480_v7  ;;  %2209 = vmatprep.subr.bf16.mxu0 %v634_v0  ;;  %v2420_v5 = vld [vmem:[#allocation2 + $0x10] sm:$0xff]  }
 0x147   : > { %v516_v47 = vmul.f32 0.0625, %v482_v61  ;;  %2472 = vrsqrt.f32 %v594_v44  ;;  %2210 = vmatpush3.bf16.msra.mxu0 %v634_v0  ;;  %v2423_v44 = vld [vmem:[#allocation2 + $0x28] sm:$0xff]  }
 0x148   : > { %v2467_v49 = vpop.eup %2466  ;;  %v547_v50 = vsub.f32 %v515_v6, %v531_v4  ;;  %v2425_v4 = vld [vmem:[#allocation2 + $0x38] sm:$0xff]  }
 0x149   : > { %v548_v52 = vsub.f32 %v516_v47, %v532_v13  ;;  %v2469_v53 = vpop.eup %2468  ;;  %v436_v55 = vpop.xlane.xlu0 %435  ;;  %v623_v58 = vmul.f32 %v2467_v49, %v575_v48 }
 0x14a   : > { %v438_v56 = vpop.xlane.xlu1 %437  ;;  %v563_v59 = vmax.f32 %v547_v50, 0.0  ;;  %v501_v62 = vmul.f32 0.0625, %v436_v55  ;;  %v624_v2 = vmul.f32 %v2469_v53, %v576_v54 }
 0x14b   : > { %v564_v60 = vmax.f32 %v548_v52, 0.0  ;;  %v502_v63 = vmul.f32 0.0625, %v438_v56 }
 0x14c   : > { %v595_v10 = vadd.f32 1e-05, %v563_v59  ;;  %v533_v45 = vmul.f32 %v501_v62, %v501_v62  ;;  %v635_v14 = vpack.c.bf16 %v624_v2, %v623_v58  ;;  %v581_v35 = vsub.f32 %v3116_v28, %v501_v62  ;;  %v2424_v28 = vld [vmem:[#allocation2 + $0x30] sm:$0xff]  }
 0x14d   : > { %v596_v16 = vadd.f32 1e-05, %v564_v60  ;;  %v484_v11 = vpop.xlane.xlu0 %483  ;;  %v534_v18 = vmul.f32 %v502_v63, %v502_v63  ;;  %v582_v37 = vsub.f32 %v3119_v29, %v502_v63  ;;  %v2426_v29 = vld [vmem:[#allocation5] sm:$0xff]  }
 0x14e   : > { %v486_v15 = vpop.xlane.xlu1 %485  ;;  %2474 = vrsqrt.f32 %v595_v10  ;;  %v517_v8 = vmul.f32 0.0625, %v484_v11  ;;  %2211 = vmatprep.subr.bf16.mxu0 %v635_v14  ;;  %2251 = vmatprep.mubr.bf16.mxu1 %v2426_v29 }
 0x14f   : > { %v518_v41 = vmul.f32 0.0625, %v486_v15  ;;  %2476 = vrsqrt.f32 %v596_v16  ;;  %2212 = vmatpush3.bf16.msra.mxu0 %v635_v14 }
 0x150   : > { %v2471_v46 = vpop.eup %2470  ;;  %v549_v26 = vsub.f32 %v517_v8, %v533_v45 }
 0x151   : > { %v550_v27 = vsub.f32 %v518_v41, %v534_v18  ;;  %v2473_v30 = vpop.eup %2472  ;;  %v625_v31 = vmul.f32 %v2471_v46, %v577_v17 }
 0x152   : > { %v565_v9 = vmax.f32 %v549_v26, 0.0  ;;  %v626_v1 = vmul.f32 %v2473_v30, %v578_v23  ;;  %v711_v7 = vpop.permute.xlu1 %710 }
 0x153   : > { %v566_v43 = vmax.f32 %v550_v27, 0.0 }
 0x154   : > { %v597_v3 = vadd.f32 1e-05, %v565_v9  ;;  %v636_v57 = vpack.c.bf16 %v626_v1, %v625_v31 }
 0x155   : > { %v598_v51 = vadd.f32 1e-05, %v566_v43  ;;  %v706_v50 = vpop.permute.xlu0 %705 }
 0x156   : > { %2478 = vrsqrt.f32 %v597_v3  ;;  %2213 = vmatprep.subr.bf16.mxu0 %v636_v57  ;;  %v716_v0 = vpop.permute.xlu1 %715 }
 0x157   : > { %2480 = vrsqrt.f32 %v598_v51  ;;  %2214 = vmatpush3.bf16.msra.mxu0 %v636_v57 }
 0x158   : > { %v2475_v19 = vpop.eup %2474 }
 0x159   : > { %v2477_v22 = vpop.eup %2476  ;;  %v627_v32 = vmul.f32 %v2475_v19, %v579_v20  ;;  %v751_v45 = vpop.permute.xlu0 %750 }
 0x15a   : > { %v628_v33 = vmul.f32 %v2477_v22, %v580_v21  ;;  %v721_v61 = vpop.permute.xlu1 %720 }
 0x15c   : > { %v637_v34 = vpack.c.bf16 %v628_v33, %v627_v32 }
 0x15d   : > { %v761_v9 = vpop.permute.xlu0 %760 }
 0x15e   : > { %2215 = vmatprep.subr.bf16.mxu0 %v637_v34  ;;  %v726_v13 = vpop.permute.xlu1 %725 }
 0x15f   : > { %2216 = vmatpush3.bf16.msra.mxu0 %v637_v34 }
 0x160   : > { %v2479_v36 = vpop.eup %2478 }
 0x161   : > { %v2481_v38 = vpop.eup %2480  ;;  %v629_v39 = vmul.f32 %v2479_v36, %v581_v35 }
 0x162   : > { %v630_v24 = vmul.f32 %v2481_v38, %v582_v37  ;;  %v731_v6 = vpop.permute.xlu1 %730 }
 0x164   : > { %v638_v40 = vpack.c.bf16 %v630_v24, %v629_v39 }
 0x166   : > { %2217 = vmatprep.subr.bf16.mxu0 %v638_v40  ;;  %v736_v47 = vpop.permute.xlu1 %735 }
 0x167   : > { %2218 = vmatpush3.bf16.msra.mxu0 %v638_v40 }
 0x16a   : > { %2220 = vmatmul.mubr.bf16.vlgmr.msra.gmra.mrb[0].mxu0 %v2419_v12  ;;  %v741_v48 = vpop.permute.xlu1 %740 }
 0x16b   : > { %2223 = vmatprep.mubr.bf16.mxu0 %v2420_v5 }
 0x16e   : > { %v746_v2 = vpop.permute.xlu1 %745 }
 0x172   : > { %2224 = vmatmul.mubr.bf16.gmra.mrb[4].mxu0 %v2421_v25  ;;  %v756_v46 = vpop.permute.xlu1 %755 }
 0x173   : > { %2227 = vmatprep.mubr.bf16.mxu0 %v2422_v42 }
 0x176   : > { %v766_v22 = vpop.permute.xlu1 %765 }
 0x17a   : > { %2228 = vmatmul.mubr.bf16.gmra.mrb[8].mxu0 %v2423_v44  ;;  %v771_v44 = vpop.permute.xlu0 %770 }
 0x17b   : > { %2231 = vmatprep.mubr.bf16.mxu0 %v2424_v28 }
 0x182   : > { %2232 = vmatmul.mubr.bf16.gmra.mrb[12].mxu0 %v2425_v4 }
 0x23d   : > { %v2221_v49 = vpop.f32.mrb[0].mxu0 }
 0x23e   : > { %v874_v52 = vadd.f32 %v2221_v49, %v716_v0  ;;  %v865_v53 = vpop.f32.mrb[1].mxu0 }
 0x23f   : > { %v866_v54 = vadd.f32 %v865_v53, %v706_v50  ;;  %v2222_v55 = vpop.f32.mrb[2].mxu0 }
 0x240   : > { %v946_v56 = vmul.f32 0.70710677, %v874_v52  ;;  %v877_v58 = vadd.f32 %v2222_v55, %v721_v61  ;;  %v868_v59 = vpop.f32.mrb[3].mxu0  ;;  %v930_v51 = vmul.f32 0.5, %v874_v52 }
 0x241   : > { %v944_v60 = vmul.f32 0.70710677, %v866_v54  ;;  %v869_v62 = vadd.f32 %v868_v59, %v711_v7  ;;  %v928_v37 = vmul.f32 0.5, %v866_v54 }
 0x242   : > { %2482 = verf.f32 %v946_v56  ;;  %v947_v63 = vmul.f32 0.70710677, %v877_v58  ;;  %v931_v32 = vmul.f32 0.5, %v877_v58 }
 0x243   : > { %2484 = verf.f32 %v944_v60  ;;  %v945_v10 = vmul.f32 0.70710677, %v869_v62  ;;  %v929_v5 = vmul.f32 0.5, %v869_v62 }
 0x244   : > { %2486 = verf.f32 %v947_v63 }
 0x245   : > { %2488 = verf.f32 %v945_v10  ;;  %v2225_v16 = vpop.f32.mrb[4].mxu0 }
 0x246   : > { %v890_v11 = vadd.f32 %v2225_v16, %v736_v47  ;;  %v881_v14 = vpop.f32.mrb[5].mxu0  ;;  %v776_v47 = vpop.permute.xlu1 %775 }
 0x247   : > { %v3309_v15 = vadd.f32 %v881_v14, %v726_v13  ;;  %v2226_v18 = vpop.f32.mrb[6].mxu0 }
 0x248   : > { %v950_v8 = vmul.f32 0.70710677, %v890_v11  ;;  %v893_v41 = vadd.f32 %v2226_v18, %v741_v48  ;;  %v884_v17 = vpop.f32.mrb[7].mxu0  ;;  %v934_v58 = vmul.f32 0.5, %v890_v11 }
 0x249   : > { %v948_v23 = vmul.f32 0.70710677, %v3309_v15  ;;  %v885_v26 = vadd.f32 %v884_v17, %v731_v6  ;;  %v932_v10 = vmul.f32 0.5, %v3309_v15 }
 0x24a   : > { %2490 = verf.f32 %v950_v8  ;;  %v951_v27 = vmul.f32 0.70710677, %v893_v41  ;;  %v935_v59 = vmul.f32 0.5, %v893_v41 }
 0x24b   : > { %2492 = verf.f32 %v948_v23  ;;  %v949_v30 = vmul.f32 0.70710677, %v885_v26  ;;  %v933_v16 = vmul.f32 0.5, %v885_v26 }
 0x24c   : > { %v2483_v31 = vpop.eup %2482  ;;  %2494 = verf.f32 %v951_v27 }
 0x24d   : > { %v2485_v43 = vpop.eup %2484  ;;  %2496 = verf.f32 %v949_v30  ;;  %v2229_v1 = vpop.f32.mrb[8].mxu0  ;;  %v978_v57 = vadd.f32 1.0, %v2483_v31 }
 0x24e   : > { %v2487_v3 = vpop.eup %2486  ;;  %v3312_v20 = vadd.f32 %v2229_v1, %v756_v46  ;;  %v897_v19 = vpop.f32.mrb[9].mxu0  ;;  %v976_v36 = vadd.f32 1.0, %v2485_v43 }
 0x24f   : > { %v2489_v21 = vpop.eup %2488  ;;  %v979_v33 = vadd.f32 1.0, %v2487_v3  ;;  %v3314_v34 = vadd.f32 %v897_v19, %v746_v2  ;;  %v2230_v35 = vpop.f32.mrb[10].mxu0  ;;  %v994_v28 = vmul.f32 %v978_v57, %v930_v51 }
 0x250   : > { %v954_v38 = vmul.f32 0.70710677, %v3312_v20  ;;  %v3317_v39 = vadd.f32 %v2230_v35, %v761_v9  ;;  %v900_v24 = vpop.f32.mrb[11].mxu0  ;;  %v977_v40 = vadd.f32 1.0, %v2489_v21  ;;  %v992_v7 = vmul.f32 %v976_v36, %v928_v37  ;;  %v781_v2 = vpop.permute.xlu0 %780 }
 0x251   : > { %v995_v12 = vmul.f32 %v979_v33, %v931_v32  ;;  %v952_v25 = vmul.f32 0.70710677, %v3314_v34  ;;  %v3320_v42 = vadd.f32 %v900_v24, %v751_v45  ;;  %v938_v19 = vmul.f32 0.5, %v3312_v20 }
 0x252   : > { %2498 = verf.f32 %v954_v38  ;;  %v955_v4 = vmul.f32 0.70710677, %v3317_v39  ;;  %v993_v0 = vmul.f32 %v977_v40, %v929_v5  ;;  %v939_v21 = vmul.f32 0.5, %v3317_v39 }
 0x253   : > { %2500 = verf.f32 %v952_v25  ;;  %v953_v29 = vmul.f32 0.70710677, %v3320_v42  ;;  %v1009_v13 = vpack.c.bf16 %v995_v12, %v994_v28  ;;  %v936_v32 = vmul.f32 0.5, %v3314_v34 }
 0x254   : > { %v2491_v61 = vpop.eup %2490  ;;  %2502 = verf.f32 %v955_v4  ;;  %v1008_v50 = vpack.c.bf16 %v993_v0, %v992_v7  ;;  %v937_v33 = vmul.f32 0.5, %v3320_v42 }
 0x255   : > { %v2493_v6 = vpop.eup %2492  ;;  %v982_v48 = vadd.f32 1.0, %v2491_v61  ;;  %2504 = verf.f32 %v953_v29  ;;  %v2233_v49 = vpop.f32.mrb[12].mxu0 }
 0x256   : > { %v2495_v52 = vpop.eup %2494  ;;  %v980_v53 = vadd.f32 1.0, %v2493_v6  ;;  %v922_v54 = vadd.f32 %v2233_v49, %v776_v47  ;;  %v913_v55 = vpop.f32.mrb[13].mxu0  ;;  %2235 = vmatprep.subr.bf16.mxu1 %v1008_v50 }
 0x257   : > { %v2497_v56 = vpop.eup %2496  ;;  %v983_v60 = vadd.f32 1.0, %v2495_v52  ;;  %v914_v62 = vadd.f32 %v913_v55, %v766_v22  ;;  %v2234_v63 = vpop.f32.mrb[14].mxu0  ;;  %2236 = vmatpush3.bf16.msra.mxu1 %v1008_v50  ;;  %v998_v8 = vmul.f32 %v982_v48, %v934_v58  ;;  %v2427_v50 = vld [vmem:[#allocation5 + $0x8] sm:$0xff]   ;;  %v2428_v52 = vld [vmem:[#allocation5 + $0x10] sm:$0xff]   ;;  %v2433_v58 = vld [vmem:[#allocation5 + $0x38] sm:$0xff]  }
 0x258   : > { %v981_v45 = vadd.f32 1.0, %v2497_v56  ;;  %v958_v14 = vmul.f32 0.70710677, %v922_v54  ;;  %v916_v18 = vpop.f32.mrb[15].mxu0  ;;  %v925_v23 = vadd.f32 %v2234_v63, %v781_v2  ;;  %2237 = vmatprep.subr.bf16.mxu1 %v1009_v13  ;;  %v996_v27 = vmul.f32 %v980_v53, %v932_v10  ;;  %v2429_v53 = vld [vmem:[#allocation5 + $0x18] sm:$0xff]   ;;  %v2431_v55 = vld [vmem:[#allocation5 + $0x28] sm:$0xff]  }
 0x259   : > { %v999_v17 = vmul.f32 %v983_v60, %v935_v59  ;;  %v956_v46 = vmul.f32 0.70710677, %v914_v62  ;;  %v917_v41 = vadd.f32 %v916_v18, %v771_v44  ;;  %v942_v34 = vmul.f32 0.5, %v922_v54  ;;  %v2430_v54 = vld [vmem:[#allocation5 + $0x20] sm:$0xff]   ;;  %v2432_v56 = vld [vmem:[#allocation5 + $0x30] sm:$0xff]   ;;  %v1019_v59 = vpop.permute.xlu1 %1018 }
 0x25a   : > { %v997_v11 = vmul.f32 %v981_v45, %v933_v16  ;;  %2506 = verf.f32 %v958_v14  ;;  %v959_v30 = vmul.f32 0.70710677, %v925_v23  ;;  %v943_v4 = vmul.f32 0.5, %v925_v23 }
 0x25b   : > { %2508 = verf.f32 %v956_v46  ;;  %v1011_v31 = vpack.c.bf16 %v999_v17, %v998_v8  ;;  %v957_v43 = vmul.f32 0.70710677, %v917_v41  ;;  %2238 = vmatpush3.bf16.msra.mxu1 %v1009_v13  ;;  %v940_v29 = vmul.f32 0.5, %v914_v62  ;;  %v1024_v62 = vpop.permute.xlu0 %1023  ;;  %v2578_v17 = vld [vmem:[%s3029_s16 + $0x10] sm:$0xff] }
 0x25c   : > { %v2499_v9 = vpop.eup %2498  ;;  %v1010_v15 = vpack.c.bf16 %v997_v11, %v996_v27  ;;  %2510 = verf.f32 %v959_v30  ;;  %v941_v7 = vmul.f32 0.5, %v917_v41  ;;  %v1257_v60 = vlaneseq  ;;  %v2579_v11 = vld [vmem:[%s3029_s16] sm:$0xff] }
 0x25d   : > { %v2501_v26 = vpop.eup %2500  ;;  %v986_v1 = vadd.f32 1.0, %v2499_v9  ;;  %2512 = verf.f32 %v957_v43  ;;  %v1029_v2 = vpop.permute.xlu1 %1028  ;;  %v2580_v43 = vld [vmem:[%s3029_s16 + $0x18] sm:$0xff] }
 0x25e   : > { %v2503_v3 = vpop.eup %2502  ;;  %v984_v51 = vadd.f32 1.0, %v2501_v26  ;;  %2239 = vmatprep.subr.bf16.mxu1 %v1010_v15  ;;  %v3329_v63 = vand.u32 127, %v1257_v60 }
 0x25f   : > { %v2505_v57 = vpop.eup %2504  ;;  %v987_v22 = vadd.f32 1.0, %v2503_v3  ;;  %2240 = vmatpush3.bf16.msra.mxu1 %v1010_v15  ;;  %v1002_v36 = vmul.f32 %v986_v1, %v938_v19  ;;  %v1034_v16 = vpop.permute.xlu0 %1033 }
 0x260   : > { %v985_v35 = vadd.f32 1.0, %v2505_v57  ;;  %2241 = vmatprep.subr.bf16.mxu1 %v1011_v31  ;;  %v1000_v38 = vmul.f32 %v984_v51, %v936_v32  ;;  %vm1259_vm0 = vcmp.lt.s32.totalorder %v3329_v63, 16  ;;  %v2581_v57 = vld [vmem:[%s3029_s16 + $0x8] sm:$0xff]  ;;  %v2442_v63 = vld [vmem:[#allocation8] sm:$0xff]  }
 0x261   : > { %v1003_v37 = vmul.f32 %v987_v22, %v939_v21  ;;  %v1039_v9 = vpop.permute.xlu1 %1038 }
 0x262   : > { %v1001_v24 = vmul.f32 %v985_v35, %v937_v33 }
 0x263   : > { %v1013_v40 = vpack.c.bf16 %v1003_v37, %v1002_v36  ;;  %2242 = vmatpush3.bf16.msra.mxu1 %v1011_v31  ;;  %v1044_v1 = vpop.permute.xlu0 %1043 }
 0x264   : > { %v2507_v12 = vpop.eup %2506  ;;  %v1012_v5 = vpack.c.bf16 %v1001_v24, %v1000_v38 }
 0x265   : > { %v2509_v25 = vpop.eup %2508  ;;  %v990_v20 = vadd.f32 1.0, %v2507_v12  ;;  %v1049_v35 = vpop.permute.xlu1 %1048 }
 0x266   : > { %2243 = vmatprep.subr.bf16.mxu1 %v1012_v5  ;;  %v2511_v39 = vpop.eup %2510  ;;  %v988_v44 = vadd.f32 1.0, %v2509_v25  ;;  %v2582_v25 = vld [vmem:[%s3029_s16 + $0x30] sm:$0xff] }
 0x267   : > { %v2513_v28 = vpop.eup %2512  ;;  %v991_v42 = vadd.f32 1.0, %v2511_v39  ;;  %2244 = vmatpush3.bf16.msra.mxu1 %v1012_v5  ;;  %v1006_v61 = vmul.f32 %v990_v20, %v942_v34  ;;  %v1054_v36 = vpop.permute.xlu0 %1053  ;;  %v2583_v34 = vld [vmem:[%s3029_s16 + $0x38] sm:$0xff] }
 0x268   : > { %v989_v0 = vadd.f32 1.0, %v2513_v28  ;;  %2245 = vmatprep.subr.bf16.mxu1 %v1013_v40  ;;  %v1004_v6 = vmul.f32 %v988_v44, %v940_v29 }
 0x269   : > { %v1007_v13 = vmul.f32 %v991_v42, %v943_v4 }
 0x26a   : > { %v1005_v47 = vmul.f32 %v989_v0, %v941_v7  ;;  %v2584_v0 = vld [vmem:[%s3029_s16 + $0x20] sm:$0xff] }
 0x26b   : > { %2246 = vmatpush3.bf16.msra.mxu1 %v1013_v40  ;;  %v1015_v48 = vpack.c.bf16 %v1007_v13, %v1006_v61 }
 0x26c   : > { %v1014_v49 = vpack.c.bf16 %v1005_v47, %v1004_v6  ;;  %v1059_v6 = vpop.permute.xlu1 %1058  ;;  %v2585_v47 = vld [vmem:[%s3029_s16 + $0x28] sm:$0xff] }
 0x26e   : > { %2247 = vmatprep.subr.bf16.mxu1 %v1014_v49 }
 0x26f   : > { %2248 = vmatpush3.bf16.msra.mxu1 %v1014_v49 }
 0x270   : > { %2249 = vmatprep.subr.bf16.mxu1 %v1015_v48  ;;  %v1069_v60 = vpop.permute.xlu1 %1068 }
 0x273   : > { %2250 = vmatpush3.bf16.msra.mxu1 %v1015_v48 }
 0x274   : > { %2299 = vmatprep.subr.bf16.mxu1 %v2442_v63 }
 0x276   : > { %2252 = vmatmul.mubr.bf16.vlgmr.msra.gmra.mrb[0].mxu1 %v2427_v50  ;;  %v1064_v50 = vpop.permute.xlu0 %1063 }
 0x277   : > { %2255 = vmatprep.mubr.bf16.mxu1 %v2428_v52  ;;  %2300 = vmatpush3.bf16.msra.mxu1 %v2442_v63 }
 0x27e   : > { %2256 = vmatmul.mubr.bf16.gmra.mrb[4].mxu1 %v2429_v53  ;;  %v2434_v53 = vld [vmem:[#allocation7] sm:$0xff]  }
 0x27f   : > { %2259 = vmatprep.mubr.bf16.mxu1 %v2430_v54  ;;  %2267 = vmatprep.subr.bf16.mxu0 %v2434_v53 }
 0x280   : > { %2268 = vmatpush3.bf16.msra.mxu0 %v2434_v53 }
 0x286   : > { %2260 = vmatmul.mubr.bf16.gmra.mrb[8].mxu1 %v2431_v55 }
 0x287   : > { %2263 = vmatprep.mubr.bf16.mxu1 %v2432_v56 }
 0x28e   : > { %2264 = vmatmul.mubr.bf16.gmra.mrb[12].mxu1 %v2433_v58 }
 0x349   : > { %v2253_v10 = vpop.f32.mrb[0].mxu1 }
 0x34a   : > { %v1187_v45 = vadd.f32 %v2253_v10, %v1029_v2  ;;  %v1178_v14 = vpop.f32.mrb[1].mxu1  ;;  %v2435_v2 = vld [vmem:[#allocation7 + $0x8] sm:$0xff]   ;;  %v1074_v10 = vpop.permute.xlu0 %1073 }
 0x34b   : > { %v1179_v18 = vadd.f32 %v1178_v14, %v1019_v59  ;;  %v2254_v8 = vpop.f32.mrb[2].mxu1  ;;  %2269 = vmatprep.subr.bf16.mxu0 %v2435_v2 }
 0x34c   : > { %v1243_v46 = vadd.f32 %v2578_v17, %v1187_v45  ;;  %v1190_v23 = vadd.f32 %v2254_v8, %v1034_v16  ;;  %v1181_v27 = vpop.f32.mrb[3].mxu1  ;;  %2270 = vmatpush3.bf16.msra.mxu0 %v2435_v2  ;;  %v2436_v8 = vld [vmem:[#allocation7 + $0x10] sm:$0xff]   ;;  %v2443_v2 = vld [vmem:[#allocation8 + $0x8] sm:$0xff]  }
 0x34d   : > { %v1241_v41 = vadd.f32 %v2579_v11, %v1179_v18  ;;  %v1182_v30 = vadd.f32 %v1181_v27, %v1024_v62  ;;  %v2586_v17 = vld [vmem:[%s3029_s16 + $0x50] sm:$0xff]  ;;  %v2587_v11 = vld [vmem:[%s3029_s16 + $0x58] sm:$0xff]  ;;  %2271 = vmatprep.subr.bf16.mxu0 %v2436_v8  ;;  %2301 = vmatprep.subr.bf16.mxu1 %v2443_v2 }
 0x34e   : > { %v3336_v31 = vsel %vm1259_vm0, %v1243_v46, 0.0  ;;  %v1244_v15 = vadd.f32 %v2580_v43, %v1190_v23  ;;  %v2588_v43 = vld [vmem:[%s3029_s16 + $0x40] sm:$0xff]  ;;  %2302 = vmatpush3.bf16.msra.mxu1 %v2443_v2 }
 0x34f   : > { %1282 = vadd.xlane.f32.xlu0 %v3336_v31  ;;  %v3342_v26 = vsel %vm1259_vm0, %v1241_v41, 0.0  ;;  %v1312_v51 = vmul.f32 %v3336_v31, %v3336_v31  ;;  %v1242_v19 = vadd.f32 %v2581_v57, %v1182_v30 }
 0x350   : > { %1278 = vadd.xlane.f32.xlu1 %v3342_v26  ;;  %v3350_v32 = vsel %vm1259_vm0, %v1244_v15, 0.0  ;;  %v1310_v5 = vmul.f32 %v3342_v26, %v3342_v26  ;;  %2272 = vmatpush3.bf16.msra.mxu0 %v2436_v8 }
 0x351   : > { %v2257_v3 = vpop.f32.mrb[4].mxu1  ;;  %v3355_v38 = vsel %vm1259_vm0, %v1242_v19, 0.0  ;;  %v1313_v24 = vmul.f32 %v3350_v32, %v3350_v32 }
 0x352   : > { %v1194_v21 = vpop.f32.mrb[5].mxu1  ;;  %v1203_v37 = vadd.f32 %v2257_v3, %v1049_v35  ;;  %v1311_v28 = vmul.f32 %v3355_v38, %v3355_v38  ;;  %v1079_v3 = vpop.permute.xlu1 %1078 }
 0x353   : > { %v2258_v22 = vpop.f32.mrb[6].mxu1  ;;  %1330 = vadd.xlane.f32.xlu0 %v1312_v51  ;;  %v1195_v39 = vadd.f32 %v1194_v21, %v1039_v9  ;;  %v2437_v9 = vld [vmem:[#allocation7 + $0x18] sm:$0xff]   ;;  %v2589_v51 = vld [vmem:[%s3029_s16 + $0x48] sm:$0xff]  ;;  %v1084_v21 = vpop.permute.xlu0 %1083 }
 0x354   : > { %v1197_v33 = vpop.f32.mrb[7].mxu1  ;;  %1284 = vadd.xlane.f32.xlu1 %v3350_v32  ;;  %v1206_v40 = vadd.f32 %v2258_v22, %v1054_v36  ;;  %v1247_v20 = vadd.f32 %v2582_v25, %v1203_v37  ;;  %2273 = vmatprep.subr.bf16.mxu0 %v2437_v9  ;;  %v2438_v22 = vld [vmem:[#allocation7 + $0x20] sm:$0xff]  }
 0x355   : > { %v1198_v42 = vadd.f32 %v1197_v33, %v1044_v1  ;;  %v1245_v61 = vadd.f32 %v2584_v0, %v1195_v39  ;;  %2274 = vmatpush3.bf16.msra.mxu0 %v2437_v9  ;;  %v2440_v39 = vld [vmem:[#allocation7 + $0x30] sm:$0xff]   ;;  %v2441_v0 = vld [vmem:[#allocation7 + $0x38] sm:$0xff]  }
 0x356   : > { %v1248_v4 = vadd.f32 %v2583_v34, %v1206_v40  ;;  %v3369_v13 = vsel %vm1259_vm0, %v1247_v20, 0.0  ;;  %2275 = vmatprep.subr.bf16.mxu0 %v2438_v22  ;;  %v1089_v36 = vpop.permute.xlu1 %1088 }
 0x357   : > { %1280 = vadd.xlane.f32.xlu0 %v3355_v38  ;;  %v1246_v48 = vadd.f32 %v2585_v47, %v1198_v42  ;;  %v3382_v55 = vsel %vm1259_vm0, %v1245_v61, 0.0  ;;  %v1316_v62 = vmul.f32 %v3369_v13, %v3369_v13  ;;  %v1094_v40 = vpop.permute.xlu0 %1093  ;;  %v2591_v42 = vld [vmem:[%s3029_s16 + $0x78] sm:$0xff]  ;;  %v2592_v61 = vld [vmem:[%s3029_s16 + $0x60] sm:$0xff] }
 0x358   : > { %1332 = vadd.xlane.f32.xlu1 %v1313_v24  ;;  %v3375_v49 = vsel %vm1259_vm0, %v1248_v4, 0.0  ;;  %v1314_v18 = vmul.f32 %v3382_v55, %v3382_v55  ;;  %v2439_v24 = vld [vmem:[#allocation7 + $0x28] sm:$0xff]  }
 0x359   : > { %v2261_v12 = vpop.f32.mrb[8].mxu1  ;;  %v3387_v58 = vsel %vm1259_vm0, %v1246_v48, 0.0  ;;  %v1317_v45 = vmul.f32 %v3375_v49, %v3375_v49  ;;  %2276 = vmatpush3.bf16.msra.mxu0 %v2438_v22  ;;  %v2593_v48 = vld [vmem:[%s3029_s16 + $0x68] sm:$0xff] }
 0x35a   : > { %v1210_v44 = vpop.f32.mrb[9].mxu1  ;;  %v1219_v16 = vadd.f32 %v2261_v12, %v1069_v60  ;;  %v1315_v27 = vmul.f32 %v3387_v58, %v3387_v58  ;;  %2277 = vmatprep.subr.bf16.mxu0 %v2439_v24 }
 0x35b   : > { %v2262_v29 = vpop.f32.mrb[10].mxu1  ;;  %1326 = vadd.xlane.f32.xlu0 %v1310_v5  ;;  %v1211_v23 = vadd.f32 %v1210_v44, %v1059_v6  ;;  %v2590_v44 = vld [vmem:[%s3029_s16 + $0x70] sm:$0xff] }
 0x35c   : > { %v1213_v7 = vpop.f32.mrb[11].mxu1  ;;  %1328 = vadd.xlane.f32.xlu1 %v1311_v28  ;;  %v1222_v14 = vadd.f32 %v2262_v29, %v1074_v10  ;;  %v1251_v46 = vadd.f32 %v2586_v17, %v1219_v16 }
 0x35d   : > { %v1214_v30 = vadd.f32 %v1213_v7, %v1064_v50  ;;  %v1249_v15 = vadd.f32 %v2588_v43, %v1211_v23  ;;  %2278 = vmatpush3.bf16.msra.mxu0 %v2439_v24 }
 0x35e   : > { %v1252_v41 = vadd.f32 %v2587_v11, %v1222_v14  ;;  %v3405_v1 = vsel %vm1259_vm0, %v1251_v46, 0.0  ;;  %2279 = vmatprep.subr.bf16.mxu0 %v2440_v39 }
 0x35f   : > { %1290 = vadd.xlane.f32.xlu0 %v3369_v13  ;;  %v1250_v57 = vadd.f32 %v2589_v51, %v1214_v30  ;;  %v3416_v33 = vsel %vm1259_vm0, %v1249_v15, 0.0  ;;  %v1320_v37 = vmul.f32 %v3405_v1, %v3405_v1 }
 0x360   : > { %1292 = vadd.xlane.f32.xlu1 %v3375_v49  ;;  %v3411_v19 = vsel %vm1259_vm0, %v1252_v41, 0.0  ;;  %v1318_v20 = vmul.f32 %v3416_v33, %v3416_v33 }
 0x361   : > { %v2265_v52 = vpop.f32.mrb[12].mxu1  ;;  %v3421_v35 = vsel %vm1259_vm0, %v1250_v57, 0.0  ;;  %v1321_v5 = vmul.f32 %v3411_v19, %v3411_v19  ;;  %2280 = vmatpush3.bf16.msra.mxu0 %v2440_v39 }
 0x362   : > { %v3378_v54 = vpop.f32.mrb[13].mxu1  ;;  %v1235_v12 = vadd.f32 %v2265_v52, %v1089_v36  ;;  %v1319_v4 = vmul.f32 %v3421_v35, %v3421_v35  ;;  %2281 = vmatprep.subr.bf16.mxu0 %v2441_v0 }
 0x363   : > { %v2266_v56 = vpop.f32.mrb[14].mxu1  ;;  %1286 = vadd.xlane.f32.xlu0 %v3382_v55  ;;  %v1227_v34 = vadd.f32 %v3378_v54, %v1079_v3 }
 0x364   : > { %v3389_v59 = vpop.f32.mrb[15].mxu1  ;;  %1288 = vadd.xlane.f32.xlu1 %v3387_v58  ;;  %v1238_v25 = vadd.f32 %v2266_v56, %v1094_v40  ;;  %v1255_v28 = vadd.f32 %v2590_v44, %v1235_v12 }
 0x365   : > { %v1230_v7 = vadd.f32 %v3389_v59, %v1084_v21  ;;  %v1253_v6 = vadd.f32 %v2592_v61, %v1227_v34  ;;  %2282 = vmatpush3.bf16.msra.mxu0 %v2441_v0 }
 0x366   : > { %v1256_v29 = vadd.f32 %v2591_v42, %v1238_v25  ;;  %v3439_v47 = vsel %vm1259_vm0, %v1255_v28, 0.0 }
 0x367   : > { %1338 = vadd.xlane.f32.xlu0 %v1316_v62  ;;  %v1254_v50 = vadd.f32 %v2593_v48, %v1230_v7  ;;  %v3450_v53 = vsel %vm1259_vm0, %v1253_v6, 0.0  ;;  %v1324_v60 = vmul.f32 %v3439_v47, %v3439_v47 }
 0x368   : > { %1340 = vadd.xlane.f32.xlu1 %v1317_v45  ;;  %v3445_v52 = vsel %vm1259_vm0, %v1256_v29, 0.0  ;;  %v1322_v56 = vmul.f32 %v3450_v53, %v3450_v53 }
 0x369   : > { %v3455_v54 = vsel %vm1259_vm0, %v1254_v50, 0.0  ;;  %v1325_v62 = vmul.f32 %v3445_v52, %v3445_v52 }
 0x36a   : > { %v1323_v59 = vmul.f32 %v3455_v54, %v3455_v54 }
 0x36b   : > { %1334 = vadd.xlane.f32.xlu0 %v1314_v18 }
 0x36c   : > { %1336 = vadd.xlane.f32.xlu1 %v1315_v27 }
 0x36f   : > { %1298 = vadd.xlane.f32.xlu0 %v3405_v1 }
 0x370   : > { %1300 = vadd.xlane.f32.xlu1 %v3411_v19 }
 0x373   : > { %1294 = vadd.xlane.f32.xlu0 %v3416_v33 }
 0x374   : > { %1296 = vadd.xlane.f32.xlu1 %v3421_v35 }
 0x377   : > { %1346 = vadd.xlane.f32.xlu0 %v1320_v37 }
 0x378   : > { %1348 = vadd.xlane.f32.xlu1 %v1321_v5 }
 0x37b   : > { %1342 = vadd.xlane.f32.xlu0 %v1318_v20 }
 0x37c   : > { %1344 = vadd.xlane.f32.xlu1 %v1319_v4 }
 0x37f   : > { %1306 = vadd.xlane.f32.xlu0 %v3439_v47 }
 0x380   : > { %1308 = vadd.xlane.f32.xlu1 %v3445_v52 }
 0x383   : > { %1302 = vadd.xlane.f32.xlu0 %v3450_v53 }
 0x384   : > { %1304 = vadd.xlane.f32.xlu1 %v3455_v54 }
 0x387   : > { %1350 = vadd.xlane.f32.xlu0 %v1322_v56 }
 0x388   : > { %1352 = vadd.xlane.f32.xlu1 %v1323_v59 }
 0x38b   : > { %1354 = vadd.xlane.f32.xlu0 %v1324_v60 }
 0x38c   : > { %1356 = vadd.xlane.f32.xlu1 %v1325_v62 }
 0x3dc   : > { %v1283_v10 = vpop.xlane.xlu0 %1282 }
 0x3dd   : > { %v1279_v16 = vpop.xlane.xlu1 %1278  ;;  %v3466_v45 = vmul.f32 0.0625, %v1283_v10 }
 0x3de   : > { %v3472_v11 = vmul.f32 0.0625, %v1279_v16 }
 0x3df   : > { %v1392_v17 = vmul.f32 %v3466_v45, %v3466_v45 }
 0x3e0   : > { %v1331_v14 = vpop.xlane.xlu0 %1330  ;;  %v1390_v57 = vmul.f32 %v3472_v11, %v3472_v11 }
 0x3e1   : > { %v1376_v18 = vmul.f32 0.0625, %v1331_v14  ;;  %v1285_v8 = vpop.xlane.xlu1 %1284  ;;  %v1438_v14 = vsub.f32 %v3342_v26, %v3472_v11 }
 0x3e2   : > { %v3470_v46 = vmul.f32 0.0625, %v1285_v8 }
 0x3e3   : > { %v1408_v23 = vsub.f32 %v1376_v18, %v1392_v17 }
 0x3e4   : > { %v1281_v27 = vpop.xlane.xlu0 %1280  ;;  %v1393_v30 = vmul.f32 %v3470_v46, %v3470_v46 }
 0x3e5   : > { %v1333_v41 = vpop.xlane.xlu1 %1332  ;;  %v3476_v9 = vmul.f32 0.0625, %v1281_v27  ;;  %v1424_v15 = vmax.f32 %v1408_v23, 0.0 }
 0x3e6   : > { %v1377_v43 = vmul.f32 0.0625, %v1333_v41  ;;  %v1441_v41 = vsub.f32 %v3350_v32, %v3470_v46 }
 0x3e7   : > { %v1391_v36 = vmul.f32 %v3476_v9, %v3476_v9  ;;  %v1456_v12 = vadd.f32 1e-05, %v1424_v15  ;;  %v1439_v11 = vsub.f32 %v3355_v38, %v3476_v9 }
 0x3e8   : > { %v1409_v3 = vsub.f32 %v1377_v43, %v1393_v30  ;;  %v1327_v51 = vpop.xlane.xlu0 %1326 }
 0x3e9   : > { %v1374_v21 = vmul.f32 0.0625, %v1327_v51  ;;  %v1329_v22 = vpop.xlane.xlu1 %1328  ;;  %v1440_v51 = vsub.f32 %v3336_v31, %v3466_v45 }
 0x3ea   : > { %v1425_v37 = vmax.f32 %v1409_v3, 0.0  ;;  %v1375_v24 = vmul.f32 0.0625, %v1329_v22 }
 0x3eb   : > { %v1406_v40 = vsub.f32 %v1374_v21, %v1390_v57 }
 0x3ec   : > { %v1457_v5 = vadd.f32 1e-05, %v1425_v37  ;;  %v1407_v25 = vsub.f32 %v1375_v24, %v1391_v36  ;;  %v1291_v20 = vpop.xlane.xlu0 %1290 }
 0x3ed   : > { %v1422_v39 = vmax.f32 %v1406_v40, 0.0  ;;  %v1293_v44 = vpop.xlane.xlu1 %1292  ;;  %v3482_v29 = vmul.f32 0.0625, %v1291_v20 }
 0x3ee   : > { %v1423_v28 = vmax.f32 %v1407_v25, 0.0  ;;  %2514 = vrsqrt.f32 %v1457_v5  ;;  %v3484_v0 = vmul.f32 0.0625, %v1293_v44 }
 0x3ef   : > { %v1454_v34 = vadd.f32 1e-05, %v1422_v39  ;;  %2516 = vrsqrt.f32 %v1456_v12  ;;  %v1396_v6 = vmul.f32 %v3482_v29, %v3482_v29 }
 0x3f0   : > { %v1455_v4 = vadd.f32 1e-05, %v1423_v28  ;;  %v1287_v42 = vpop.xlane.xlu0 %1286  ;;  %v1397_v59 = vmul.f32 %v3484_v0, %v3484_v0 }
 0x3f1   : > { %2518 = vrsqrt.f32 %v1454_v34  ;;  %v1289_v7 = vpop.xlane.xlu1 %1288  ;;  %v3488_v48 = vmul.f32 0.0625, %v1287_v42 }
 0x3f2   : > { %2520 = vrsqrt.f32 %v1455_v4  ;;  %v3492_v60 = vmul.f32 0.0625, %v1289_v7 }
 0x3f3   : > { %v1394_v18 = vmul.f32 %v3488_v48, %v3488_v48 }
 0x3f4   : > { %v1339_v61 = vpop.xlane.xlu0 %1338  ;;  %v1395_v30 = vmul.f32 %v3492_v60, %v3492_v60 }
 0x3f5   : > { %v1380_v50 = vmul.f32 0.0625, %v1339_v61  ;;  %v1341_v56 = vpop.xlane.xlu1 %1340 }
 0x3f6   : > { %v1381_v62 = vmul.f32 0.0625, %v1341_v56 }
 0x3f7   : > { %v1412_v63 = vsub.f32 %v1380_v50, %v1396_v6 }
 0x3f8   : > { %v1413_v2 = vsub.f32 %v1381_v62, %v1397_v59  ;;  %v1335_v10 = vpop.xlane.xlu0 %1334  ;;  %v2515_v16 = vpop.eup %2514 }
 0x3f9   : > { %v1428_v8 = vmax.f32 %v1412_v63, 0.0  ;;  %v1378_v17 = vmul.f32 0.0625, %v1335_v10  ;;  %v1337_v23 = vpop.xlane.xlu1 %1336  ;;  %v2517_v27 = vpop.eup %2516  ;;  %v1489_v46 = vmul.f32 %v2515_v16, %v1441_v41 }
 0x3fa   : > { %v1429_v43 = vmax.f32 %v1413_v2, 0.0  ;;  %v1379_v15 = vmul.f32 0.0625, %v1337_v23  ;;  %v1488_v39 = vmul.f32 %v2517_v27, %v1440_v51  ;;  %v1445_v23 = vsub.f32 %v3375_v49, %v3484_v0 }
 0x3fb   : > { %v2519_v3 = vpop.eup %2518  ;;  %v1460_v57 = vadd.f32 1e-05, %v1428_v8  ;;  %v1410_v21 = vsub.f32 %v1378_v17, %v1394_v18 }
 0x3fc   : > { %v2521_v22 = vpop.eup %2520  ;;  %v1461_v36 = vadd.f32 1e-05, %v1429_v43  ;;  %v1411_v37 = vsub.f32 %v1379_v15, %v1395_v30  ;;  %v1299_v24 = vpop.xlane.xlu0 %1298  ;;  %v1486_v40 = vmul.f32 %v2519_v3, %v1438_v14  ;;  %v1503_v9 = vpack.c.bf16 %v1489_v46, %v1488_v39 }
 0x3fd   : > { %v1426_v12 = vmax.f32 %v1410_v21, 0.0  ;;  %v1301_v5 = vpop.xlane.xlu1 %1300  ;;  %v1487_v25 = vmul.f32 %v2521_v22, %v1439_v11  ;;  %2522 = vrsqrt.f32 %v1460_v57  ;;  %v3506_v4 = vmul.f32 0.0625, %v1299_v24 }
 0x3fe   : > { %v1427_v20 = vmax.f32 %v1411_v37, 0.0  ;;  %2524 = vrsqrt.f32 %v1461_v36  ;;  %v3508_v7 = vmul.f32 0.0625, %v1301_v5  ;;  %v1444_v14 = vsub.f32 %v3369_v13, %v3482_v29 }
 0x3ff   : > { %v1458_v44 = vadd.f32 1e-05, %v1426_v12  ;;  %v1502_v45 = vpack.c.bf16 %v1487_v25, %v1486_v40  ;;  %v1400_v6 = vmul.f32 %v3506_v4, %v3506_v4  ;;  %v1442_v15 = vsub.f32 %v3382_v55, %v3488_v48 }
 0x400   : > { %v1459_v28 = vadd.f32 1e-05, %v1427_v20  ;;  %v1295_v34 = vpop.xlane.xlu0 %1294  ;;  %v1401_v62 = vmul.f32 %v3508_v7, %v3508_v7  ;;  %v1443_v57 = vsub.f32 %v3387_v58, %v3492_v60 }
 0x401   : > { %2526 = vrsqrt.f32 %v1458_v44  ;;  %2283 = vmatprep.mubr.bf16.mxu0 %v1502_v45  ;;  %v1297_v42 = vpop.xlane.xlu1 %1296  ;;  %v3512_v50 = vmul.f32 0.0625, %v1295_v34 }
 0x402   : > { %2528 = vrsqrt.f32 %v1459_v28  ;;  %2284 = vmatmul.mubr.bf16.vlgmr.msra.gmra.mrb[16].mxu0 %v1503_v9  ;;  %v3516_v63 = vmul.f32 0.0625, %v1297_v42 }
 0x403   : > { %v1398_v27 = vmul.f32 %v3512_v50, %v3512_v50 }
 0x404   : > { %v1347_v61 = vpop.xlane.xlu0 %1346  ;;  %v1399_v3 = vmul.f32 %v3516_v63, %v3516_v63 }
 0x405   : > { %v1384_v56 = vmul.f32 0.0625, %v1347_v61  ;;  %v1349_v59 = vpop.xlane.xlu1 %1348 }
 0x406   : > { %v1385_v2 = vmul.f32 0.0625, %v1349_v59 }
 0x407   : > { %v1416_v10 = vsub.f32 %v1384_v56, %v1400_v6  ;;  %v2523_v16 = vpop.eup %2522 }
 0x408   : > { %v1417_v18 = vsub.f32 %v1385_v2, %v1401_v62  ;;  %v1343_v8 = vpop.xlane.xlu0 %1342  ;;  %v2525_v17 = vpop.eup %2524  ;;  %v1492_v22 = vmul.f32 %v2523_v16, %v1444_v14 }
 0x409   : > { %v1432_v41 = vmax.f32 %v1416_v10, 0.0  ;;  %v1382_v30 = vmul.f32 0.0625, %v1343_v8  ;;  %v1345_v43 = vpop.xlane.xlu1 %1344  ;;  %v1493_v12 = vmul.f32 %v2525_v17, %v1445_v23  ;;  %v1448_v8 = vsub.f32 %v3405_v1, %v3506_v4 }
 0x40a   : > { %v1433_v51 = vmax.f32 %v1417_v18, 0.0  ;;  %v1383_v29 = vmul.f32 0.0625, %v1345_v43  ;;  %v1447_v4 = vsub.f32 %v3421_v35, %v3516_v63 }
 0x40b   : > { %v2527_v11 = vpop.eup %2526  ;;  %v1464_v21 = vadd.f32 1e-05, %v1432_v41  ;;  %v1414_v0 = vsub.f32 %v1382_v30, %v1398_v27  ;;  %v1505_v60 = vpack.c.bf16 %v1493_v12, %v1492_v22  ;;  %v1449_v41 = vsub.f32 %v3411_v19, %v3508_v7 }
 0x40c   : > { %v2529_v36 = vpop.eup %2528  ;;  %v1465_v37 = vadd.f32 1e-05, %v1433_v51  ;;  %v1415_v24 = vsub.f32 %v1383_v29, %v1399_v3  ;;  %v1307_v40 = vpop.xlane.xlu0 %1306  ;;  %v1490_v46 = vmul.f32 %v2527_v11, %v1442_v15  ;;  %v1446_v51 = vsub.f32 %v3416_v33, %v3512_v50 }
 0x40d   : > { %v1430_v5 = vmax.f32 %v1414_v0, 0.0  ;;  %v1309_v48 = vpop.xlane.xlu1 %1308  ;;  %v1491_v25 = vmul.f32 %v2529_v36, %v1443_v57  ;;  %2530 = vrsqrt.f32 %v1464_v21  ;;  %v1372_v6 = vmul.f32 0.0625, %v1307_v40 }
 0x40e   : > { %v1431_v20 = vmax.f32 %v1415_v24, 0.0  ;;  %2532 = vrsqrt.f32 %v1465_v37  ;;  %v1373_v2 = vmul.f32 0.0625, %v1309_v48 }
 0x40f   : > { %v1462_v39 = vadd.f32 1e-05, %v1430_v5  ;;  %v1504_v44 = vpack.c.bf16 %v1491_v25, %v1490_v46  ;;  %v1404_v30 = vmul.f32 %v1372_v6, %v1372_v6 }
 0x410   : > { %v1463_v45 = vadd.f32 1e-05, %v1431_v20  ;;  %v1303_v28 = vpop.xlane.xlu0 %1302  ;;  %v1405_v29 = vmul.f32 %v1373_v2, %v1373_v2 }
 0x411   : > { %2534 = vrsqrt.f32 %v1462_v39  ;;  %v1370_v34 = vmul.f32 0.0625, %v1303_v28  ;;  %2287 = vmatprep.mubr.bf16.mxu0 %v1504_v44  ;;  %v1305_v9 = vpop.xlane.xlu1 %1304 }
 0x412   : > { %2536 = vrsqrt.f32 %v1463_v45  ;;  %v1371_v42 = vmul.f32 0.0625, %v1305_v9  ;;  %2288 = vmatmul.mubr.bf16.gmra.mrb[20].mxu0 %v1505_v60 }
 0x413   : > { %v1402_v56 = vmul.f32 %v1370_v34, %v1370_v34  ;;  %v1450_v63 = vsub.f32 %v3450_v53, %v1370_v34  ;;  %v2445_v34 = vld [vmem:[#allocation8 + $0x18] sm:$0xff]  }
 0x414   : > { %v1351_v61 = vpop.xlane.xlu0 %1350  ;;  %v1403_v10 = vmul.f32 %v1371_v42, %v1371_v42  ;;  %v1451_v45 = vsub.f32 %v3455_v54, %v1371_v42  ;;  %v2446_v42 = vld [vmem:[#allocation8 + $0x20] sm:$0xff]  }
 0x415   : > { %v1386_v59 = vmul.f32 0.0625, %v1351_v61  ;;  %v1353_v62 = vpop.xlane.xlu1 %1352  ;;  %v1452_v61 = vsub.f32 %v3439_v47, %v1372_v6  ;;  %v2447_v6 = vld [vmem:[#allocation8 + $0x28] sm:$0xff]  }
 0x416   : > { %v1387_v16 = vmul.f32 0.0625, %v1353_v62 }
 0x417   : > { %v1418_v14 = vsub.f32 %v1386_v59, %v1402_v56  ;;  %v2531_v18 = vpop.eup %2530  ;;  %v1453_v59 = vsub.f32 %v3445_v52, %v1373_v2  ;;  %v2448_v2 = vld [vmem:[#allocation8 + $0x30] sm:$0xff]  }
 0x418   : > { %v1419_v17 = vsub.f32 %v1387_v16, %v1403_v10  ;;  %v1355_v23 = vpop.xlane.xlu0 %1354  ;;  %v2533_v27 = vpop.eup %2532  ;;  %v1496_v36 = vmul.f32 %v2531_v18, %v1448_v8  ;;  %v2444_v8 = vld [vmem:[#allocation8 + $0x10] sm:$0xff]  }
 0x419   : > { %v1434_v43 = vmax.f32 %v1418_v14, 0.0  ;;  %v1388_v15 = vmul.f32 0.0625, %v1355_v23  ;;  %v1357_v3 = vpop.xlane.xlu1 %1356  ;;  %v1497_v46 = vmul.f32 %v2533_v27, %v1449_v41  ;;  %2303 = vmatprep.subr.bf16.mxu1 %v2444_v8  ;;  %v3545_v23 = vld [vmem:[%s3661_s6] ss:$0 sm:$0xff] }
 0x41a   : > { %v1435_v11 = vmax.f32 %v1419_v17, 0.0  ;;  %v1389_v57 = vmul.f32 0.0625, %v1357_v3  ;;  %2304 = vmatpush3.bf16.msra.mxu1 %v2444_v8  ;;  %v2449_v17 = vld [vmem:[#allocation8 + $0x38] sm:$0xff]  }
 0x41b   : > { %v2535_v21 = vpop.eup %2534  ;;  %v1466_v0 = vadd.f32 1e-05, %v1434_v43  ;;  %v1420_v22 = vsub.f32 %v1388_v15, %v1404_v30  ;;  %v1507_v39 = vpack.c.bf16 %v1497_v46, %v1496_v36  ;;  %2305 = vmatprep.subr.bf16.mxu1 %v2445_v34 }
 0x41c   : > { %v2537_v37 = vpop.eup %2536  ;;  %v1467_v24 = vadd.f32 1e-05, %v1435_v11  ;;  %v1421_v7 = vsub.f32 %v1389_v57, %v1405_v29  ;;  %v1494_v40 = vmul.f32 %v2535_v21, %v1446_v51 }
 0x41d   : > { %2538 = vrsqrt.f32 %v1466_v0  ;;  %v1436_v12 = vmax.f32 %v1420_v22, 0.0  ;;  %v1495_v5 = vmul.f32 %v2537_v37, %v1447_v4 }
 0x41e   : > { %2540 = vrsqrt.f32 %v1467_v24  ;;  %v1437_v50 = vmax.f32 %v1421_v7, 0.0  ;;  %2306 = vmatpush3.bf16.msra.mxu1 %v2445_v34 }
 0x41f   : > { %v1468_v48 = vadd.f32 1e-05, %v1436_v12  ;;  %v1506_v25 = vpack.c.bf16 %v1495_v5, %v1494_v40  ;;  %2307 = vmatprep.subr.bf16.mxu1 %v2446_v42 }
 0x420   : > { %v1469_v20 = vadd.f32 1e-05, %v1437_v50 }
 0x421   : > { %2542 = vrsqrt.f32 %v1468_v48  ;;  %2291 = vmatprep.mubr.bf16.mxu0 %v1506_v25 }
 0x422   : > { %2544 = vrsqrt.f32 %v1469_v20  ;;  %2292 = vmatmul.mubr.bf16.gmra.mrb[24].mxu0 %v1507_v39  ;;  %2308 = vmatpush3.bf16.msra.mxu1 %v2446_v42 }
 0x423   : > { %2309 = vmatprep.subr.bf16.mxu1 %v2447_v6 }
 0x426   : > { %2310 = vmatpush3.bf16.msra.mxu1 %v2447_v6 }
 0x427   : > { %v2539_v44 = vpop.eup %2538  ;;  %2311 = vmatprep.subr.bf16.mxu1 %v2448_v2 }
 0x428   : > { %v2541_v28 = vpop.eup %2540  ;;  %v1498_v60 = vmul.f32 %v2539_v44, %v1450_v63 }
 0x429   : > { %v1499_v9 = vmul.f32 %v2541_v28, %v1451_v45 }
 0x42a   : > { %2312 = vmatpush3.bf16.msra.mxu1 %v2448_v2 }
 0x42b   : > { %v2543_v56 = vpop.eup %2542  ;;  %v1508_v62 = vpack.c.bf16 %v1499_v9, %v1498_v60  ;;  %2313 = vmatprep.subr.bf16.mxu1 %v2449_v17 }
 0x42c   : > { %v2545_v10 = vpop.eup %2544  ;;  %v1500_v16 = vmul.f32 %v2543_v56, %v1452_v61 }
 0x42d   : > { %2295 = vmatprep.mubr.bf16.mxu0 %v1508_v62  ;;  %v1501_v14 = vmul.f32 %v2545_v10, %v1453_v59 }
 0x42e   : > { %2314 = vmatpush3.bf16.msra.mxu1 %v2449_v17 }
 0x42f   : > { %v1509_v18 = vpack.c.bf16 %v1501_v14, %v1500_v16 }
 0x431   : > { %2296 = vmatmul.mubr.bf16.gmra.mrb[28].mxu0 %v1509_v18 }
 0x4d5   : > { %v2285_v27 = vpop.f32.mrb[16].mxu0 }
 0x4d6   : > { %v1624_v41 = vadd.f32 %v2285_v27, %v3545_v23  ;;  %v1615_v30 = vpop.f32.mrb[17].mxu0 }
 0x4d7   : > { %v1616_v43 = vadd.f32 %v3545_v23, %v1615_v30  ;;  %v2286_v15 = vpop.f32.mrb[18].mxu0 }
 0x4d8   : > { %v1696_v3 = vmul.f32 0.70710677, %v1624_v41  ;;  %v1627_v51 = vadd.f32 %v2286_v15, %v3545_v23  ;;  %v1618_v29 = vpop.f32.mrb[19].mxu0  ;;  %v1680_v5 = vmul.f32 0.5, %v1624_v41 }
 0x4d9   : > { %v1694_v11 = vmul.f32 0.70710677, %v1616_v43  ;;  %v1619_v57 = vadd.f32 %v3545_v23, %v1618_v29  ;;  %v1678_v39 = vmul.f32 0.5, %v1616_v43 }
 0x4da   : > { %2546 = verf.f32 %v1696_v3  ;;  %v1697_v21 = vmul.f32 0.70710677, %v1627_v51  ;;  %v1681_v50 = vmul.f32 0.5, %v1627_v51 }
 0x4db   : > { %2548 = verf.f32 %v1694_v11  ;;  %v1695_v4 = vmul.f32 0.70710677, %v1619_v57  ;;  %v1679_v63 = vmul.f32 0.5, %v1619_v57 }
 0x4dc   : > { %2550 = verf.f32 %v1697_v21 }
 0x4dd   : > { %2552 = verf.f32 %v1695_v4 }
 0x4e4   : > { %v2547_v0 = vpop.eup %2546 }
 0x4e5   : > { %v2549_v22 = vpop.eup %2548  ;;  %v1728_v36 = vadd.f32 1.0, %v2547_v0  ;;  %v2289_v37 = vpop.f32.mrb[20].mxu0 }
 0x4e6   : > { %v2551_v24 = vpop.eup %2550  ;;  %v1726_v7 = vadd.f32 1.0, %v2549_v22  ;;  %v1640_v40 = vadd.f32 %v2289_v37, %v3545_v23  ;;  %v1631_v46 = vpop.f32.mrb[21].mxu0 }
 0x4e7   : > { %v2553_v12 = vpop.eup %2552  ;;  %v1729_v48 = vadd.f32 1.0, %v2551_v24  ;;  %v1632_v25 = vadd.f32 %v3545_v23, %v1631_v46  ;;  %v2290_v20 = vpop.f32.mrb[22].mxu0  ;;  %v1744_v60 = vmul.f32 %v1728_v36, %v1680_v5 }
 0x4e8   : > { %v1727_v44 = vadd.f32 1.0, %v2553_v12  ;;  %v1700_v45 = vmul.f32 0.70710677, %v1640_v40  ;;  %v1634_v28 = vpop.f32.mrb[23].mxu0  ;;  %v1643_v56 = vadd.f32 %v2290_v20, %v3545_v23  ;;  %v1742_v59 = vmul.f32 %v1726_v7, %v1678_v39 }
 0x4e9   : > { %v1745_v9 = vmul.f32 %v1729_v48, %v1681_v50  ;;  %v1698_v61 = vmul.f32 0.70710677, %v1632_v25  ;;  %v1635_v10 = vadd.f32 %v3545_v23, %v1634_v28  ;;  %v1684_v30 = vmul.f32 0.5, %v1640_v40 }
 0x4ea   : > { %v1743_v62 = vmul.f32 %v1727_v44, %v1679_v63  ;;  %2554 = verf.f32 %v1700_v45  ;;  %v1701_v14 = vmul.f32 0.70710677, %v1643_v56  ;;  %v1682_v29 = vmul.f32 0.5, %v1632_v25 }
 0x4eb   : > { %v1759_v16 = vpack.c.bf16 %v1745_v9, %v1744_v60  ;;  %2556 = verf.f32 %v1698_v61  ;;  %v1699_v18 = vmul.f32 0.70710677, %v1635_v10  ;;  %v1685_v11 = vmul.f32 0.5, %v1643_v56 }
 0x4ec   : > { %v1758_v8 = vpack.c.bf16 %v1743_v62, %v1742_v59  ;;  %2558 = verf.f32 %v1701_v14  ;;  %v1683_v0 = vmul.f32 0.5, %v1635_v10 }
 0x4ed   : > { %2560 = verf.f32 %v1699_v18 }
 0x4ee   : > { %2315 = vmatprep.mubr.bf16.mxu1 %v1758_v8 }
 0x4ef   : > { %2316 = vmatmul.mubr.bf16.vlgmr.msra.gmra.mrb[16].mxu1 %v1759_v16 }
 0x4f4   : > { %v2555_v34 = vpop.eup %2554 }
 0x4f5   : > { %v2557_v42 = vpop.eup %2556  ;;  %v2293_v6 = vpop.f32.mrb[24].mxu0  ;;  %v1732_v2 = vadd.f32 1.0, %v2555_v34 }
 0x4f6   : > { %v1656_v17 = vadd.f32 %v2293_v6, %v3545_v23  ;;  %v1647_v27 = vpop.f32.mrb[25].mxu0  ;;  %v2559_v41 = vpop.eup %2558  ;;  %v1730_v43 = vadd.f32 1.0, %v2557_v42 }
 0x4f7   : > { %v1648_v15 = vadd.f32 %v3545_v23, %v1647_v27  ;;  %v2294_v3 = vpop.f32.mrb[26].mxu0  ;;  %v2561_v51 = vpop.eup %2560  ;;  %v1733_v57 = vadd.f32 1.0, %v2559_v41  ;;  %v1748_v24 = vmul.f32 %v1732_v2, %v1684_v30 }
 0x4f8   : > { %v1704_v21 = vmul.f32 0.70710677, %v1656_v17  ;;  %v1650_v4 = vpop.f32.mrb[27].mxu0  ;;  %v1731_v22 = vadd.f32 1.0, %v2561_v51  ;;  %v1659_v37 = vadd.f32 %v2294_v3, %v3545_v23  ;;  %v1746_v46 = vmul.f32 %v1730_v43, %v1682_v29 }
 0x4f9   : > { %v1702_v36 = vmul.f32 0.70710677, %v1648_v15  ;;  %v1749_v7 = vmul.f32 %v1733_v57, %v1685_v11  ;;  %v1651_v40 = vadd.f32 %v3545_v23, %v1650_v4  ;;  %v1688_v56 = vmul.f32 0.5, %v1656_v17 }
 0x4fa   : > { %2562 = verf.f32 %v1704_v21  ;;  %v1747_v12 = vmul.f32 %v1731_v22, %v1683_v0  ;;  %v1705_v5 = vmul.f32 0.70710677, %v1659_v37  ;;  %v1686_v18 = vmul.f32 0.5, %v1648_v15 }
 0x4fb   : > { %2564 = verf.f32 %v1702_v36  ;;  %v1703_v50 = vmul.f32 0.70710677, %v1651_v40  ;;  %v1761_v48 = vpack.c.bf16 %v1749_v7, %v1748_v24  ;;  %v1689_v8 = vmul.f32 0.5, %v1659_v37 }
 0x4fc   : > { %2566 = verf.f32 %v1705_v5  ;;  %v1760_v25 = vpack.c.bf16 %v1747_v12, %v1746_v46  ;;  %v1687_v6 = vmul.f32 0.5, %v1651_v40 }
 0x4fd   : > { %2568 = verf.f32 %v1703_v50 }
 0x4fe   : > { %2319 = vmatprep.mubr.bf16.mxu1 %v1760_v25 }
 0x4ff   : > { %2320 = vmatmul.mubr.bf16.gmra.mrb[20].mxu1 %v1761_v48 }
 0x504   : > { %v2563_v20 = vpop.eup %2562  ;;  %v2297_v39 = vpop.f32.mrb[28].mxu0 }
 0x505   : > { %v2565_v63 = vpop.eup %2564  ;;  %v1672_v44 = vadd.f32 %v2297_v39, %v3545_v23  ;;  %v1663_v45 = vpop.f32.mrb[29].mxu0  ;;  %v1736_v28 = vadd.f32 1.0, %v2563_v20  ;;  %v2123_v20 = vld [vmem:[%s3663_s8] ss:$0 sm:$0xff] }
 0x506   : > { %v1664_v60 = vadd.f32 %v3545_v23, %v1663_v45  ;;  %v2298_v9 = vpop.f32.mrb[30].mxu0  ;;  %v2567_v61 = vpop.eup %2566  ;;  %v1734_v59 = vadd.f32 1.0, %v2565_v63 }
 0x507   : > { %v1708_v62 = vmul.f32 0.70710677, %v1672_v44  ;;  %v1675_v10 = vadd.f32 %v2298_v9, %v3545_v23  ;;  %v1666_v16 = vpop.f32.mrb[31].mxu0  ;;  %v2569_v14 = vpop.eup %2568  ;;  %v1737_v34 = vadd.f32 1.0, %v2567_v61  ;;  %v1752_v41 = vmul.f32 %v1736_v28, %v1688_v56 }
 0x508   : > { %v1706_v42 = vmul.f32 0.70710677, %v1664_v60  ;;  %v1735_v2 = vadd.f32 1.0, %v2569_v14  ;;  %v1667_v43 = vadd.f32 %v3545_v23, %v1666_v16  ;;  %v1750_v17 = vmul.f32 %v1734_v59, %v1686_v18 }
 0x509   : > { %2570 = verf.f32 %v1708_v62  ;;  %v1709_v27 = vmul.f32 0.70710677, %v1675_v10  ;;  %v1753_v30 = vmul.f32 %v1737_v34, %v1689_v8  ;;  %v1692_v0 = vmul.f32 0.5, %v1672_v44 }
 0x50a   : > { %2572 = verf.f32 %v1706_v42  ;;  %v1751_v3 = vmul.f32 %v1735_v2, %v1687_v6  ;;  %v1707_v51 = vmul.f32 0.70710677, %v1667_v43  ;;  %v1693_v22 = vmul.f32 0.5, %v1675_v10 }
 0x50b   : > { %2574 = verf.f32 %v1709_v27  ;;  %v1763_v29 = vpack.c.bf16 %v1753_v30, %v1752_v41  ;;  %v1690_v40 = vmul.f32 0.5, %v1664_v60  ;;  %v1691_v46 = vmul.f32 0.5, %v1667_v43 }
 0x50c   : > { %v1762_v11 = vpack.c.bf16 %v1751_v3, %v1750_v17  ;;  %2576 = verf.f32 %v1707_v51 }
 0x50e   : > { %2323 = vmatprep.mubr.bf16.mxu1 %v1762_v11 }
 0x50f   : > { %2324 = vmatmul.mubr.bf16.gmra.mrb[24].mxu1 %v1763_v29 }
 0x513   : > { %v2571_v15 = vpop.eup %2570 }
 0x514   : > { %v2573_v57 = vpop.eup %2572  ;;  %v1740_v21 = vadd.f32 1.0, %v2571_v15 }
 0x515   : > { %v2575_v4 = vpop.eup %2574  ;;  %v1738_v37 = vadd.f32 1.0, %v2573_v57 }
 0x516   : > { %v1741_v36 = vadd.f32 1.0, %v2575_v4  ;;  %v2577_v23 = vpop.eup %2576  ;;  %v1756_v24 = vmul.f32 %v1740_v21, %v1692_v0 }
 0x517   : > { %v1739_v12 = vadd.f32 1.0, %v2577_v23  ;;  %v1754_v50 = vmul.f32 %v1738_v37, %v1690_v40 }
 0x518   : > { %v1757_v7 = vmul.f32 %v1741_v36, %v1693_v22 }
 0x519   : > { %v1755_v48 = vmul.f32 %v1739_v12, %v1691_v46 }
 0x51a   : > { %v1765_v5 = vpack.c.bf16 %v1757_v7, %v1756_v24 }
 0x51b   : > { %v1764_v25 = vpack.c.bf16 %v1755_v48, %v1754_v50 }
 0x51d   : > { %2327 = vmatprep.mubr.bf16.mxu1 %v1764_v25 }
 0x51e   : > { %2328 = vmatmul.mubr.bf16.gmra.mrb[28].mxu1 %v1765_v5 }
 0x5c2   : > { %v2317_v39 = vpop.f32.mrb[16].mxu1 }
 0x5c3   : > { %v1880_v63 = vadd.f32 %v2317_v39, %v2123_v20  ;;  %v1871_v44 = vpop.f32.mrb[17].mxu1 }
 0x5c4   : > { %v1872_v45 = vadd.f32 %v2123_v20, %v1871_v44  ;;  %v2318_v28 = vpop.f32.mrb[18].mxu1 }
 0x5c5   : > { %v1936_v60 = vadd.f32 %v1880_v63, %v3336_v31  ;;  %v1883_v9 = vadd.f32 %v2318_v28, %v2123_v20  ;;  %v1874_v61 = vpop.f32.mrb[19].mxu1 }
 0x5c6   : > { %v1934_v56 = vadd.f32 %v1872_v45, %v3342_v26  ;;  %v1875_v59 = vadd.f32 %v2123_v20, %v1874_v61 }
 0x5c7   : > { %1952 = vst [vmem:[%s3571_s25 + $0x10] sm:$0xff] %v1936_v60  ;;  %v1937_v62 = vadd.f32 %v1883_v9, %v3350_v32 }
 0x5c8   : > { %1950 = vst [vmem:[%s3571_s25] sm:$0xff] %v1934_v56  ;;  %v1935_v10 = vadd.f32 %v1875_v59, %v3355_v38 }
 0x5c9   : > { %1953 = vst [vmem:[%s3571_s25 + $0x18] sm:$0xff] %v1937_v62 }
 0x5ca   : > { %1951 = vst [vmem:[%s3571_s25 + $0x8] sm:$0xff] %v1935_v10 }
 0x5d2   : > { %v2321_v31 = vpop.f32.mrb[20].mxu1 }
 0x5d3   : > { %v1896_v26 = vadd.f32 %v2321_v31, %v2123_v20  ;;  %v1887_v16 = vpop.f32.mrb[21].mxu1 }
 0x5d4   : > { %v1888_v14 = vadd.f32 %v2123_v20, %v1887_v16  ;;  %v2322_v18 = vpop.f32.mrb[22].mxu1 }
 0x5d5   : > { %v1940_v8 = vadd.f32 %v1896_v26, %v3369_v13  ;;  %v1899_v34 = vadd.f32 %v2322_v18, %v2123_v20  ;;  %v1890_v42 = vpop.f32.mrb[23].mxu1 }
 0x5d6   : > { %v1938_v6 = vadd.f32 %v1888_v14, %v3382_v55  ;;  %v1891_v32 = vadd.f32 %v2123_v20, %v1890_v42 }
 0x5d7   : > { %1956 = vst [vmem:[%s3571_s25 + $0x30] sm:$0xff] %v1940_v8  ;;  %v1941_v38 = vadd.f32 %v1899_v34, %v3375_v49 }
 0x5d8   : > { %1954 = vst [vmem:[%s3571_s25 + $0x20] sm:$0xff] %v1938_v6  ;;  %v1939_v2 = vadd.f32 %v1891_v32, %v3387_v58 }
 0x5d9   : > { %1957 = vst [vmem:[%s3571_s25 + $0x38] sm:$0xff] %v1941_v38 }
 0x5da   : > { %1955 = vst [vmem:[%s3571_s25 + $0x28] sm:$0xff] %v1939_v2 }
 0x5e2   : > { %v2325_v27 = vpop.f32.mrb[24].mxu1 }
 0x5e3   : > { %v1912_v41 = vadd.f32 %v2325_v27, %v2123_v20  ;;  %v1903_v13 = vpop.f32.mrb[25].mxu1 }
 0x5e4   : > { %v1904_v30 = vadd.f32 %v2123_v20, %v1903_v13  ;;  %v2326_v43 = vpop.f32.mrb[26].mxu1 }
 0x5e5   : > { %v1944_v55 = vadd.f32 %v1912_v41, %v3405_v1  ;;  %v1915_v17 = vadd.f32 %v2326_v43, %v2123_v20  ;;  %v1906_v3 = vpop.f32.mrb[27].mxu1 }
 0x5e6   : > { %v1942_v49 = vadd.f32 %v1904_v30, %v3416_v33  ;;  %v1907_v51 = vadd.f32 %v2123_v20, %v1906_v3 }
 0x5e7   : > { %1960 = vst [vmem:[%s3571_s25 + $0x50] sm:$0xff] %v1944_v55  ;;  %v1945_v58 = vadd.f32 %v1915_v17, %v3411_v19 }
 0x5e8   : > { %1958 = vst [vmem:[%s3571_s25 + $0x40] sm:$0xff] %v1942_v49  ;;  %v1943_v29 = vadd.f32 %v1907_v51, %v3421_v35 }
 0x5e9   : > { %1961 = vst [vmem:[%s3571_s25 + $0x58] sm:$0xff] %v1945_v58 }
 0x5ea   : > { %1959 = vst [vmem:[%s3571_s25 + $0x48] sm:$0xff] %v1943_v29 }
 0x5f1   : > { %v2329_v11 = vpop.f32.mrb[28].mxu1 }
 0x5f2   : > { %v1928_v15 = vadd.f32 %v2329_v11, %v2123_v20  ;;  %v1919_v1 = vpop.f32.mrb[29].mxu1 }
 0x5f3   : > { %v1920_v57 = vadd.f32 %v2123_v20, %v1919_v1  ;;  %v2330_v21 = vpop.f32.mrb[30].mxu1 }
 0x5f4   : > { %v1948_v33 = vadd.f32 %v1928_v15, %v3439_v47  ;;  %v1931_v19 = vadd.f32 %v2330_v21, %v2123_v20  ;;  %v1922_v4 = vpop.f32.mrb[31].mxu1 }
 0x5f5   : > { %v1946_v35 = vadd.f32 %v1920_v57, %v3450_v53  ;;  %v1923_v0 = vadd.f32 %v2123_v20, %v1922_v4 }
 0x5f6   : > { %1964 = vst [vmem:[%s3571_s25 + $0x70] sm:$0xff] %v1948_v33  ;;  %v1949_v22 = vadd.f32 %v1931_v19, %v3445_v52 }
 0x5f7   : > { %1962 = vst [vmem:[%s3571_s25 + $0x60] sm:$0xff] %v1946_v35  ;;  %v1947_v47 = vadd.f32 %v1923_v0, %v3455_v54 }
 0x5f8   : > { %1965 = vst [vmem:[%s3571_s25 + $0x78] sm:$0xff] %v1949_v22 }
 0x5f9   : > { %1963 = vst [vmem:[%s3571_s25 + $0x68] sm:$0xff] %v1947_v47 }
 0x5fa   : > { %2719 = shalt.err (!%p2716_p0)
}
 0x5fb   : > { %s2720_s14 = scalar_lea.hbm %s3604_s26, 2048  ;;  %s2724_s15 = scalar_lea.hbm %s3664_s9, 4096 }
 0x5fc   : > { %p2721_p10 = scmp.ne.s32.totalorder %s3604_s26, %s2720_s14  ;;  %p2725_p4 = scmp.lt.u32.totalorder %s3604_s26, %s3664_s9 }
 0x5fd   : > { %p2726_p12 = scmp.lt.u32.totalorder %s2724_s15, %s2720_s14  ;;  %p2728_p8 = scmp.lt.u32.totalorder %s2720_s14, %s3604_s26 }
 0x5fe   : > { %p2722_p2 = pnand %p2721_p10, %p3690_p11 }
 0x5ff   : > { %p2727_p7 = por %p2726_p12, %p2725_p4 }
 0x600   : > { %p2723_p3 = pneg %p2722_p2 }
 0x601   : > { %p2729_p13 = por %p2728_p8, %p2727_p7 }
 0x603   : > { %p2730_p1 = pnand %p2729_p13, %p2723_p3 }
 0x605   : > { %2733 = shalt.err (!%p2730_p1)
}
 0x606   : > { %s2790_s22 = smov 128   ;;  %s2791_s25 = smov 8  }
 0x607   : > { %2347 = dma.vmem_to_hbm [thread:$0]  (%p3690_p11), %s3606_s29, 2048, %s3604_s26, %s3614_s13, %s2790_s22, %s2790_s22, %s2791_s25  }
 0x608 PF: > { %s3691_s27 = sld [smem:[#allocation15_spill]]  ;;  %s3692_s23 = sld [smem:[#allocation19_spill]] }
 0x609   : > { %p2374_p6 = scmp.ge.s32.totalorder %s2780_s12, 2 }
 0x60e   : > { %s1995_s28 = sand.u32 1, %s3691_s27   ;;  %p3693_p9 = scmp.ne.s32.totalorder %s3692_s23, 0 }
 0x60f   : > { %s1996_s30 = scalar_lea.sflag [#allocation4], %s1995_s28 }
 0x610   : > { %p2363_p5 = pnand %p2374_p6, %p3693_p9 }
 0x612   : > { %2763 = dma.done.wait (!%p2363_p5), %s1996_s30, 2048  }
 0x613   : > { %2765 = vsyncadd (!%p2363_p5), %s1996_s30, 4294965248  ;;  %s3694_s12 = sld [smem:[#allocation17_spill]]  ;;  %s3695_s18 = sld [smem:[#allocation16_spill]] }
 0x614   : > { %s3696_s11 = sld [smem:[#allocation18_spill]]  ;;  %s3697_s30 = smov %s2772_s10 }
 0x619   : > { %p22_p0 = scmp.ge.s32.totalorder %s3694_s12, 4   ;;  %s3698_s10 = smov %s3695_s18 }
 0x61b   :  { %24 = sbr.rel (!%p22_p0) target bundleno = 6 (0x6), region = 108 }
 0x622   :  { %2001 = vsyncpa [#allocation3], 1 }
 0x623   :  { %2003 = vsyncpa [#allocation3 + $0x1], 1 }
 0x624   :  { %2004 = vsyncpa [#allocation6], 1 }
 0x625   :  { %2005 = vsyncpa [#allocation9], 1 }
 0x626   :  { %2006 = vsyncpa [#allocation4], 1 }
 0x627   :  { %2008 = vsyncpa [#allocation4 + $0x1], 1 }

// kernel: tpu_custom_call.1
= control target key start
LH: loop header
LB: loop body
LE: loop exit
PB: predicated region body
PF: predicated region fallthrough
CT: control target
= control target key end

     0   :  { %14 = vsyncpa [#allocation3], 0  ;;  %s3655_s0 = inlined_call_operand.vmem [shape: f32[2,128,128], index: 0, kind: input, shape index: {}]   ;;  %s3656_s1 = inlined_call_operand.hbm [shape: bf16[128,128], index: 1, kind: input, shape index: {}]   ;;  %s3657_s2 = inlined_call_operand.vmem [shape: f32[128,1], index: 2, kind: input, shape index: {}]   ;;  %s3658_s3 = inlined_call_operand.hbm [shape: bf16[128,128], index: 3, kind: input, shape index: {}]   ;;  %s3659_s4 = inlined_call_operand.vmem [shape: f32[128,1], index: 4, kind: input, shape index: {}]   ;;  %s3660_s5 = inlined_call_operand.hbm [shape: bf16[128,128], index: 5, kind: input, shape index: {}]   ;;  %s3661_s6 = inlined_call_operand.vmem [shape: f32[1,128], index: 6, kind: input, shape index: {}]   ;;  %s3662_s7 = inlined_call_operand.hbm [shape: bf16[128,128], index: 7, kind: input, shape index: {}]   ;;  %s3663_s8 = inlined_call_operand.vmem [shape: f32[1,128], index: 8, kind: input, shape index: {}]   ;;  %s3664_s9 = inlined_call_operand.hbm [shape: f32[2,128,128], index: 9, kind: output, shape index: {}]  }
   0x1   :  { %15 = vsyncpa [#allocation6], 0 }
   0x2   :  { %16 = vsyncpa [#allocation9], 0 }
   0x3   :  { %17 = vsyncpa [#allocation4], 0 }
   0x4   :  { %19 = vsyncpa [#allocation4 + $0x1], 0  ;;  %s2842_s30 = smov 0   ;;  %s2844_s10 = smov 0  }
   0x5   :  { %s2846_s11 = smov 0   ;;  %s2848_s12 = smov 0  }
   0x6 LB: > { %3673 = sst [smem:[#allocation15_spill]] %s2768_s30  ;;  %s2863_s13 = sadd.s32 4294967295, %s2780_s12   ;;  %s2780_s12 = sphi %s2848_s12, %s3694_s12   ;;  %s2776_s11 = sphi %s2846_s11, %s3696_s11   ;;  %s2772_s10 = sphi %s2844_s10, %s3698_s10   ;;  %s2768_s30 = sphi %s2842_s30, %s3697_s30  }
   0x7   : > { %3674 = sst [smem:[#allocation16_spill]] %s2776_s11  ;;  %s2083_s14 = sadd.s32 4294967294, %s2780_s12  }
   0x8   : > { %s2867_s15 = sadd.s32 1, %s2780_s12   ;;  %s226_s16 = sadd.s32 1, %s2776_s11 }
   0x9   : > { %3675 = sst [smem:[#allocation17_spill]] %s2867_s15  ;;  %s223_s17 = ssub.s32 %s2780_s12, %s2867_s15 }
   0xa   : > { %p236_p0 = scmp.ne.s32.totalorder %s2776_s11, %s2772_s10  ;;  %p224_p1 = scmp.eq.s32.totalorder %s223_s17, 0 }
   0xb   : > { %p237_p2 = scmp.eq.s32.totalorder %s2863_s13, 1  ;;  %p242_p3 = scmp.ne.s32.totalorder %s2772_s10, %s2768_s30 }
   0xc   : > { %p243_p4 = scmp.eq.s32.totalorder %s2083_s14, 1  ;;  %p2084_p7 = scmp.ge.s32.totalorder %s2780_s12, 1 }
   0xd   : > { %s2878_s18 = scalar_select %p224_p1, %s2776_s11, %s226_s16  }
   0xe   : > { %p2880_p5 = por %p237_p2, %p236_p0  ;;  %p2884_p6 = por %p243_p4, %p242_p3 }
   0xf   : > { %3676 = sst [smem:[#allocation18_spill]] %s2878_s18  ;;  %p250_p8 = scmp.lt.s32.totalorder %s2780_s12, 3 }
  0x10   : > { %s3677_s19 = scalar_select %p2880_p5, 1, 0 }
  0x11   : > { %s3678_s20 = scalar_select %p2884_p6, 1, 0 }
  0x12   : > { %p3665_p9 = scmp.eq.s32.totalorder %s2863_s13, 0  ;;  %p2891_p10 = pnand %p2084_p7, %p250_p8 }
  0x13   : > { %3679 = sst [smem:[#allocation19_spill]] %s3678_s20  ;;  %s2782_s22 = smov [#allocation5]  }
  0x14   : > { %s3680_s21 = scalar_select %p2891_p10, 1, 0 }
  0x15   : > { %p2349_p11 = pneg %p2891_p10  ;;  %s278_s23 = sshll.u32 %s2782_s22, 4  ;;  %s2897_s23 = int_to_ptr.vmem [resolvable:$true] %s278_s23 }
  0x16   : > { %s2783_s25 = smov [#allocation2]   ;;  %s2784_s27 = smov [#allocation7]  }
  0x17   : > { %p2901_p12 = pnand %p3665_p9, %p2349_p11  ;;  %s262_s26 = sshll.u32 %s2783_s25, 4  ;;  %s2905_s26 = int_to_ptr.vmem [resolvable:$true] %s262_s26 }
  0x18   : > { %s2907_s28 = sshll.u32 %s2784_s27, 4  ;;  %s2594_s16 = scalar_lea.hbm %s3658_s3, 1024  ;;  %s295_s28 = int_to_ptr.vmem [resolvable:$true] %s2907_s28 }
  0x19   : > { %p2595_p13 = scmp.ne.s32.totalorder %s3658_s3, %s2594_s16  ;;  %p2917_p0 = pneg %p2901_p12 }
  0x1a   : > { %p2601_p3 = scmp.lt.u32.totalorder %s2594_s16, %s3658_s3 }
  0x1b   : > { %p2597_p1 = pnand %p2917_p0, %p2595_p13 }
  0x1d   : > { %p2598_p2 = pneg %p2597_p1 }
  0x1f   : > { %p2603_p4 = pnand %p2601_p3, %p2598_p2 }
  0x21   : > { %2606 = shalt.err (!%p2603_p4)
}
  0x22   : > { %s2607_s29 = scalar_lea.vmem %s2897_s23, 1024  ;;  %p2615_p9 = scmp.lt.s32.totalorder %s2897_s23, %s2897_s23 }
  0x23   : > { %p2608_p7 = scmp.ne.s32.totalorder %s2897_s23, %s2607_s29  ;;  %p2616_p6 = scmp.lt.s32.totalorder %s2607_s29, %s2607_s29 }
  0x25   : > { %p2610_p8 = pnand %p2608_p7, %p2917_p0  ;;  %p2617_p13 = por %p2616_p6, %p2615_p9 }
  0x27   : > { %p2611_p11 = pneg %p2610_p8 }
  0x29   : > { %p2618_p1 = pnand %p2617_p13, %p2611_p11 }
  0x2b   : > { %2621 = shalt.err (!%p2618_p1)
}
  0x2c   : > { %s2785_s14 = smov 64   ;;  %s2786_s16 = smov 4  }
  0x2d   : > { %2355 = dma.hbm_to_vmem [thread:$0]  (!%p2901_p12), %s3658_s3, 1024, %s2897_s23, [#allocation6], %s2785_s14, %s2785_s14, %s2786_s16  }
  0x2e   : > { %s2622_s29 = scalar_lea.hbm %s3656_s1, 1024 }
  0x2f   : > { %p2623_p6 = scmp.ne.s32.totalorder %s3656_s1, %s2622_s29  ;;  %p2629_p3 = scmp.lt.u32.totalorder %s2622_s29, %s3656_s1 }
  0x31   : > { %p2625_p9 = pnand %p2623_p6, %p2917_p0 }
  0x33   : > { %p2626_p2 = pneg %p2625_p9 }
  0x35   : > { %p2631_p4 = pnand %p2629_p3, %p2626_p2 }
  0x37   : > { %2634 = shalt.err (!%p2631_p4)
}
  0x38   : > { %s2635_s23 = scalar_lea.vmem %s2905_s26, 1024  ;;  %p2643_p13 = scmp.lt.s32.totalorder %s2905_s26, %s2905_s26 }
  0x39   : > { %p2636_p7 = scmp.ne.s32.totalorder %s2905_s26, %s2635_s23  ;;  %p2644_p1 = scmp.lt.s32.totalorder %s2635_s23, %s2635_s23 }
  0x3b   : > { %p2638_p8 = pnand %p2636_p7, %p2917_p0  ;;  %p2645_p6 = por %p2644_p1, %p2643_p13 }
  0x3d   : > { %p2639_p11 = pneg %p2638_p8 }
  0x3f   : > { %p2646_p9 = pnand %p2645_p6, %p2639_p11 }
  0x41   : > { %2649 = shalt.err (!%p2646_p9)
}
  0x42   : > { %2352 = dma.hbm_to_vmem [thread:$0]  (!%p2901_p12), %s3656_s1, 1024, %s2905_s26, [#allocation3], %s2785_s14, %s2785_s14, %s2786_s16  }
  0x43   : > { %s2650_s17 = scalar_lea.hbm %s3660_s5, 1024 }
  0x44   : > { %p2651_p2 = scmp.ne.s32.totalorder %s3660_s5, %s2650_s17  ;;  %p2657_p7 = scmp.lt.u32.totalorder %s2650_s17, %s3660_s5 }
  0x46   : > { %p2653_p3 = pnand %p2651_p2, %p2917_p0 }
  0x48   : > { %p2654_p4 = pneg %p2653_p3 }
  0x4a   : > { %p2659_p8 = pnand %p2657_p7, %p2654_p4 }
  0x4c   : > { %2662 = shalt.err (!%p2659_p8)
}
  0x4d   : > { %s2663_s23 = scalar_lea.vmem %s295_s28, 1024  ;;  %p2671_p6 = scmp.lt.s32.totalorder %s295_s28, %s295_s28 }
  0x4e   : > { %p2664_p11 = scmp.ne.s32.totalorder %s295_s28, %s2663_s23  ;;  %p2672_p9 = scmp.lt.s32.totalorder %s2663_s23, %s2663_s23 }
  0x50   : > { %p2666_p13 = pnand %p2664_p11, %p2917_p0  ;;  %p2673_p5 = por %p2672_p9, %p2671_p6 }
  0x52   : > { %p2667_p1 = pneg %p2666_p13 }
  0x54   : > { %p2674_p10 = pnand %p2673_p5, %p2667_p1 }
  0x56   : > { %2677 = shalt.err (!%p2674_p10)
}
  0x57   : > { %2358 = dma.hbm_to_vmem [thread:$0]  (!%p2901_p12), %s3660_s5, 1024, %s295_s28, [#allocation6], %s2785_s14, %s2785_s14, %s2786_s16  }
  0x58   : > { %s2787_s11 = smov [#allocation8]   ;;  %s2678_s22 = scalar_lea.hbm %s3662_s7, 1024 }
  0x59   : > { %s310_s15 = sshll.u32 %s2787_s11, 4  ;;  %p2679_p5 = scmp.ne.s32.totalorder %s3662_s7, %s2678_s22  ;;  %s311_s15 = int_to_ptr.vmem [resolvable:$true] %s310_s15 }
  0x5a   : > { %p2685_p3 = scmp.lt.u32.totalorder %s2678_s22, %s3662_s7 }
  0x5b   : > { %p2681_p10 = pnand %p2679_p5, %p2917_p0 }
  0x5d   : > { %p2682_p2 = pneg %p2681_p10 }
  0x5f   : > { %p2687_p4 = pnand %p2685_p3, %p2682_p2 }
  0x61   : > { %2690 = shalt.err (!%p2687_p4)
}
  0x62   : > { %s2691_s28 = scalar_lea.vmem %s311_s15, 1024  ;;  %p2699_p13 = scmp.lt.s32.totalorder %s311_s15, %s311_s15 }
  0x63   : > { %p2692_p7 = scmp.ne.s32.totalorder %s311_s15, %s2691_s28  ;;  %p2700_p1 = scmp.lt.s32.totalorder %s2691_s28, %s2691_s28 }
  0x65   : > { %p2694_p8 = pnand %p2692_p7, %p2917_p0  ;;  %p2701_p6 = por %p2700_p1, %p2699_p13 }
  0x67   : > { %p2695_p11 = pneg %p2694_p8 }
  0x69   : > { %p2702_p9 = pnand %p2701_p6, %p2695_p11 }
  0x6b   : > { %2705 = shalt.err (!%p2702_p9)
}
  0x6c   : > { %2361 = dma.hbm_to_vmem [thread:$0]  (!%p2901_p12), %s3662_s7, 1024, %s311_s15, [#allocation9], %s2785_s14, %s2785_s14, %s2786_s16  }
  0x6d   : > { %p3683_p5 = scmp.ne.s32.totalorder %s3680_s21, 0 }
  0x6e   : > { %p3684_p0 = scmp.eq.s32.totalorder (!%p3683_p5), %s2863_s13, 0 }
  0x6f   : > { %337 = sbr.rel (%p3683_p5) target bundleno = 1544 (0x608), region = 56 }
  0x76   : > { %2751 = dma.done.wait (%p3684_p0), [#allocation3], 1024   ;;  %p3685_p10 = pmov %p3684_p0 }
  0x77   : > { %p3686_p2 = pmov %p3684_p0 }
  0x78   : > { %2753 = vsyncadd (%p3685_p10), [#allocation3], 4294966272 }
  0x79   : > { %2755 = dma.done.wait (%p3686_p2), [#allocation6], 2048   ;;  %p3687_p3 = pmov %p3684_p0 }
  0x7a   : > { %p3688_p4 = pmov %p3684_p0 }
  0x7b   : > { %2757 = vsyncadd (%p3687_p3), [#allocation6], 4294965248 }
  0x7c   : > { %2759 = dma.done.wait (%p3688_p4), [#allocation9], 1024   ;;  %p3689_p12 = pmov %p3684_p0 }
  0x7d   : > { %p385_p7 = scmp.lt.s32.totalorder %s2863_s13, 1  ;;  %v2418_v32 = vld [vmem:[#allocation2] sm:$0xff]   ;;  %v672_v33 = vld [vmem:[%s3657_s2 + $0x8] sm:$0xff]  ;;  %v2788_v34 = vmov 0   ;;  %v673_v35 = vld [vmem:[%s3657_s2 + $0x10] sm:$0xff]  ;;  %s382_s15 = sand.u32 1, %s2772_s10  }
  0x7e   : > { %2761 = vsyncadd (%p3689_p12), [#allocation9], 4294966272  ;;  %2219 = vmatprep.mubr.bf16.mxu0 %v2418_v32  ;;  %2417 = vset.pattern.permute.xlu1 %v2788_v34  ;;  %v674_v36 = vld [vmem:[%s3657_s2 + $0x18] sm:$0xff]  ;;  %v675_v37 = vld [vmem:[%s3657_s2 + $0x20] sm:$0xff]  ;;  %s2095_s22 = sshll.u32 %s382_s15, 7  ;;  %s2138_s27 = sshll.u32 %s2863_s13, 11 }
  0x7f   : > { %s386_s18 = scalar_select %p385_p7, %s2863_s13, 1  ;;  %2416 = vset.pattern.permute.xlu0 %v2788_v34  ;;  %v676_v38 = vld [vmem:[%s3657_s2 + $0x28] sm:$0xff]  ;;  %v677_v39 = vld [vmem:[%s3657_s2 + $0x30] sm:$0xff]  ;;  %v678_v40 = vld [vmem:[%s3657_s2 + $0x38] sm:$0xff] }
  0x80   : > { %v671_v41 = vld [vmem:[%s3657_s2] sm:$0xff]  ;;  %v680_v43 = vld [vmem:[%s3657_s2 + $0x48] sm:$0xff]  ;;  %v681_v44 = vld [vmem:[%s3657_s2 + $0x50] sm:$0xff]  ;;  %s3571_s25 = scalar_lea.vmem [#allocation10], %s2095_s22  ;;  %s3604_s26 = scalar_lea.hbm %s3664_s9, %s2138_s27 }
  0x81   : > { %s2137_s21 = sshll.u32 %s386_s18, 7  ;;  %v679_v42 = vld [vmem:[%s3657_s2 + $0x40] sm:$0xff]  ;;  %v682_v45 = vld [vmem:[%s3657_s2 + $0x58] sm:$0xff]  ;;  %v684_v47 = vld [vmem:[%s3657_s2 + $0x68] sm:$0xff]  ;;  %s1980_s29 = sshll.u32 %s3571_s25, 4  ;;  %s3606_s29 = int_to_ptr.vmem [resolvable:$true] %s1980_s29 }
  0x82   : > { %s3029_s16 = scalar_lea.vmem %s3655_s0, %s2137_s21  ;;  %v683_v46 = vld [vmem:[%s3657_s2 + $0x60] sm:$0xff]  ;;  %v685_v50 = vld [vmem:[%s3657_s2 + $0x70] sm:$0xff]  ;;  %v686_v52 = vld [vmem:[%s3657_s2 + $0x78] sm:$0xff]  ;;  %s3614_s13 = scalar_lea.sflag [#allocation4], %s382_s15 }
  0x83   : > { %v3032_v0 = vld [vmem:[%s3029_s16 + $0x18] sm:$0xff]  ;;  %v3035_v1 = vld [vmem:[%s3029_s16] sm:$0xff]  ;;  %v3042_v3 = vld [vmem:[%s3029_s16 + $0x8] sm:$0xff]  ;;  %s2706_s30 = scalar_lea.vmem %s3606_s29, 2048  ;;  %p3690_p11 = scmp.ne.s32.totalorder %s3677_s19, 0 }
  0x84   : > { %413 = vadd.xlane.f32.xlu1 %v3032_v0  ;;  %407 = vadd.xlane.f32.xlu0 %v3035_v1  ;;  %v439_v2 = vmul.f32 %v3035_v1, %v3035_v1  ;;  %v3046_v4 = vld [vmem:[%s3029_s16 + $0x10] sm:$0xff]  ;;  %v440_v5 = vmul.f32 %v3042_v3, %v3042_v3  ;;  %v442_v7 = vmul.f32 %v3032_v0, %v3032_v0  ;;  %v3056_v8 = vld [vmem:[%s3029_s16 + $0x20] sm:$0xff]  ;;  %v3059_v9 = vld [vmem:[%s3029_s16 + $0x28] sm:$0xff]  ;;  %p2707_p8 = scmp.ne.s32.totalorder %s3606_s29, %s2706_s30  ;;  %s2789_s18 = smov [#allocation10]  }
  0x85   : > { %v441_v6 = vmul.f32 %v3046_v4, %v3046_v4  ;;  %v443_v10 = vmul.f32 %v3056_v8, %v3056_v8  ;;  %v444_v11 = vmul.f32 %v3059_v9, %v3059_v9  ;;  %v3068_v12 = vld [vmem:[%s3029_s16 + $0x30] sm:$0xff]  ;;  %v3071_v13 = vld [vmem:[%s3029_s16 + $0x38] sm:$0xff]  ;;  %v3080_v16 = vld [vmem:[%s3029_s16 + $0x40] sm:$0xff]  ;;  %s2710_s21 = sshll.u32 %s2789_s18, 4  ;;  %s2711_s21 = int_to_ptr.vmem [resolvable:$false] %s2710_s21 }
  0x86   : > { %v445_v14 = vmul.f32 %v3068_v12, %v3068_v12  ;;  %v446_v15 = vmul.f32 %v3071_v13, %v3071_v13  ;;  %v3083_v17 = vld [vmem:[%s3029_s16 + $0x48] sm:$0xff]  ;;  %v447_v18 = vmul.f32 %v3080_v16, %v3080_v16  ;;  %v3092_v20 = vld [vmem:[%s3029_s16 + $0x50] sm:$0xff]  ;;  %v3095_v21 = vld [vmem:[%s3029_s16 + $0x58] sm:$0xff]  ;;  %p2708_p13 = pnand %p2707_p8, %p3690_p11  ;;  %s2712_s24 = scalar_lea.vmem %s2711_s21, 4096 }
  0x87   : > { %v448_v19 = vmul.f32 %v3083_v17, %v3083_v17  ;;  %v449_v22 = vmul.f32 %v3092_v20, %v3092_v20  ;;  %v450_v23 = vmul.f32 %v3095_v21, %v3095_v21  ;;  %v3104_v24 = vld [vmem:[%s3029_s16 + $0x60] sm:$0xff]  ;;  %v3107_v25 = vld [vmem:[%s3029_s16 + $0x68] sm:$0xff]  ;;  %v3116_v28 = vld [vmem:[%s3029_s16 + $0x70] sm:$0xff]  ;;  %p2713_p6 = scmp.lt.s32.totalorder %s3606_s29, %s2711_s21  ;;  %p2714_p9 = scmp.lt.s32.totalorder %s2712_s24, %s2706_s30 }
  0x88   : > { %409 = vadd.xlane.f32.xlu0 %v3042_v3  ;;  %455 = vadd.xlane.f32.xlu1 %v439_v2  ;;  %v451_v26 = vmul.f32 %v3104_v24, %v3104_v24  ;;  %v452_v27 = vmul.f32 %v3107_v25, %v3107_v25  ;;  %v3119_v29 = vld [vmem:[%s3029_s16 + $0x78] sm:$0xff]  ;;  %v453_v30 = vmul.f32 %v3116_v28, %v3116_v28  ;;  %v687_v55 = vld [vmem:[%s3659_s4] sm:$0xff]  ;;  %v688_v59 = vld [vmem:[%s3659_s4 + $0x8] sm:$0xff]  ;;  %p2709_p1 = pneg %p2708_p13 }
  0x89   : > { %v454_v31 = vmul.f32 %v3119_v29, %v3119_v29  ;;  %v689_v2 = vld [vmem:[%s3659_s4 + $0x10] sm:$0xff]  ;;  %v692_v32 = vld [vmem:[%s3659_s4 + $0x28] sm:$0xff]  ;;  %p2715_p5 = por %p2714_p9, %p2713_p6 }
  0x8b   : > { %p2716_p0 = pnand %p2715_p5, %p2709_p1 }
  0x8c   : > { %411 = vadd.xlane.f32.xlu0 %v3046_v4  ;;  %457 = vadd.xlane.f32.xlu1 %v440_v5 }
  0x90   : > { %459 = vadd.xlane.f32.xlu0 %v441_v6  ;;  %461 = vadd.xlane.f32.xlu1 %v442_v7 }
  0x94   : > { %415 = vadd.xlane.f32.xlu0 %v3056_v8  ;;  %417 = vadd.xlane.f32.xlu1 %v3059_v9 }
  0x98   : > { %463 = vadd.xlane.f32.xlu0 %v443_v10  ;;  %465 = vadd.xlane.f32.xlu1 %v444_v11  ;;  %v690_v11 = vld [vmem:[%s3659_s4 + $0x18] sm:$0xff] }
  0x9c   : > { %419 = vadd.xlane.f32.xlu0 %v3068_v12  ;;  %421 = vadd.xlane.f32.xlu1 %v3071_v13 }
  0xa0   : > { %467 = vadd.xlane.f32.xlu0 %v445_v14  ;;  %469 = vadd.xlane.f32.xlu1 %v446_v15 }
  0xa4   : > { %423 = vadd.xlane.f32.xlu0 %v3080_v16  ;;  %425 = vadd.xlane.f32.xlu1 %v3083_v17 }
  0xa8   : > { %471 = vadd.xlane.f32.xlu0 %v447_v18  ;;  %473 = vadd.xlane.f32.xlu1 %v448_v19 }
  0xac   : > { %427 = vadd.xlane.f32.xlu0 %v3092_v20  ;;  %429 = vadd.xlane.f32.xlu1 %v3095_v21 }
  0xb0   : > { %475 = vadd.xlane.f32.xlu0 %v449_v22  ;;  %477 = vadd.xlane.f32.xlu1 %v450_v23  ;;  %v691_v23 = vld [vmem:[%s3659_s4 + $0x20] sm:$0xff] }
  0xb4   : > { %431 = vadd.xlane.f32.xlu0 %v3104_v24  ;;  %433 = vadd.xlane.f32.xlu1 %v3107_v25 }
  0xb8   : > { %479 = vadd.xlane.f32.xlu0 %v451_v26  ;;  %481 = vadd.xlane.f32.xlu1 %v452_v27 }
  0xbc   : > { %435 = vadd.xlane.f32.xlu0 %v3116_v28  ;;  %437 = vadd.xlane.f32.xlu1 %v3119_v29 }
  0xc0   : > { %483 = vadd.xlane.f32.xlu0 %v453_v30  ;;  %485 = vadd.xlane.f32.xlu1 %v454_v31 }
  0xd1   : > { %710 = vperm.xlu1 %2417, %v672_v33  }
  0xd5   : > { %715 = vperm.xlu1 %2417, %v673_v35  }
  0xd6   : > { %705 = vperm.xlu0 %2416, %v671_v41  }
  0xd9   : > { %720 = vperm.xlu1 %2417, %v674_v36  }
  0xda   : > { %750 = vperm.xlu0 %2416, %v680_v43  }
  0xdd   : > { %725 = vperm.xlu1 %2417, %v675_v37  }
  0xde   : > { %760 = vperm.xlu0 %2416, %v682_v45  }
  0xe1   : > { %730 = vperm.xlu1 %2417, %v676_v38   ;;  %v693_v38 = vld [vmem:[%s3659_s4 + $0x30] sm:$0xff] }
  0xe2   : > { %770 = vperm.xlu0 %2416, %v684_v47  }
  0xe5   : > { %735 = vperm.xlu1 %2417, %v677_v39  }
  0xe6   : > { %780 = vperm.xlu0 %2416, %v686_v52  }
  0xe9   : > { %740 = vperm.xlu1 %2417, %v678_v40  }
  0xea   : > { %1023 = vperm.xlu0 %2416, %v688_v59  }
  0xed   : > { %745 = vperm.xlu1 %2417, %v679_v42   ;;  %v694_v42 = vld [vmem:[%s3659_s4 + $0x38] sm:$0xff] }
  0xee   : > { %1033 = vperm.xlu0 %2416, %v690_v11  }
  0xf1   : > { %755 = vperm.xlu1 %2417, %v681_v44  }
  0xf2   : > { %1043 = vperm.xlu0 %2416, %v692_v32  }
  0xf5   : > { %765 = vperm.xlu1 %2417, %v683_v46  }
  0xf6   : > { %1053 = vperm.xlu0 %2416, %v694_v42  }
  0xf9   : > { %775 = vperm.xlu1 %2417, %v685_v50  }
  0xfd   : > { %1018 = vperm.xlu1 %2417, %v687_v55  }
 0x101   : > { %1028 = vperm.xlu1 %2417, %v689_v2  }
 0x105   : > { %1038 = vperm.xlu1 %2417, %v691_v23  }
 0x109   : > { %1048 = vperm.xlu1 %2417, %v693_v38  }
 0x111   : > { %v414_v48 = vpop.xlane.xlu1 %413  ;;  %v408_v49 = vpop.xlane.xlu0 %407 }
 0x112   : > { %v3172_v51 = vmul.f32 0.0625, %v408_v49  ;;  %v3187_v61 = vmul.f32 0.0625, %v414_v48  ;;  %v695_v49 = vld [vmem:[%s3659_s4 + $0x40] sm:$0xff] }
 0x113   : > { %1058 = vperm.xlu1 %2417, %v695_v49  }
 0x114   : > { %v519_v56 = vmul.f32 %v3172_v51, %v3172_v51  ;;  %v522_v18 = vmul.f32 %v3187_v61, %v3187_v61  ;;  %v567_v11 = vsub.f32 %v3035_v1, %v3172_v51  ;;  %v570_v38 = vsub.f32 %v3032_v0, %v3187_v61  ;;  %v702_v0 = vld [vmem:[%s3659_s4 + $0x78] sm:$0xff] }
 0x115   : > { %v410_v53 = vpop.xlane.xlu0 %409  ;;  %v456_v54 = vpop.xlane.xlu1 %455 }
 0x116   : > { %v3182_v57 = vmul.f32 0.0625, %v410_v53  ;;  %v503_v58 = vmul.f32 0.0625, %v456_v54  ;;  %v696_v54 = vld [vmem:[%s3659_s4 + $0x48] sm:$0xff] }
 0x117   : > { %1063 = vperm.xlu0 %2416, %v696_v54  }
 0x118   : > { %v535_v60 = vsub.f32 %v503_v58, %v519_v56  ;;  %v520_v5 = vmul.f32 %v3182_v57, %v3182_v57 }
 0x119   : > { %v412_v62 = vpop.xlane.xlu0 %411  ;;  %v458_v63 = vpop.xlane.xlu1 %457 }
 0x11a   : > { %v551_v6 = vmax.f32 %v535_v60, 0.0  ;;  %v3194_v7 = vmul.f32 0.0625, %v412_v62  ;;  %v504_v10 = vmul.f32 0.0625, %v458_v63  ;;  %v697_v60 = vld [vmem:[%s3659_s4 + $0x50] sm:$0xff] }
 0x11b   : > { %1068 = vperm.xlu1 %2417, %v697_v60  }
 0x11c   : > { %v583_v14 = vadd.f32 1e-05, %v551_v6  ;;  %v536_v15 = vsub.f32 %v504_v10, %v520_v5  ;;  %v521_v26 = vmul.f32 %v3194_v7, %v3194_v7  ;;  %v698_v10 = vld [vmem:[%s3659_s4 + $0x58] sm:$0xff]  ;;  %v569_v32 = vsub.f32 %v3046_v4, %v3194_v7 }
 0x11d   : > { %v460_v19 = vpop.xlane.xlu0 %459  ;;  %v462_v22 = vpop.xlane.xlu1 %461  ;;  %1073 = vperm.xlu0 %2416, %v698_v10  }
 0x11e   : > { %v552_v27 = vmax.f32 %v536_v15, 0.0  ;;  %v505_v30 = vmul.f32 0.0625, %v460_v19  ;;  %v506_v31 = vmul.f32 0.0625, %v462_v22  ;;  %2450 = vrsqrt.f32 %v583_v14 }
 0x11f   : > { %v568_v14 = vsub.f32 %v3042_v3, %v3182_v57  ;;  %v700_v57 = vld [vmem:[%s3659_s4 + $0x68] sm:$0xff] }
 0x120   : > { %v584_v33 = vadd.f32 1e-05, %v552_v27  ;;  %v537_v34 = vsub.f32 %v505_v30, %v521_v26  ;;  %v538_v35 = vsub.f32 %v506_v31, %v522_v18  ;;  %v699_v31 = vld [vmem:[%s3659_s4 + $0x60] sm:$0xff] }
 0x121   : > { %v416_v36 = vpop.xlane.xlu0 %415  ;;  %v418_v37 = vpop.xlane.xlu1 %417  ;;  %1078 = vperm.xlu1 %2417, %v699_v31   ;;  %1083 = vperm.xlu0 %2416, %v700_v57  }
 0x122   : > { %2452 = vrsqrt.f32 %v584_v33  ;;  %v553_v39 = vmax.f32 %v537_v34, 0.0  ;;  %v554_v40 = vmax.f32 %v538_v35, 0.0  ;;  %v3212_v41 = vmul.f32 0.0625, %v416_v36 }
 0x123   : > { %v3217_v43 = vmul.f32 0.0625, %v418_v37 }
 0x124   : > { %v585_v44 = vadd.f32 1e-05, %v553_v39  ;;  %v586_v45 = vadd.f32 1e-05, %v554_v40  ;;  %v523_v46 = vmul.f32 %v3212_v41, %v3212_v41 }
 0x125   : > { %v464_v47 = vpop.xlane.xlu0 %463  ;;  %v466_v48 = vpop.xlane.xlu1 %465  ;;  %v524_v50 = vmul.f32 %v3217_v43, %v3217_v43  ;;  %1093 = vperm.xlu0 %2416, %v702_v0  }
 0x126   : > { %2454 = vrsqrt.f32 %v585_v44  ;;  %v507_v52 = vmul.f32 0.0625, %v464_v47  ;;  %v508_v53 = vmul.f32 0.0625, %v466_v48  ;;  %v701_v44 = vld [vmem:[%s3659_s4 + $0x70] sm:$0xff] }
 0x127   : > { %2456 = vrsqrt.f32 %v586_v45  ;;  %1088 = vperm.xlu1 %2417, %v701_v44  }
 0x128   : > { %v539_v55 = vsub.f32 %v507_v52, %v523_v46  ;;  %v540_v56 = vsub.f32 %v508_v53, %v524_v50  ;;  %v2451_v62 = vpop.eup %2450 }
 0x129   : > { %v420_v58 = vpop.xlane.xlu0 %419  ;;  %v422_v59 = vpop.xlane.xlu1 %421  ;;  %v615_v27 = vmul.f32 %v2451_v62, %v567_v11 }
 0x12a   : > { %v555_v63 = vmax.f32 %v539_v55, 0.0  ;;  %v556_v2 = vmax.f32 %v540_v56, 0.0  ;;  %v3232_v5 = vmul.f32 0.0625, %v420_v58  ;;  %v3234_v6 = vmul.f32 0.0625, %v422_v59 }
 0x12b   : > { %v571_v58 = vsub.f32 %v3056_v8, %v3212_v41 }
 0x12c   : > { %v2453_v15 = vpop.eup %2452  ;;  %v587_v18 = vadd.f32 1e-05, %v555_v63  ;;  %v588_v19 = vadd.f32 1e-05, %v556_v2  ;;  %v525_v22 = vmul.f32 %v3232_v5, %v3232_v5  ;;  %v526_v1 = vmul.f32 %v3234_v6, %v3234_v6 }
 0x12d   : > { %v468_v23 = vpop.xlane.xlu0 %467  ;;  %v470_v26 = vpop.xlane.xlu1 %469  ;;  %v616_v30 = vmul.f32 %v2453_v15, %v568_v14  ;;  %v572_v2 = vsub.f32 %v3059_v9, %v3217_v43 }
 0x12e   : > { %2458 = vrsqrt.f32 %v587_v18  ;;  %v509_v3 = vmul.f32 0.0625, %v468_v23  ;;  %v510_v51 = vmul.f32 0.0625, %v470_v26 }
 0x12f   : > { %2460 = vrsqrt.f32 %v588_v19  ;;  %v631_v33 = vpack.c.bf16 %v616_v30, %v615_v27 }
 0x130   : > { %v2455_v34 = vpop.eup %2454  ;;  %v541_v35 = vsub.f32 %v509_v3, %v525_v22  ;;  %v542_v36 = vsub.f32 %v510_v51, %v526_v1  ;;  %v573_v3 = vsub.f32 %v3068_v12, %v3232_v5 }
 0x131   : > { %v2457_v37 = vpop.eup %2456  ;;  %v424_v39 = vpop.xlane.xlu0 %423  ;;  %2203 = vmatprep.subr.bf16.mxu0 %v631_v33  ;;  %v617_v42 = vmul.f32 %v2455_v34, %v569_v32  ;;  %v574_v34 = vsub.f32 %v3071_v13, %v3234_v6 }
 0x132   : > { %v426_v40 = vpop.xlane.xlu1 %425  ;;  %v557_v4 = vmax.f32 %v541_v35, 0.0  ;;  %v558_v7 = vmax.f32 %v542_v36, 0.0  ;;  %v3260_v45 = vmul.f32 0.0625, %v424_v39  ;;  %2204 = vmatpush3.bf16.msra.mxu0 %v631_v33  ;;  %v618_v61 = vmul.f32 %v2457_v37, %v570_v38 }
 0x133   : > { %v3262_v46 = vmul.f32 0.0625, %v426_v40 }
 0x134   : > { %v589_v47 = vadd.f32 1e-05, %v557_v4  ;;  %v590_v48 = vadd.f32 1e-05, %v558_v7  ;;  %v527_v49 = vmul.f32 %v3260_v45, %v3260_v45  ;;  %v632_v52 = vpack.c.bf16 %v618_v61, %v617_v42 }
 0x135   : > { %v472_v50 = vpop.xlane.xlu0 %471  ;;  %v528_v54 = vmul.f32 %v3262_v46, %v3262_v46 }
 0x136   : > { %v474_v53 = vpop.xlane.xlu1 %473  ;;  %2462 = vrsqrt.f32 %v589_v47  ;;  %v511_v55 = vmul.f32 0.0625, %v472_v50  ;;  %2205 = vmatprep.subr.bf16.mxu0 %v632_v52 }
 0x137   : > { %v512_v56 = vmul.f32 0.0625, %v474_v53  ;;  %2464 = vrsqrt.f32 %v590_v48  ;;  %2206 = vmatpush3.bf16.msra.mxu0 %v632_v52  ;;  %v575_v48 = vsub.f32 %v3080_v16, %v3260_v45 }
 0x138   : > { %v2459_v59 = vpop.eup %2458  ;;  %v543_v60 = vsub.f32 %v511_v55, %v527_v49 }
 0x139   : > { %v544_v62 = vsub.f32 %v512_v56, %v528_v54  ;;  %v2461_v63 = vpop.eup %2460  ;;  %v428_v10 = vpop.xlane.xlu0 %427  ;;  %v619_v14 = vmul.f32 %v2459_v59, %v571_v58  ;;  %v576_v54 = vsub.f32 %v3083_v17, %v3262_v46 }
 0x13a   : > { %v430_v11 = vpop.xlane.xlu1 %429  ;;  %v559_v15 = vmax.f32 %v543_v60, 0.0  ;;  %v3275_v19 = vmul.f32 0.0625, %v428_v10  ;;  %v620_v8 = vmul.f32 %v2461_v63, %v572_v2 }
 0x13b   : > { %v560_v18 = vmax.f32 %v544_v62, 0.0  ;;  %v3277_v22 = vmul.f32 0.0625, %v430_v11 }
 0x13c   : > { %v591_v41 = vadd.f32 1e-05, %v559_v15  ;;  %v529_v26 = vmul.f32 %v3275_v19, %v3275_v19  ;;  %v633_v30 = vpack.c.bf16 %v620_v8, %v619_v14  ;;  %v577_v17 = vsub.f32 %v3092_v20, %v3275_v19 }
 0x13d   : > { %v592_v23 = vadd.f32 1e-05, %v560_v18  ;;  %v476_v27 = vpop.xlane.xlu0 %475  ;;  %v530_v9 = vmul.f32 %v3277_v22, %v3277_v22 }
 0x13e   : > { %v478_v31 = vpop.xlane.xlu1 %477  ;;  %2466 = vrsqrt.f32 %v591_v41  ;;  %v513_v43 = vmul.f32 0.0625, %v476_v27  ;;  %2207 = vmatprep.subr.bf16.mxu0 %v633_v30 }
 0x13f   : > { %v514_v1 = vmul.f32 0.0625, %v478_v31  ;;  %2468 = vrsqrt.f32 %v592_v23  ;;  %2208 = vmatpush3.bf16.msra.mxu0 %v633_v30  ;;  %v578_v23 = vsub.f32 %v3095_v21, %v3277_v22 }
 0x140   : > { %v2463_v51 = vpop.eup %2462  ;;  %v545_v57 = vsub.f32 %v513_v43, %v529_v26 }
 0x141   : > { %v546_v32 = vsub.f32 %v514_v1, %v530_v9  ;;  %v2465_v33 = vpop.eup %2464  ;;  %v432_v35 = vpop.xlane.xlu0 %431  ;;  %v621_v37 = vmul.f32 %v2463_v51, %v573_v3 }
 0x142   : > { %v434_v36 = vpop.xlane.xlu1 %433  ;;  %v561_v38 = vmax.f32 %v545_v57, 0.0  ;;  %v3287_v40 = vmul.f32 0.0625, %v432_v35  ;;  %v622_v12 = vmul.f32 %v2465_v33, %v574_v34 }
 0x143   : > { %v562_v39 = vmax.f32 %v546_v32, 0.0  ;;  %v3289_v42 = vmul.f32 0.0625, %v434_v36 }
 0x144   : > { %v593_v5 = vadd.f32 1e-05, %v561_v38  ;;  %v531_v4 = vmul.f32 %v3287_v40, %v3287_v40  ;;  %v634_v0 = vpack.c.bf16 %v622_v12, %v621_v37  ;;  %v579_v20 = vsub.f32 %v3104_v24, %v3287_v40  ;;  %v2419_v12 = vld [vmem:[#allocation2 + $0x8] sm:$0xff]  }
 0x145   : > { %v594_v44 = vadd.f32 1e-05, %v562_v39  ;;  %v480_v7 = vpop.xlane.xlu0 %479  ;;  %v532_v13 = vmul.f32 %v3289_v42, %v3289_v42  ;;  %v580_v21 = vsub.f32 %v3107_v25, %v3289_v42  ;;  %v2421_v25 = vld [vmem:[#allocation2 + $0x18] sm:$0xff]   ;;  %v2422_v42 = vld [vmem:[#allocation2 + $0x20] sm:$0xff]  }
 0x146   : > { %v482_v61 = vpop.xlane.xlu1 %481  ;;  %2470 = vrsqrt.f32 %v593_v5  ;;  %v515_v6 = vmul.f32 0.0625, %v480_v7  ;;  %2209 = vmatprep.subr.bf16.mxu0 %v634_v0  ;;  %v2420_v5 = vld [vmem:[#allocation2 + $0x10] sm:$0xff]  }
 0x147   : > { %v516_v47 = vmul.f32 0.0625, %v482_v61  ;;  %2472 = vrsqrt.f32 %v594_v44  ;;  %2210 = vmatpush3.bf16.msra.mxu0 %v634_v0  ;;  %v2423_v44 = vld [vmem:[#allocation2 + $0x28] sm:$0xff]  }
 0x148   : > { %v2467_v49 = vpop.eup %2466  ;;  %v547_v50 = vsub.f32 %v515_v6, %v531_v4  ;;  %v2425_v4 = vld [vmem:[#allocation2 + $0x38] sm:$0xff]  }
 0x149   : > { %v548_v52 = vsub.f32 %v516_v47, %v532_v13  ;;  %v2469_v53 = vpop.eup %2468  ;;  %v436_v55 = vpop.xlane.xlu0 %435  ;;  %v623_v58 = vmul.f32 %v2467_v49, %v575_v48 }
 0x14a   : > { %v438_v56 = vpop.xlane.xlu1 %437  ;;  %v563_v59 = vmax.f32 %v547_v50, 0.0  ;;  %v501_v62 = vmul.f32 0.0625, %v436_v55  ;;  %v624_v2 = vmul.f32 %v2469_v53, %v576_v54 }
 0x14b   : > { %v564_v60 = vmax.f32 %v548_v52, 0.0  ;;  %v502_v63 = vmul.f32 0.0625, %v438_v56 }
 0x14c   : > { %v595_v10 = vadd.f32 1e-05, %v563_v59  ;;  %v533_v45 = vmul.f32 %v501_v62, %v501_v62  ;;  %v635_v14 = vpack.c.bf16 %v624_v2, %v623_v58  ;;  %v581_v35 = vsub.f32 %v3116_v28, %v501_v62  ;;  %v2424_v28 = vld [vmem:[#allocation2 + $0x30] sm:$0xff]  }
 0x14d   : > { %v596_v16 = vadd.f32 1e-05, %v564_v60  ;;  %v484_v11 = vpop.xlane.xlu0 %483  ;;  %v534_v18 = vmul.f32 %v502_v63, %v502_v63  ;;  %v582_v37 = vsub.f32 %v3119_v29, %v502_v63  ;;  %v2426_v29 = vld [vmem:[#allocation5] sm:$0xff]  }
 0x14e   : > { %v486_v15 = vpop.xlane.xlu1 %485  ;;  %2474 = vrsqrt.f32 %v595_v10  ;;  %v517_v8 = vmul.f32 0.0625, %v484_v11  ;;  %2211 = vmatprep.subr.bf16.mxu0 %v635_v14  ;;  %2251 = vmatprep.mubr.bf16.mxu1 %v2426_v29 }
 0x14f   : > { %v518_v41 = vmul.f32 0.0625, %v486_v15  ;;  %2476 = vrsqrt.f32 %v596_v16  ;;  %2212 = vmatpush3.bf16.msra.mxu0 %v635_v14 }
 0x150   : > { %v2471_v46 = vpop.eup %2470  ;;  %v549_v26 = vsub.f32 %v517_v8, %v533_v45 }
 0x151   : > { %v550_v27 = vsub.f32 %v518_v41, %v534_v18  ;;  %v2473_v30 = vpop.eup %2472  ;;  %v625_v31 = vmul.f32 %v2471_v46, %v577_v17 }
 0x152   : > { %v565_v9 = vmax.f32 %v549_v26, 0.0  ;;  %v626_v1 = vmul.f32 %v2473_v30, %v578_v23  ;;  %v711_v7 = vpop.permute.xlu1 %710 }
 0x153   : > { %v566_v43 = vmax.f32 %v550_v27, 0.0 }
 0x154   : > { %v597_v3 = vadd.f32 1e-05, %v565_v9  ;;  %v636_v57 = vpack.c.bf16 %v626_v1, %v625_v31 }
 0x155   : > { %v598_v51 = vadd.f32 1e-05, %v566_v43  ;;  %v706_v50 = vpop.permute.xlu0 %705 }
 0x156   : > { %2478 = vrsqrt.f32 %v597_v3  ;;  %2213 = vmatprep.subr.bf16.mxu0 %v636_v57  ;;  %v716_v0 = vpop.permute.xlu1 %715 }
 0x157   : > { %2480 = vrsqrt.f32 %v598_v51  ;;  %2214 = vmatpush3.bf16.msra.mxu0 %v636_v57 }
 0x158   : > { %v2475_v19 = vpop.eup %2474 }
 0x159   : > { %v2477_v22 = vpop.eup %2476  ;;  %v627_v32 = vmul.f32 %v2475_v19, %v579_v20  ;;  %v751_v45 = vpop.permute.xlu0 %750 }
 0x15a   : > { %v628_v33 = vmul.f32 %v2477_v22, %v580_v21  ;;  %v721_v61 = vpop.permute.xlu1 %720 }
 0x15c   : > { %v637_v34 = vpack.c.bf16 %v628_v33, %v627_v32 }
 0x15d   : > { %v761_v9 = vpop.permute.xlu0 %760 }
 0x15e   : > { %2215 = vmatprep.subr.bf16.mxu0 %v637_v34  ;;  %v726_v13 = vpop.permute.xlu1 %725 }
 0x15f   : > { %2216 = vmatpush3.bf16.msra.mxu0 %v637_v34 }
 0x160   : > { %v2479_v36 = vpop.eup %2478 }
 0x161   : > { %v2481_v38 = vpop.eup %2480  ;;  %v629_v39 = vmul.f32 %v2479_v36, %v581_v35 }
 0x162   : > { %v630_v24 = vmul.f32 %v2481_v38, %v582_v37  ;;  %v731_v6 = vpop.permute.xlu1 %730 }
 0x164   : > { %v638_v40 = vpack.c.bf16 %v630_v24, %v629_v39 }
 0x166   : > { %2217 = vmatprep.subr.bf16.mxu0 %v638_v40  ;;  %v736_v47 = vpop.permute.xlu1 %735 }
 0x167   : > { %2218 = vmatpush3.bf16.msra.mxu0 %v638_v40 }
 0x16a   : > { %2220 = vmatmul.mubr.bf16.vlgmr.msra.gmra.mrb[0].mxu0 %v2419_v12  ;;  %v741_v48 = vpop.permute.xlu1 %740 }
 0x16b   : > { %2223 = vmatprep.mubr.bf16.mxu0 %v2420_v5 }
 0x16e   : > { %v746_v2 = vpop.permute.xlu1 %745 }
 0x172   : > { %2224 = vmatmul.mubr.bf16.gmra.mrb[4].mxu0 %v2421_v25  ;;  %v756_v46 = vpop.permute.xlu1 %755 }
 0x173   : > { %2227 = vmatprep.mubr.bf16.mxu0 %v2422_v42 }
 0x176   : > { %v766_v22 = vpop.permute.xlu1 %765 }
 0x17a   : > { %2228 = vmatmul.mubr.bf16.gmra.mrb[8].mxu0 %v2423_v44  ;;  %v771_v44 = vpop.permute.xlu0 %770 }
 0x17b   : > { %2231 = vmatprep.mubr.bf16.mxu0 %v2424_v28 }
 0x182   : > { %2232 = vmatmul.mubr.bf16.gmra.mrb[12].mxu0 %v2425_v4 }
 0x23d   : > { %v2221_v49 = vpop.f32.mrb[0].mxu0 }
 0x23e   : > { %v874_v52 = vadd.f32 %v2221_v49, %v716_v0  ;;  %v865_v53 = vpop.f32.mrb[1].mxu0 }
 0x23f   : > { %v866_v54 = vadd.f32 %v865_v53, %v706_v50  ;;  %v2222_v55 = vpop.f32.mrb[2].mxu0 }
 0x240   : > { %v946_v56 = vmul.f32 0.70710677, %v874_v52  ;;  %v877_v58 = vadd.f32 %v2222_v55, %v721_v61  ;;  %v868_v59 = vpop.f32.mrb[3].mxu0  ;;  %v930_v51 = vmul.f32 0.5, %v874_v52 }
 0x241   : > { %v944_v60 = vmul.f32 0.70710677, %v866_v54  ;;  %v869_v62 = vadd.f32 %v868_v59, %v711_v7  ;;  %v928_v37 = vmul.f32 0.5, %v866_v54 }
 0x242   : > { %2482 = verf.f32 %v946_v56  ;;  %v947_v63 = vmul.f32 0.70710677, %v877_v58  ;;  %v931_v32 = vmul.f32 0.5, %v877_v58 }
 0x243   : > { %2484 = verf.f32 %v944_v60  ;;  %v945_v10 = vmul.f32 0.70710677, %v869_v62  ;;  %v929_v5 = vmul.f32 0.5, %v869_v62 }
 0x244   : > { %2486 = verf.f32 %v947_v63 }
 0x245   : > { %2488 = verf.f32 %v945_v10  ;;  %v2225_v16 = vpop.f32.mrb[4].mxu0 }
 0x246   : > { %v890_v11 = vadd.f32 %v2225_v16, %v736_v47  ;;  %v881_v14 = vpop.f32.mrb[5].mxu0  ;;  %v776_v47 = vpop.permute.xlu1 %775 }
 0x247   : > { %v3309_v15 = vadd.f32 %v881_v14, %v726_v13  ;;  %v2226_v18 = vpop.f32.mrb[6].mxu0 }
 0x248   : > { %v950_v8 = vmul.f32 0.70710677, %v890_v11  ;;  %v893_v41 = vadd.f32 %v2226_v18, %v741_v48  ;;  %v884_v17 = vpop.f32.mrb[7].mxu0  ;;  %v934_v58 = vmul.f32 0.5, %v890_v11 }
 0x249   : > { %v948_v23 = vmul.f32 0.70710677, %v3309_v15  ;;  %v885_v26 = vadd.f32 %v884_v17, %v731_v6  ;;  %v932_v10 = vmul.f32 0.5, %v3309_v15 }
 0x24a   : > { %2490 = verf.f32 %v950_v8  ;;  %v951_v27 = vmul.f32 0.70710677, %v893_v41  ;;  %v935_v59 = vmul.f32 0.5, %v893_v41 }
 0x24b   : > { %2492 = verf.f32 %v948_v23  ;;  %v949_v30 = vmul.f32 0.70710677, %v885_v26  ;;  %v933_v16 = vmul.f32 0.5, %v885_v26 }
 0x24c   : > { %v2483_v31 = vpop.eup %2482  ;;  %2494 = verf.f32 %v951_v27 }
 0x24d   : > { %v2485_v43 = vpop.eup %2484  ;;  %2496 = verf.f32 %v949_v30  ;;  %v2229_v1 = vpop.f32.mrb[8].mxu0  ;;  %v978_v57 = vadd.f32 1.0, %v2483_v31 }
 0x24e   : > { %v2487_v3 = vpop.eup %2486  ;;  %v3312_v20 = vadd.f32 %v2229_v1, %v756_v46  ;;  %v897_v19 = vpop.f32.mrb[9].mxu0  ;;  %v976_v36 = vadd.f32 1.0, %v2485_v43 }
 0x24f   : > { %v2489_v21 = vpop.eup %2488  ;;  %v979_v33 = vadd.f32 1.0, %v2487_v3  ;;  %v3314_v34 = vadd.f32 %v897_v19, %v746_v2  ;;  %v2230_v35 = vpop.f32.mrb[10].mxu0  ;;  %v994_v28 = vmul.f32 %v978_v57, %v930_v51 }
 0x250   : > { %v954_v38 = vmul.f32 0.70710677, %v3312_v20  ;;  %v3317_v39 = vadd.f32 %v2230_v35, %v761_v9  ;;  %v900_v24 = vpop.f32.mrb[11].mxu0  ;;  %v977_v40 = vadd.f32 1.0, %v2489_v21  ;;  %v992_v7 = vmul.f32 %v976_v36, %v928_v37  ;;  %v781_v2 = vpop.permute.xlu0 %780 }
 0x251   : > { %v995_v12 = vmul.f32 %v979_v33, %v931_v32  ;;  %v952_v25 = vmul.f32 0.70710677, %v3314_v34  ;;  %v3320_v42 = vadd.f32 %v900_v24, %v751_v45  ;;  %v938_v19 = vmul.f32 0.5, %v3312_v20 }
 0x252   : > { %2498 = verf.f32 %v954_v38  ;;  %v955_v4 = vmul.f32 0.70710677, %v3317_v39  ;;  %v993_v0 = vmul.f32 %v977_v40, %v929_v5  ;;  %v939_v21 = vmul.f32 0.5, %v3317_v39 }
 0x253   : > { %2500 = verf.f32 %v952_v25  ;;  %v953_v29 = vmul.f32 0.70710677, %v3320_v42  ;;  %v1009_v13 = vpack.c.bf16 %v995_v12, %v994_v28  ;;  %v936_v32 = vmul.f32 0.5, %v3314_v34 }
 0x254   : > { %v2491_v61 = vpop.eup %2490  ;;  %2502 = verf.f32 %v955_v4  ;;  %v1008_v50 = vpack.c.bf16 %v993_v0, %v992_v7  ;;  %v937_v33 = vmul.f32 0.5, %v3320_v42 }
 0x255   : > { %v2493_v6 = vpop.eup %2492  ;;  %v982_v48 = vadd.f32 1.0, %v2491_v61  ;;  %2504 = verf.f32 %v953_v29  ;;  %v2233_v49 = vpop.f32.mrb[12].mxu0 }
 0x256   : > { %v2495_v52 = vpop.eup %2494  ;;  %v980_v53 = vadd.f32 1.0, %v2493_v6  ;;  %v922_v54 = vadd.f32 %v2233_v49, %v776_v47  ;;  %v913_v55 = vpop.f32.mrb[13].mxu0  ;;  %2235 = vmatprep.subr.bf16.mxu1 %v1008_v50 }
 0x257   : > { %v2497_v56 = vpop.eup %2496  ;;  %v983_v60 = vadd.f32 1.0, %v2495_v52  ;;  %v914_v62 = vadd.f32 %v913_v55, %v766_v22  ;;  %v2234_v63 = vpop.f32.mrb[14].mxu0  ;;  %2236 = vmatpush3.bf16.msra.mxu1 %v1008_v50  ;;  %v998_v8 = vmul.f32 %v982_v48, %v934_v58  ;;  %v2427_v50 = vld [vmem:[#allocation5 + $0x8] sm:$0xff]   ;;  %v2428_v52 = vld [vmem:[#allocation5 + $0x10] sm:$0xff]   ;;  %v2433_v58 = vld [vmem:[#allocation5 + $0x38] sm:$0xff]  }
 0x258   : > { %v981_v45 = vadd.f32 1.0, %v2497_v56  ;;  %v958_v14 = vmul.f32 0.70710677, %v922_v54  ;;  %v916_v18 = vpop.f32.mrb[15].mxu0  ;;  %v925_v23 = vadd.f32 %v2234_v63, %v781_v2  ;;  %2237 = vmatprep.subr.bf16.mxu1 %v1009_v13  ;;  %v996_v27 = vmul.f32 %v980_v53, %v932_v10  ;;  %v2429_v53 = vld [vmem:[#allocation5 + $0x18] sm:$0xff]   ;;  %v2431_v55 = vld [vmem:[#allocation5 + $0x28] sm:$0xff]  }
 0x259   : > { %v999_v17 = vmul.f32 %v983_v60, %v935_v59  ;;  %v956_v46 = vmul.f32 0.70710677, %v914_v62  ;;  %v917_v41 = vadd.f32 %v916_v18, %v771_v44  ;;  %v942_v34 = vmul.f32 0.5, %v922_v54  ;;  %v2430_v54 = vld [vmem:[#allocation5 + $0x20] sm:$0xff]   ;;  %v2432_v56 = vld [vmem:[#allocation5 + $0x30] sm:$0xff]   ;;  %v1019_v59 = vpop.permute.xlu1 %1018 }
 0x25a   : > { %v997_v11 = vmul.f32 %v981_v45, %v933_v16  ;;  %2506 = verf.f32 %v958_v14  ;;  %v959_v30 = vmul.f32 0.70710677, %v925_v23  ;;  %v943_v4 = vmul.f32 0.5, %v925_v23 }
 0x25b   : > { %2508 = verf.f32 %v956_v46  ;;  %v1011_v31 = vpack.c.bf16 %v999_v17, %v998_v8  ;;  %v957_v43 = vmul.f32 0.70710677, %v917_v41  ;;  %2238 = vmatpush3.bf16.msra.mxu1 %v1009_v13  ;;  %v940_v29 = vmul.f32 0.5, %v914_v62  ;;  %v1024_v62 = vpop.permute.xlu0 %1023  ;;  %v2578_v17 = vld [vmem:[%s3029_s16 + $0x10] sm:$0xff] }
 0x25c   : > { %v2499_v9 = vpop.eup %2498  ;;  %v1010_v15 = vpack.c.bf16 %v997_v11, %v996_v27  ;;  %2510 = verf.f32 %v959_v30  ;;  %v941_v7 = vmul.f32 0.5, %v917_v41  ;;  %v1257_v60 = vlaneseq  ;;  %v2579_v11 = vld [vmem:[%s3029_s16] sm:$0xff] }
 0x25d   : > { %v2501_v26 = vpop.eup %2500  ;;  %v986_v1 = vadd.f32 1.0, %v2499_v9  ;;  %2512 = verf.f32 %v957_v43  ;;  %v1029_v2 = vpop.permute.xlu1 %1028  ;;  %v2580_v43 = vld [vmem:[%s3029_s16 + $0x18] sm:$0xff] }
 0x25e   : > { %v2503_v3 = vpop.eup %2502  ;;  %v984_v51 = vadd.f32 1.0, %v2501_v26  ;;  %2239 = vmatprep.subr.bf16.mxu1 %v1010_v15  ;;  %v3329_v63 = vand.u32 127, %v1257_v60 }
 0x25f   : > { %v2505_v57 = vpop.eup %2504  ;;  %v987_v22 = vadd.f32 1.0, %v2503_v3  ;;  %2240 = vmatpush3.bf16.msra.mxu1 %v1010_v15  ;;  %v1002_v36 = vmul.f32 %v986_v1, %v938_v19  ;;  %v1034_v16 = vpop.permute.xlu0 %1033 }
 0x260   : > { %v985_v35 = vadd.f32 1.0, %v2505_v57  ;;  %2241 = vmatprep.subr.bf16.mxu1 %v1011_v31  ;;  %v1000_v38 = vmul.f32 %v984_v51, %v936_v32  ;;  %vm1259_vm0 = vcmp.lt.s32.totalorder %v3329_v63, 16  ;;  %v2581_v57 = vld [vmem:[%s3029_s16 + $0x8] sm:$0xff]  ;;  %v2442_v63 = vld [vmem:[#allocation8] sm:$0xff]  }
 0x261   : > { %v1003_v37 = vmul.f32 %v987_v22, %v939_v21  ;;  %v1039_v9 = vpop.permute.xlu1 %1038 }
 0x262   : > { %v1001_v24 = vmul.f32 %v985_v35, %v937_v33 }
 0x263   : > { %v1013_v40 = vpack.c.bf16 %v1003_v37, %v1002_v36  ;;  %2242 = vmatpush3.bf16.msra.mxu1 %v1011_v31  ;;  %v1044_v1 = vpop.permute.xlu0 %1043 }
 0x264   : > { %v2507_v12 = vpop.eup %2506  ;;  %v1012_v5 = vpack.c.bf16 %v1001_v24, %v1000_v38 }
 0x265   : > { %v2509_v25 = vpop.eup %2508  ;;  %v990_v20 = vadd.f32 1.0, %v2507_v12  ;;  %v1049_v35 = vpop.permute.xlu1 %1048 }
 0x266   : > { %2243 = vmatprep.subr.bf16.mxu1 %v1012_v5  ;;  %v2511_v39 = vpop.eup %2510  ;;  %v988_v44 = vadd.f32 1.0, %v2509_v25  ;;  %v2582_v25 = vld [vmem:[%s3029_s16 + $0x30] sm:$0xff] }
 0x267   : > { %v2513_v28 = vpop.eup %2512  ;;  %v991_v42 = vadd.f32 1.0, %v2511_v39  ;;  %2244 = vmatpush3.bf16.msra.mxu1 %v1012_v5  ;;  %v1006_v61 = vmul.f32 %v990_v20, %v942_v34  ;;  %v1054_v36 = vpop.permute.xlu0 %1053  ;;  %v2583_v34 = vld [vmem:[%s3029_s16 + $0x38] sm:$0xff] }
 0x268   : > { %v989_v0 = vadd.f32 1.0, %v2513_v28  ;;  %2245 = vmatprep.subr.bf16.mxu1 %v1013_v40  ;;  %v1004_v6 = vmul.f32 %v988_v44, %v940_v29 }
 0x269   : > { %v1007_v13 = vmul.f32 %v991_v42, %v943_v4 }
 0x26a   : > { %v1005_v47 = vmul.f32 %v989_v0, %v941_v7  ;;  %v2584_v0 = vld [vmem:[%s3029_s16 + $0x20] sm:$0xff] }
 0x26b   : > { %2246 = vmatpush3.bf16.msra.mxu1 %v1013_v40  ;;  %v1015_v48 = vpack.c.bf16 %v1007_v13, %v1006_v61 }
 0x26c   : > { %v1014_v49 = vpack.c.bf16 %v1005_v47, %v1004_v6  ;;  %v1059_v6 = vpop.permute.xlu1 %1058  ;;  %v2585_v47 = vld [vmem:[%s3029_s16 + $0x28] sm:$0xff] }
 0x26e   : > { %2247 = vmatprep.subr.bf16.mxu1 %v1014_v49 }
 0x26f   : > { %2248 = vmatpush3.bf16.msra.mxu1 %v1014_v49 }
 0x270   : > { %2249 = vmatprep.subr.bf16.mxu1 %v1015_v48  ;;  %v1069_v60 = vpop.permute.xlu1 %1068 }
 0x273   : > { %2250 = vmatpush3.bf16.msra.mxu1 %v1015_v48 }
 0x274   : > { %2299 = vmatprep.subr.bf16.mxu1 %v2442_v63 }
 0x276   : > { %2252 = vmatmul.mubr.bf16.vlgmr.msra.gmra.mrb[0].mxu1 %v2427_v50  ;;  %v1064_v50 = vpop.permute.xlu0 %1063 }
 0x277   : > { %2255 = vmatprep.mubr.bf16.mxu1 %v2428_v52  ;;  %2300 = vmatpush3.bf16.msra.mxu1 %v2442_v63 }
 0x27e   : > { %2256 = vmatmul.mubr.bf16.gmra.mrb[4].mxu1 %v2429_v53  ;;  %v2434_v53 = vld [vmem:[#allocation7] sm:$0xff]  }
 0x27f   : > { %2259 = vmatprep.mubr.bf16.mxu1 %v2430_v54  ;;  %2267 = vmatprep.subr.bf16.mxu0 %v2434_v53 }
 0x280   : > { %2268 = vmatpush3.bf16.msra.mxu0 %v2434_v53 }
 0x286   : > { %2260 = vmatmul.mubr.bf16.gmra.mrb[8].mxu1 %v2431_v55 }
 0x287   : > { %2263 = vmatprep.mubr.bf16.mxu1 %v2432_v56 }
 0x28e   : > { %2264 = vmatmul.mubr.bf16.gmra.mrb[12].mxu1 %v2433_v58 }
 0x349   : > { %v2253_v10 = vpop.f32.mrb[0].mxu1 }
 0x34a   : > { %v1187_v45 = vadd.f32 %v2253_v10, %v1029_v2  ;;  %v1178_v14 = vpop.f32.mrb[1].mxu1  ;;  %v2435_v2 = vld [vmem:[#allocation7 + $0x8] sm:$0xff]   ;;  %v1074_v10 = vpop.permute.xlu0 %1073 }
 0x34b   : > { %v1179_v18 = vadd.f32 %v1178_v14, %v1019_v59  ;;  %v2254_v8 = vpop.f32.mrb[2].mxu1  ;;  %2269 = vmatprep.subr.bf16.mxu0 %v2435_v2 }
 0x34c   : > { %v1243_v46 = vadd.f32 %v2578_v17, %v1187_v45  ;;  %v1190_v23 = vadd.f32 %v2254_v8, %v1034_v16  ;;  %v1181_v27 = vpop.f32.mrb[3].mxu1  ;;  %2270 = vmatpush3.bf16.msra.mxu0 %v2435_v2  ;;  %v2436_v8 = vld [vmem:[#allocation7 + $0x10] sm:$0xff]   ;;  %v2443_v2 = vld [vmem:[#allocation8 + $0x8] sm:$0xff]  }
 0x34d   : > { %v1241_v41 = vadd.f32 %v2579_v11, %v1179_v18  ;;  %v1182_v30 = vadd.f32 %v1181_v27, %v1024_v62  ;;  %v2586_v17 = vld [vmem:[%s3029_s16 + $0x50] sm:$0xff]  ;;  %v2587_v11 = vld [vmem:[%s3029_s16 + $0x58] sm:$0xff]  ;;  %2271 = vmatprep.subr.bf16.mxu0 %v2436_v8  ;;  %2301 = vmatprep.subr.bf16.mxu1 %v2443_v2 }
 0x34e   : > { %v3336_v31 = vsel %vm1259_vm0, %v1243_v46, 0.0  ;;  %v1244_v15 = vadd.f32 %v2580_v43, %v1190_v23  ;;  %v2588_v43 = vld [vmem:[%s3029_s16 + $0x40] sm:$0xff]  ;;  %2302 = vmatpush3.bf16.msra.mxu1 %v2443_v2 }
 0x34f   : > { %1282 = vadd.xlane.f32.xlu0 %v3336_v31  ;;  %v3342_v26 = vsel %vm1259_vm0, %v1241_v41, 0.0  ;;  %v1312_v51 = vmul.f32 %v3336_v31, %v3336_v31  ;;  %v1242_v19 = vadd.f32 %v2581_v57, %v1182_v30 }
 0x350   : > { %1278 = vadd.xlane.f32.xlu1 %v3342_v26  ;;  %v3350_v32 = vsel %vm1259_vm0, %v1244_v15, 0.0  ;;  %v1310_v5 = vmul.f32 %v3342_v26, %v3342_v26  ;;  %2272 = vmatpush3.bf16.msra.mxu0 %v2436_v8 }
 0x351   : > { %v2257_v3 = vpop.f32.mrb[4].mxu1  ;;  %v3355_v38 = vsel %vm1259_vm0, %v1242_v19, 0.0  ;;  %v1313_v24 = vmul.f32 %v3350_v32, %v3350_v32 }
 0x352   : > { %v1194_v21 = vpop.f32.mrb[5].mxu1  ;;  %v1203_v37 = vadd.f32 %v2257_v3, %v1049_v35  ;;  %v1311_v28 = vmul.f32 %v3355_v38, %v3355_v38  ;;  %v1079_v3 = vpop.permute.xlu1 %1078 }
 0x353   : > { %v2258_v22 = vpop.f32.mrb[6].mxu1  ;;  %1330 = vadd.xlane.f32.xlu0 %v1312_v51  ;;  %v1195_v39 = vadd.f32 %v1194_v21, %v1039_v9  ;;  %v2437_v9 = vld [vmem:[#allocation7 + $0x18] sm:$0xff]   ;;  %v2589_v51 = vld [vmem:[%s3029_s16 + $0x48] sm:$0xff]  ;;  %v1084_v21 = vpop.permute.xlu0 %1083 }
 0x354   : > { %v1197_v33 = vpop.f32.mrb[7].mxu1  ;;  %1284 = vadd.xlane.f32.xlu1 %v3350_v32  ;;  %v1206_v40 = vadd.f32 %v2258_v22, %v1054_v36  ;;  %v1247_v20 = vadd.f32 %v2582_v25, %v1203_v37  ;;  %2273 = vmatprep.subr.bf16.mxu0 %v2437_v9  ;;  %v2438_v22 = vld [vmem:[#allocation7 + $0x20] sm:$0xff]  }
 0x355   : > { %v1198_v42 = vadd.f32 %v1197_v33, %v1044_v1  ;;  %v1245_v61 = vadd.f32 %v2584_v0, %v1195_v39  ;;  %2274 = vmatpush3.bf16.msra.mxu0 %v2437_v9  ;;  %v2440_v39 = vld [vmem:[#allocation7 + $0x30] sm:$0xff]   ;;  %v2441_v0 = vld [vmem:[#allocation7 + $0x38] sm:$0xff]  }
 0x356   : > { %v1248_v4 = vadd.f32 %v2583_v34, %v1206_v40  ;;  %v3369_v13 = vsel %vm1259_vm0, %v1247_v20, 0.0  ;;  %2275 = vmatprep.subr.bf16.mxu0 %v2438_v22  ;;  %v1089_v36 = vpop.permute.xlu1 %1088 }
 0x357   : > { %1280 = vadd.xlane.f32.xlu0 %v3355_v38  ;;  %v1246_v48 = vadd.f32 %v2585_v47, %v1198_v42  ;;  %v3382_v55 = vsel %vm1259_vm0, %v1245_v61, 0.0  ;;  %v1316_v62 = vmul.f32 %v3369_v13, %v3369_v13  ;;  %v1094_v40 = vpop.permute.xlu0 %1093  ;;  %v2591_v42 = vld [vmem:[%s3029_s16 + $0x78] sm:$0xff]  ;;  %v2592_v61 = vld [vmem:[%s3029_s16 + $0x60] sm:$0xff] }
 0x358   : > { %1332 = vadd.xlane.f32.xlu1 %v1313_v24  ;;  %v3375_v49 = vsel %vm1259_vm0, %v1248_v4, 0.0  ;;  %v1314_v18 = vmul.f32 %v3382_v55, %v3382_v55  ;;  %v2439_v24 = vld [vmem:[#allocation7 + $0x28] sm:$0xff]  }
 0x359   : > { %v2261_v12 = vpop.f32.mrb[8].mxu1  ;;  %v3387_v58 = vsel %vm1259_vm0, %v1246_v48, 0.0  ;;  %v1317_v45 = vmul.f32 %v3375_v49, %v3375_v49  ;;  %2276 = vmatpush3.bf16.msra.mxu0 %v2438_v22  ;;  %v2593_v48 = vld [vmem:[%s3029_s16 + $0x68] sm:$0xff] }
 0x35a   : > { %v1210_v44 = vpop.f32.mrb[9].mxu1  ;;  %v1219_v16 = vadd.f32 %v2261_v12, %v1069_v60  ;;  %v1315_v27 = vmul.f32 %v3387_v58, %v3387_v58  ;;  %2277 = vmatprep.subr.bf16.mxu0 %v2439_v24 }
 0x35b   : > { %v2262_v29 = vpop.f32.mrb[10].mxu1  ;;  %1326 = vadd.xlane.f32.xlu0 %v1310_v5  ;;  %v1211_v23 = vadd.f32 %v1210_v44, %v1059_v6  ;;  %v2590_v44 = vld [vmem:[%s3029_s16 + $0x70] sm:$0xff] }
 0x35c   : > { %v1213_v7 = vpop.f32.mrb[11].mxu1  ;;  %1328 = vadd.xlane.f32.xlu1 %v1311_v28  ;;  %v1222_v14 = vadd.f32 %v2262_v29, %v1074_v10  ;;  %v1251_v46 = vadd.f32 %v2586_v17, %v1219_v16 }
 0x35d   : > { %v1214_v30 = vadd.f32 %v1213_v7, %v1064_v50  ;;  %v1249_v15 = vadd.f32 %v2588_v43, %v1211_v23  ;;  %2278 = vmatpush3.bf16.msra.mxu0 %v2439_v24 }
 0x35e   : > { %v1252_v41 = vadd.f32 %v2587_v11, %v1222_v14  ;;  %v3405_v1 = vsel %vm1259_vm0, %v1251_v46, 0.0  ;;  %2279 = vmatprep.subr.bf16.mxu0 %v2440_v39 }
 0x35f   : > { %1290 = vadd.xlane.f32.xlu0 %v3369_v13  ;;  %v1250_v57 = vadd.f32 %v2589_v51, %v1214_v30  ;;  %v3416_v33 = vsel %vm1259_vm0, %v1249_v15, 0.0  ;;  %v1320_v37 = vmul.f32 %v3405_v1, %v3405_v1 }
 0x360   : > { %1292 = vadd.xlane.f32.xlu1 %v3375_v49  ;;  %v3411_v19 = vsel %vm1259_vm0, %v1252_v41, 0.0  ;;  %v1318_v20 = vmul.f32 %v3416_v33, %v3416_v33 }
 0x361   : > { %v2265_v52 = vpop.f32.mrb[12].mxu1  ;;  %v3421_v35 = vsel %vm1259_vm0, %v1250_v57, 0.0  ;;  %v1321_v5 = vmul.f32 %v3411_v19, %v3411_v19  ;;  %2280 = vmatpush3.bf16.msra.mxu0 %v2440_v39 }
 0x362   : > { %v3378_v54 = vpop.f32.mrb[13].mxu1  ;;  %v1235_v12 = vadd.f32 %v2265_v52, %v1089_v36  ;;  %v1319_v4 = vmul.f32 %v3421_v35, %v3421_v35  ;;  %2281 = vmatprep.subr.bf16.mxu0 %v2441_v0 }
 0x363   : > { %v2266_v56 = vpop.f32.mrb[14].mxu1  ;;  %1286 = vadd.xlane.f32.xlu0 %v3382_v55  ;;  %v1227_v34 = vadd.f32 %v3378_v54, %v1079_v3 }
 0x364   : > { %v3389_v59 = vpop.f32.mrb[15].mxu1  ;;  %1288 = vadd.xlane.f32.xlu1 %v3387_v58  ;;  %v1238_v25 = vadd.f32 %v2266_v56, %v1094_v40  ;;  %v1255_v28 = vadd.f32 %v2590_v44, %v1235_v12 }
 0x365   : > { %v1230_v7 = vadd.f32 %v3389_v59, %v1084_v21  ;;  %v1253_v6 = vadd.f32 %v2592_v61, %v1227_v34  ;;  %2282 = vmatpush3.bf16.msra.mxu0 %v2441_v0 }
 0x366   : > { %v1256_v29 = vadd.f32 %v2591_v42, %v1238_v25  ;;  %v3439_v47 = vsel %vm1259_vm0, %v1255_v28, 0.0 }
 0x367   : > { %1338 = vadd.xlane.f32.xlu0 %v1316_v62  ;;  %v1254_v50 = vadd.f32 %v2593_v48, %v1230_v7  ;;  %v3450_v53 = vsel %vm1259_vm0, %v1253_v6, 0.0  ;;  %v1324_v60 = vmul.f32 %v3439_v47, %v3439_v47 }
 0x368   : > { %1340 = vadd.xlane.f32.xlu1 %v1317_v45  ;;  %v3445_v52 = vsel %vm1259_vm0, %v1256_v29, 0.0  ;;  %v1322_v56 = vmul.f32 %v3450_v53, %v3450_v53 }
 0x369   : > { %v3455_v54 = vsel %vm1259_vm0, %v1254_v50, 0.0  ;;  %v1325_v62 = vmul.f32 %v3445_v52, %v3445_v52 }
 0x36a   : > { %v1323_v59 = vmul.f32 %v3455_v54, %v3455_v54 }
 0x36b   : > { %1334 = vadd.xlane.f32.xlu0 %v1314_v18 }
 0x36c   : > { %1336 = vadd.xlane.f32.xlu1 %v1315_v27 }
 0x36f   : > { %1298 = vadd.xlane.f32.xlu0 %v3405_v1 }
 0x370   : > { %1300 = vadd.xlane.f32.xlu1 %v3411_v19 }
 0x373   : > { %1294 = vadd.xlane.f32.xlu0 %v3416_v33 }
 0x374   : > { %1296 = vadd.xlane.f32.xlu1 %v3421_v35 }
 0x377   : > { %1346 = vadd.xlane.f32.xlu0 %v1320_v37 }
 0x378   : > { %1348 = vadd.xlane.f32.xlu1 %v1321_v5 }
 0x37b   : > { %1342 = vadd.xlane.f32.xlu0 %v1318_v20 }
 0x37c   : > { %1344 = vadd.xlane.f32.xlu1 %v1319_v4 }
 0x37f   : > { %1306 = vadd.xlane.f32.xlu0 %v3439_v47 }
 0x380   : > { %1308 = vadd.xlane.f32.xlu1 %v3445_v52 }
 0x383   : > { %1302 = vadd.xlane.f32.xlu0 %v3450_v53 }
 0x384   : > { %1304 = vadd.xlane.f32.xlu1 %v3455_v54 }
 0x387   : > { %1350 = vadd.xlane.f32.xlu0 %v1322_v56 }
 0x388   : > { %1352 = vadd.xlane.f32.xlu1 %v1323_v59 }
 0x38b   : > { %1354 = vadd.xlane.f32.xlu0 %v1324_v60 }
 0x38c   : > { %1356 = vadd.xlane.f32.xlu1 %v1325_v62 }
 0x3dc   : > { %v1283_v10 = vpop.xlane.xlu0 %1282 }
 0x3dd   : > { %v1279_v16 = vpop.xlane.xlu1 %1278  ;;  %v3466_v45 = vmul.f32 0.0625, %v1283_v10 }
 0x3de   : > { %v3472_v11 = vmul.f32 0.0625, %v1279_v16 }
 0x3df   : > { %v1392_v17 = vmul.f32 %v3466_v45, %v3466_v45 }
 0x3e0   : > { %v1331_v14 = vpop.xlane.xlu0 %1330  ;;  %v1390_v57 = vmul.f32 %v3472_v11, %v3472_v11 }
 0x3e1   : > { %v1376_v18 = vmul.f32 0.0625, %v1331_v14  ;;  %v1285_v8 = vpop.xlane.xlu1 %1284  ;;  %v1438_v14 = vsub.f32 %v3342_v26, %v3472_v11 }
 0x3e2   : > { %v3470_v46 = vmul.f32 0.0625, %v1285_v8 }
 0x3e3   : > { %v1408_v23 = vsub.f32 %v1376_v18, %v1392_v17 }
 0x3e4   : > { %v1281_v27 = vpop.xlane.xlu0 %1280  ;;  %v1393_v30 = vmul.f32 %v3470_v46, %v3470_v46 }
 0x3e5   : > { %v1333_v41 = vpop.xlane.xlu1 %1332  ;;  %v3476_v9 = vmul.f32 0.0625, %v1281_v27  ;;  %v1424_v15 = vmax.f32 %v1408_v23, 0.0 }
 0x3e6   : > { %v1377_v43 = vmul.f32 0.0625, %v1333_v41  ;;  %v1441_v41 = vsub.f32 %v3350_v32, %v3470_v46 }
 0x3e7   : > { %v1391_v36 = vmul.f32 %v3476_v9, %v3476_v9  ;;  %v1456_v12 = vadd.f32 1e-05, %v1424_v15  ;;  %v1439_v11 = vsub.f32 %v3355_v38, %v3476_v9 }
 0x3e8   : > { %v1409_v3 = vsub.f32 %v1377_v43, %v1393_v30  ;;  %v1327_v51 = vpop.xlane.xlu0 %1326 }
 0x3e9   : > { %v1374_v21 = vmul.f32 0.0625, %v1327_v51  ;;  %v1329_v22 = vpop.xlane.xlu1 %1328  ;;  %v1440_v51 = vsub.f32 %v3336_v31, %v3466_v45 }
 0x3ea   : > { %v1425_v37 = vmax.f32 %v1409_v3, 0.0  ;;  %v1375_v24 = vmul.f32 0.0625, %v1329_v22 }
 0x3eb   : > { %v1406_v40 = vsub.f32 %v1374_v21, %v1390_v57 }
 0x3ec   : > { %v1457_v5 = vadd.f32 1e-05, %v1425_v37  ;;  %v1407_v25 = vsub.f32 %v1375_v24, %v1391_v36  ;;  %v1291_v20 = vpop.xlane.xlu0 %1290 }
 0x3ed   : > { %v1422_v39 = vmax.f32 %v1406_v40, 0.0  ;;  %v1293_v44 = vpop.xlane.xlu1 %1292  ;;  %v3482_v29 = vmul.f32 0.0625, %v1291_v20 }
 0x3ee   : > { %v1423_v28 = vmax.f32 %v1407_v25, 0.0  ;;  %2514 = vrsqrt.f32 %v1457_v5  ;;  %v3484_v0 = vmul.f32 0.0625, %v1293_v44 }
 0x3ef   : > { %v1454_v34 = vadd.f32 1e-05, %v1422_v39  ;;  %2516 = vrsqrt.f32 %v1456_v12  ;;  %v1396_v6 = vmul.f32 %v3482_v29, %v3482_v29 }
 0x3f0   : > { %v1455_v4 = vadd.f32 1e-05, %v1423_v28  ;;  %v1287_v42 = vpop.xlane.xlu0 %1286  ;;  %v1397_v59 = vmul.f32 %v3484_v0, %v3484_v0 }
 0x3f1   : > { %2518 = vrsqrt.f32 %v1454_v34  ;;  %v1289_v7 = vpop.xlane.xlu1 %1288  ;;  %v3488_v48 = vmul.f32 0.0625, %v1287_v42 }
 0x3f2   : > { %2520 = vrsqrt.f32 %v1455_v4  ;;  %v3492_v60 = vmul.f32 0.0625, %v1289_v7 }
 0x3f3   : > { %v1394_v18 = vmul.f32 %v3488_v48, %v3488_v48 }
 0x3f4   : > { %v1339_v61 = vpop.xlane.xlu0 %1338  ;;  %v1395_v30 = vmul.f32 %v3492_v60, %v3492_v60 }
 0x3f5   : > { %v1380_v50 = vmul.f32 0.0625, %v1339_v61  ;;  %v1341_v56 = vpop.xlane.xlu1 %1340 }
 0x3f6   : > { %v1381_v62 = vmul.f32 0.0625, %v1341_v56 }
 0x3f7   : > { %v1412_v63 = vsub.f32 %v1380_v50, %v1396_v6 }
 0x3f8   : > { %v1413_v2 = vsub.f32 %v1381_v62, %v1397_v59  ;;  %v1335_v10 = vpop.xlane.xlu0 %1334  ;;  %v2515_v16 = vpop.eup %2514 }
 0x3f9   : > { %v1428_v8 = vmax.f32 %v1412_v63, 0.0  ;;  %v1378_v17 = vmul.f32 0.0625, %v1335_v10  ;;  %v1337_v23 = vpop.xlane.xlu1 %1336  ;;  %v2517_v27 = vpop.eup %2516  ;;  %v1489_v46 = vmul.f32 %v2515_v16, %v1441_v41 }
 0x3fa   : > { %v1429_v43 = vmax.f32 %v1413_v2, 0.0  ;;  %v1379_v15 = vmul.f32 0.0625, %v1337_v23  ;;  %v1488_v39 = vmul.f32 %v2517_v27, %v1440_v51  ;;  %v1445_v23 = vsub.f32 %v3375_v49, %v3484_v0 }
 0x3fb   : > { %v2519_v3 = vpop.eup %2518  ;;  %v1460_v57 = vadd.f32 1e-05, %v1428_v8  ;;  %v1410_v21 = vsub.f32 %v1378_v17, %v1394_v18 }
 0x3fc   : > { %v2521_v22 = vpop.eup %2520  ;;  %v1461_v36 = vadd.f32 1e-05, %v1429_v43  ;;  %v1411_v37 = vsub.f32 %v1379_v15, %v1395_v30  ;;  %v1299_v24 = vpop.xlane.xlu0 %1298  ;;  %v1486_v40 = vmul.f32 %v2519_v3, %v1438_v14  ;;  %v1503_v9 = vpack.c.bf16 %v1489_v46, %v1488_v39 }
 0x3fd   : > { %v1426_v12 = vmax.f32 %v1410_v21, 0.0  ;;  %v1301_v5 = vpop.xlane.xlu1 %1300  ;;  %v1487_v25 = vmul.f32 %v2521_v22, %v1439_v11  ;;  %2522 = vrsqrt.f32 %v1460_v57  ;;  %v3506_v4 = vmul.f32 0.0625, %v1299_v24 }
 0x3fe   : > { %v1427_v20 = vmax.f32 %v1411_v37, 0.0  ;;  %2524 = vrsqrt.f32 %v1461_v36  ;;  %v3508_v7 = vmul.f32 0.0625, %v1301_v5  ;;  %v1444_v14 = vsub.f32 %v3369_v13, %v3482_v29 }
 0x3ff   : > { %v1458_v44 = vadd.f32 1e-05, %v1426_v12  ;;  %v1502_v45 = vpack.c.bf16 %v1487_v25, %v1486_v40  ;;  %v1400_v6 = vmul.f32 %v3506_v4, %v3506_v4  ;;  %v1442_v15 = vsub.f32 %v3382_v55, %v3488_v48 }
 0x400   : > { %v1459_v28 = vadd.f32 1e-05, %v1427_v20  ;;  %v1295_v34 = vpop.xlane.xlu0 %1294  ;;  %v1401_v62 = vmul.f32 %v3508_v7, %v3508_v7  ;;  %v1443_v57 = vsub.f32 %v3387_v58, %v3492_v60 }
 0x401   : > { %2526 = vrsqrt.f32 %v1458_v44  ;;  %2283 = vmatprep.mubr.bf16.mxu0 %v1502_v45  ;;  %v1297_v42 = vpop.xlane.xlu1 %1296  ;;  %v3512_v50 = vmul.f32 0.0625, %v1295_v34 }
 0x402   : > { %2528 = vrsqrt.f32 %v1459_v28  ;;  %2284 = vmatmul.mubr.bf16.vlgmr.msra.gmra.mrb[16].mxu0 %v1503_v9  ;;  %v3516_v63 = vmul.f32 0.0625, %v1297_v42 }
 0x403   : > { %v1398_v27 = vmul.f32 %v3512_v50, %v3512_v50 }
 0x404   : > { %v1347_v61 = vpop.xlane.xlu0 %1346  ;;  %v1399_v3 = vmul.f32 %v3516_v63, %v3516_v63 }
 0x405   : > { %v1384_v56 = vmul.f32 0.0625, %v1347_v61  ;;  %v1349_v59 = vpop.xlane.xlu1 %1348 }
 0x406   : > { %v1385_v2 = vmul.f32 0.0625, %v1349_v59 }
 0x407   : > { %v1416_v10 = vsub.f32 %v1384_v56, %v1400_v6  ;;  %v2523_v16 = vpop.eup %2522 }
 0x408   : > { %v1417_v18 = vsub.f32 %v1385_v2, %v1401_v62  ;;  %v1343_v8 = vpop.xlane.xlu0 %1342  ;;  %v2525_v17 = vpop.eup %2524  ;;  %v1492_v22 = vmul.f32 %v2523_v16, %v1444_v14 }
 0x409   : > { %v1432_v41 = vmax.f32 %v1416_v10, 0.0  ;;  %v1382_v30 = vmul.f32 0.0625, %v1343_v8  ;;  %v1345_v43 = vpop.xlane.xlu1 %1344  ;;  %v1493_v12 = vmul.f32 %v2525_v17, %v1445_v23  ;;  %v1448_v8 = vsub.f32 %v3405_v1, %v3506_v4 }
 0x40a   : > { %v1433_v51 = vmax.f32 %v1417_v18, 0.0  ;;  %v1383_v29 = vmul.f32 0.0625, %v1345_v43  ;;  %v1447_v4 = vsub.f32 %v3421_v35, %v3516_v63 }
 0x40b   : > { %v2527_v11 = vpop.eup %2526  ;;  %v1464_v21 = vadd.f32 1e-05, %v1432_v41  ;;  %v1414_v0 = vsub.f32 %v1382_v30, %v1398_v27  ;;  %v1505_v60 = vpack.c.bf16 %v1493_v12, %v1492_v22  ;;  %v1449_v41 = vsub.f32 %v3411_v19, %v3508_v7 }
 0x40c   : > { %v2529_v36 = vpop.eup %2528  ;;  %v1465_v37 = vadd.f32 1e-05, %v1433_v51  ;;  %v1415_v24 = vsub.f32 %v1383_v29, %v1399_v3  ;;  %v1307_v40 = vpop.xlane.xlu0 %1306  ;;  %v1490_v46 = vmul.f32 %v2527_v11, %v1442_v15  ;;  %v1446_v51 = vsub.f32 %v3416_v33, %v3512_v50 }
 0x40d   : > { %v1430_v5 = vmax.f32 %v1414_v0, 0.0  ;;  %v1309_v48 = vpop.xlane.xlu1 %1308  ;;  %v1491_v25 = vmul.f32 %v2529_v36, %v1443_v57  ;;  %2530 = vrsqrt.f32 %v1464_v21  ;;  %v1372_v6 = vmul.f32 0.0625, %v1307_v40 }
 0x40e   : > { %v1431_v20 = vmax.f32 %v1415_v24, 0.0  ;;  %2532 = vrsqrt.f32 %v1465_v37  ;;  %v1373_v2 = vmul.f32 0.0625, %v1309_v48 }
 0x40f   : > { %v1462_v39 = vadd.f32 1e-05, %v1430_v5  ;;  %v1504_v44 = vpack.c.bf16 %v1491_v25, %v1490_v46  ;;  %v1404_v30 = vmul.f32 %v1372_v6, %v1372_v6 }
 0x410   : > { %v1463_v45 = vadd.f32 1e-05, %v1431_v20  ;;  %v1303_v28 = vpop.xlane.xlu0 %1302  ;;  %v1405_v29 = vmul.f32 %v1373_v2, %v1373_v2 }
 0x411   : > { %2534 = vrsqrt.f32 %v1462_v39  ;;  %v1370_v34 = vmul.f32 0.0625, %v1303_v28  ;;  %2287 = vmatprep.mubr.bf16.mxu0 %v1504_v44  ;;  %v1305_v9 = vpop.xlane.xlu1 %1304 }
 0x412   : > { %2536 = vrsqrt.f32 %v1463_v45  ;;  %v1371_v42 = vmul.f32 0.0625, %v1305_v9  ;;  %2288 = vmatmul.mubr.bf16.gmra.mrb[20].mxu0 %v1505_v60 }
 0x413   : > { %v1402_v56 = vmul.f32 %v1370_v34, %v1370_v34  ;;  %v1450_v63 = vsub.f32 %v3450_v53, %v1370_v34  ;;  %v2445_v34 = vld [vmem:[#allocation8 + $0x18] sm:$0xff]  }
 0x414   : > { %v1351_v61 = vpop.xlane.xlu0 %1350  ;;  %v1403_v10 = vmul.f32 %v1371_v42, %v1371_v42  ;;  %v1451_v45 = vsub.f32 %v3455_v54, %v1371_v42  ;;  %v2446_v42 = vld [vmem:[#allocation8 + $0x20] sm:$0xff]  }
 0x415   : > { %v1386_v59 = vmul.f32 0.0625, %v1351_v61  ;;  %v1353_v62 = vpop.xlane.xlu1 %1352  ;;  %v1452_v61 = vsub.f32 %v3439_v47, %v1372_v6  ;;  %v2447_v6 = vld [vmem:[#allocation8 + $0x28] sm:$0xff]  }
 0x416   : > { %v1387_v16 = vmul.f32 0.0625, %v1353_v62 }
 0x417   : > { %v1418_v14 = vsub.f32 %v1386_v59, %v1402_v56  ;;  %v2531_v18 = vpop.eup %2530  ;;  %v1453_v59 = vsub.f32 %v3445_v52, %v1373_v2  ;;  %v2448_v2 = vld [vmem:[#allocation8 + $0x30] sm:$0xff]  }
 0x418   : > { %v1419_v17 = vsub.f32 %v1387_v16, %v1403_v10  ;;  %v1355_v23 = vpop.xlane.xlu0 %1354  ;;  %v2533_v27 = vpop.eup %2532  ;;  %v1496_v36 = vmul.f32 %v2531_v18, %v1448_v8  ;;  %v2444_v8 = vld [vmem:[#allocation8 + $0x10] sm:$0xff]  }
 0x419   : > { %v1434_v43 = vmax.f32 %v1418_v14, 0.0  ;;  %v1388_v15 = vmul.f32 0.0625, %v1355_v23  ;;  %v1357_v3 = vpop.xlane.xlu1 %1356  ;;  %v1497_v46 = vmul.f32 %v2533_v27, %v1449_v41  ;;  %2303 = vmatprep.subr.bf16.mxu1 %v2444_v8  ;;  %v3545_v23 = vld [vmem:[%s3661_s6] ss:$0 sm:$0xff] }
 0x41a   : > { %v1435_v11 = vmax.f32 %v1419_v17, 0.0  ;;  %v1389_v57 = vmul.f32 0.0625, %v1357_v3  ;;  %2304 = vmatpush3.bf16.msra.mxu1 %v2444_v8  ;;  %v2449_v17 = vld [vmem:[#allocation8 + $0x38] sm:$0xff]  }
 0x41b   : > { %v2535_v21 = vpop.eup %2534  ;;  %v1466_v0 = vadd.f32 1e-05, %v1434_v43  ;;  %v1420_v22 = vsub.f32 %v1388_v15, %v1404_v30  ;;  %v1507_v39 = vpack.c.bf16 %v1497_v46, %v1496_v36  ;;  %2305 = vmatprep.subr.bf16.mxu1 %v2445_v34 }
 0x41c   : > { %v2537_v37 = vpop.eup %2536  ;;  %v1467_v24 = vadd.f32 1e-05, %v1435_v11  ;;  %v1421_v7 = vsub.f32 %v1389_v57, %v1405_v29  ;;  %v1494_v40 = vmul.f32 %v2535_v21, %v1446_v51 }
 0x41d   : > { %2538 = vrsqrt.f32 %v1466_v0  ;;  %v1436_v12 = vmax.f32 %v1420_v22, 0.0  ;;  %v1495_v5 = vmul.f32 %v2537_v37, %v1447_v4 }
 0x41e   : > { %2540 = vrsqrt.f32 %v1467_v24  ;;  %v1437_v50 = vmax.f32 %v1421_v7, 0.0  ;;  %2306 = vmatpush3.bf16.msra.mxu1 %v2445_v34 }
 0x41f   : > { %v1468_v48 = vadd.f32 1e-05, %v1436_v12  ;;  %v1506_v25 = vpack.c.bf16 %v1495_v5, %v1494_v40  ;;  %2307 = vmatprep.subr.bf16.mxu1 %v2446_v42 }
 0x420   : > { %v1469_v20 = vadd.f32 1e-05, %v1437_v50 }
 0x421   : > { %2542 = vrsqrt.f32 %v1468_v48  ;;  %2291 = vmatprep.mubr.bf16.mxu0 %v1506_v25 }
 0x422   : > { %2544 = vrsqrt.f32 %v1469_v20  ;;  %2292 = vmatmul.mubr.bf16.gmra.mrb[24].mxu0 %v1507_v39  ;;  %2308 = vmatpush3.bf16.msra.mxu1 %v2446_v42 }
 0x423   : > { %2309 = vmatprep.subr.bf16.mxu1 %v2447_v6 }
 0x426   : > { %2310 = vmatpush3.bf16.msra.mxu1 %v2447_v6 }
 0x427   : > { %v2539_v44 = vpop.eup %2538  ;;  %2311 = vmatprep.subr.bf16.mxu1 %v2448_v2 }
 0x428   : > { %v2541_v28 = vpop.eup %2540  ;;  %v1498_v60 = vmul.f32 %v2539_v44, %v1450_v63 }
 0x429   : > { %v1499_v9 = vmul.f32 %v2541_v28, %v1451_v45 }
 0x42a   : > { %2312 = vmatpush3.bf16.msra.mxu1 %v2448_v2 }
 0x42b   : > { %v2543_v56 = vpop.eup %2542  ;;  %v1508_v62 = vpack.c.bf16 %v1499_v9, %v1498_v60  ;;  %2313 = vmatprep.subr.bf16.mxu1 %v2449_v17 }
 0x42c   : > { %v2545_v10 = vpop.eup %2544  ;;  %v1500_v16 = vmul.f32 %v2543_v56, %v1452_v61 }
 0x42d   : > { %2295 = vmatprep.mubr.bf16.mxu0 %v1508_v62  ;;  %v1501_v14 = vmul.f32 %v2545_v10, %v1453_v59 }
 0x42e   : > { %2314 = vmatpush3.bf16.msra.mxu1 %v2449_v17 }
 0x42f   : > { %v1509_v18 = vpack.c.bf16 %v1501_v14, %v1500_v16 }
 0x431   : > { %2296 = vmatmul.mubr.bf16.gmra.mrb[28].mxu0 %v1509_v18 }
 0x4d5   : > { %v2285_v27 = vpop.f32.mrb[16].mxu0 }
 0x4d6   : > { %v1624_v41 = vadd.f32 %v2285_v27, %v3545_v23  ;;  %v1615_v30 = vpop.f32.mrb[17].mxu0 }
 0x4d7   : > { %v1616_v43 = vadd.f32 %v3545_v23, %v1615_v30  ;;  %v2286_v15 = vpop.f32.mrb[18].mxu0 }
 0x4d8   : > { %v1696_v3 = vmul.f32 0.70710677, %v1624_v41  ;;  %v1627_v51 = vadd.f32 %v2286_v15, %v3545_v23  ;;  %v1618_v29 = vpop.f32.mrb[19].mxu0  ;;  %v1680_v5 = vmul.f32 0.5, %v1624_v41 }
 0x4d9   : > { %v1694_v11 = vmul.f32 0.70710677, %v1616_v43  ;;  %v1619_v57 = vadd.f32 %v3545_v23, %v1618_v29  ;;  %v1678_v39 = vmul.f32 0.5, %v1616_v43 }
 0x4da   : > { %2546 = verf.f32 %v1696_v3  ;;  %v1697_v21 = vmul.f32 0.70710677, %v1627_v51  ;;  %v1681_v50 = vmul.f32 0.5, %v1627_v51 }
 0x4db   : > { %2548 = verf.f32 %v1694_v11  ;;  %v1695_v4 = vmul.f32 0.70710677, %v1619_v57  ;;  %v1679_v63 = vmul.f32 0.5, %v1619_v57 }
 0x4dc   : > { %2550 = verf.f32 %v1697_v21 }
 0x4dd   : > { %2552 = verf.f32 %v1695_v4 }
 0x4e4   : > { %v2547_v0 = vpop.eup %2546 }
 0x4e5   : > { %v2549_v22 = vpop.eup %2548  ;;  %v1728_v36 = vadd.f32 1.0, %v2547_v0  ;;  %v2289_v37 = vpop.f32.mrb[20].mxu0 }
 0x4e6   : > { %v2551_v24 = vpop.eup %2550  ;;  %v1726_v7 = vadd.f32 1.0, %v2549_v22  ;;  %v1640_v40 = vadd.f32 %v2289_v37, %v3545_v23  ;;  %v1631_v46 = vpop.f32.mrb[21].mxu0 }
 0x4e7   : > { %v2553_v12 = vpop.eup %2552  ;;  %v1729_v48 = vadd.f32 1.0, %v2551_v24  ;;  %v1632_v25 = vadd.f32 %v3545_v23, %v1631_v46  ;;  %v2290_v20 = vpop.f32.mrb[22].mxu0  ;;  %v1744_v60 = vmul.f32 %v1728_v36, %v1680_v5 }
 0x4e8   : > { %v1727_v44 = vadd.f32 1.0, %v2553_v12  ;;  %v1700_v45 = vmul.f32 0.70710677, %v1640_v40  ;;  %v1634_v28 = vpop.f32.mrb[23].mxu0  ;;  %v1643_v56 = vadd.f32 %v2290_v20, %v3545_v23  ;;  %v1742_v59 = vmul.f32 %v1726_v7, %v1678_v39 }
 0x4e9   : > { %v1745_v9 = vmul.f32 %v1729_v48, %v1681_v50  ;;  %v1698_v61 = vmul.f32 0.70710677, %v1632_v25  ;;  %v1635_v10 = vadd.f32 %v3545_v23, %v1634_v28  ;;  %v1684_v30 = vmul.f32 0.5, %v1640_v40 }
 0x4ea   : > { %v1743_v62 = vmul.f32 %v1727_v44, %v1679_v63  ;;  %2554 = verf.f32 %v1700_v45  ;;  %v1701_v14 = vmul.f32 0.70710677, %v1643_v56  ;;  %v1682_v29 = vmul.f32 0.5, %v1632_v25 }
 0x4eb   : > { %v1759_v16 = vpack.c.bf16 %v1745_v9, %v1744_v60  ;;  %2556 = verf.f32 %v1698_v61  ;;  %v1699_v18 = vmul.f32 0.70710677, %v1635_v10  ;;  %v1685_v11 = vmul.f32 0.5, %v1643_v56 }
 0x4ec   : > { %v1758_v8 = vpack.c.bf16 %v1743_v62, %v1742_v59  ;;  %2558 = verf.f32 %v1701_v14  ;;  %v1683_v0 = vmul.f32 0.5, %v1635_v10 }
 0x4ed   : > { %2560 = verf.f32 %v1699_v18 }
 0x4ee   : > { %2315 = vmatprep.mubr.bf16.mxu1 %v1758_v8 }
 0x4ef   : > { %2316 = vmatmul.mubr.bf16.vlgmr.msra.gmra.mrb[16].mxu1 %v1759_v16 }
 0x4f4   : > { %v2555_v34 = vpop.eup %2554 }
 0x4f5   : > { %v2557_v42 = vpop.eup %2556  ;;  %v2293_v6 = vpop.f32.mrb[24].mxu0  ;;  %v1732_v2 = vadd.f32 1.0, %v2555_v34 }
 0x4f6   : > { %v1656_v17 = vadd.f32 %v2293_v6, %v3545_v23  ;;  %v1647_v27 = vpop.f32.mrb[25].mxu0  ;;  %v2559_v41 = vpop.eup %2558  ;;  %v1730_v43 = vadd.f32 1.0, %v2557_v42 }
 0x4f7   : > { %v1648_v15 = vadd.f32 %v3545_v23, %v1647_v27  ;;  %v2294_v3 = vpop.f32.mrb[26].mxu0  ;;  %v2561_v51 = vpop.eup %2560  ;;  %v1733_v57 = vadd.f32 1.0, %v2559_v41  ;;  %v1748_v24 = vmul.f32 %v1732_v2, %v1684_v30 }
 0x4f8   : > { %v1704_v21 = vmul.f32 0.70710677, %v1656_v17  ;;  %v1650_v4 = vpop.f32.mrb[27].mxu0  ;;  %v1731_v22 = vadd.f32 1.0, %v2561_v51  ;;  %v1659_v37 = vadd.f32 %v2294_v3, %v3545_v23  ;;  %v1746_v46 = vmul.f32 %v1730_v43, %v1682_v29 }
 0x4f9   : > { %v1702_v36 = vmul.f32 0.70710677, %v1648_v15  ;;  %v1749_v7 = vmul.f32 %v1733_v57, %v1685_v11  ;;  %v1651_v40 = vadd.f32 %v3545_v23, %v1650_v4  ;;  %v1688_v56 = vmul.f32 0.5, %v1656_v17 }
 0x4fa   : > { %2562 = verf.f32 %v1704_v21  ;;  %v1747_v12 = vmul.f32 %v1731_v22, %v1683_v0  ;;  %v1705_v5 = vmul.f32 0.70710677, %v1659_v37  ;;  %v1686_v18 = vmul.f32 0.5, %v1648_v15 }
 0x4fb   : > { %2564 = verf.f32 %v1702_v36  ;;  %v1703_v50 = vmul.f32 0.70710677, %v1651_v40  ;;  %v1761_v48 = vpack.c.bf16 %v1749_v7, %v1748_v24  ;;  %v1689_v8 = vmul.f32 0.5, %v1659_v37 }
 0x4fc   : > { %2566 = verf.f32 %v1705_v5  ;;  %v1760_v25 = vpack.c.bf16 %v1747_v12, %v1746_v46  ;;  %v1687_v6 = vmul.f32 0.5, %v1651_v40 }
 0x4fd   : > { %2568 = verf.f32 %v1703_v50 }
 0x4fe   : > { %2319 = vmatprep.mubr.bf16.mxu1 %v1760_v25 }
 0x4ff   : > { %2320 = vmatmul.mubr.bf16.gmra.mrb[20].mxu1 %v1761_v48 }
 0x504   : > { %v2563_v20 = vpop.eup %2562  ;;  %v2297_v39 = vpop.f32.mrb[28].mxu0 }
 0x505   : > { %v2565_v63 = vpop.eup %2564  ;;  %v1672_v44 = vadd.f32 %v2297_v39, %v3545_v23  ;;  %v1663_v45 = vpop.f32.mrb[29].mxu0  ;;  %v1736_v28 = vadd.f32 1.0, %v2563_v20  ;;  %v2123_v20 = vld [vmem:[%s3663_s8] ss:$0 sm:$0xff] }
 0x506   : > { %v1664_v60 = vadd.f32 %v3545_v23, %v1663_v45  ;;  %v2298_v9 = vpop.f32.mrb[30].mxu0  ;;  %v2567_v61 = vpop.eup %2566  ;;  %v1734_v59 = vadd.f32 1.0, %v2565_v63 }
 0x507   : > { %v1708_v62 = vmul.f32 0.70710677, %v1672_v44  ;;  %v1675_v10 = vadd.f32 %v2298_v9, %v3545_v23  ;;  %v1666_v16 = vpop.f32.mrb[31].mxu0  ;;  %v2569_v14 = vpop.eup %2568  ;;  %v1737_v34 = vadd.f32 1.0, %v2567_v61  ;;  %v1752_v41 = vmul.f32 %v1736_v28, %v1688_v56 }
 0x508   : > { %v1706_v42 = vmul.f32 0.70710677, %v1664_v60  ;;  %v1735_v2 = vadd.f32 1.0, %v2569_v14  ;;  %v1667_v43 = vadd.f32 %v3545_v23, %v1666_v16  ;;  %v1750_v17 = vmul.f32 %v1734_v59, %v1686_v18 }
 0x509   : > { %2570 = verf.f32 %v1708_v62  ;;  %v1709_v27 = vmul.f32 0.70710677, %v1675_v10  ;;  %v1753_v30 = vmul.f32 %v1737_v34, %v1689_v8  ;;  %v1692_v0 = vmul.f32 0.5, %v1672_v44 }
 0x50a   : > { %2572 = verf.f32 %v1706_v42  ;;  %v1751_v3 = vmul.f32 %v1735_v2, %v1687_v6  ;;  %v1707_v51 = vmul.f32 0.70710677, %v1667_v43  ;;  %v1693_v22 = vmul.f32 0.5, %v1675_v10 }
 0x50b   : > { %2574 = verf.f32 %v1709_v27  ;;  %v1763_v29 = vpack.c.bf16 %v1753_v30, %v1752_v41  ;;  %v1690_v40 = vmul.f32 0.5, %v1664_v60  ;;  %v1691_v46 = vmul.f32 0.5, %v1667_v43 }
 0x50c   : > { %v1762_v11 = vpack.c.bf16 %v1751_v3, %v1750_v17  ;;  %2576 = verf.f32 %v1707_v51 }
 0x50e   : > { %2323 = vmatprep.mubr.bf16.mxu1 %v1762_v11 }
 0x50f   : > { %2324 = vmatmul.mubr.bf16.gmra.mrb[24].mxu1 %v1763_v29 }
 0x513   : > { %v2571_v15 = vpop.eup %2570 }
 0x514   : > { %v2573_v57 = vpop.eup %2572  ;;  %v1740_v21 = vadd.f32 1.0, %v2571_v15 }
 0x515   : > { %v2575_v4 = vpop.eup %2574  ;;  %v1738_v37 = vadd.f32 1.0, %v2573_v57 }
 0x516   : > { %v1741_v36 = vadd.f32 1.0, %v2575_v4  ;;  %v2577_v23 = vpop.eup %2576  ;;  %v1756_v24 = vmul.f32 %v1740_v21, %v1692_v0 }
 0x517   : > { %v1739_v12 = vadd.f32 1.0, %v2577_v23  ;;  %v1754_v50 = vmul.f32 %v1738_v37, %v1690_v40 }
 0x518   : > { %v1757_v7 = vmul.f32 %v1741_v36, %v1693_v22 }
 0x519   : > { %v1755_v48 = vmul.f32 %v1739_v12, %v1691_v46 }
 0x51a   : > { %v1765_v5 = vpack.c.bf16 %v1757_v7, %v1756_v24 }
 0x51b   : > { %v1764_v25 = vpack.c.bf16 %v1755_v48, %v1754_v50 }
 0x51d   : > { %2327 = vmatprep.mubr.bf16.mxu1 %v1764_v25 }
 0x51e   : > { %2328 = vmatmul.mubr.bf16.gmra.mrb[28].mxu1 %v1765_v5 }
 0x5c2   : > { %v2317_v39 = vpop.f32.mrb[16].mxu1 }
 0x5c3   : > { %v1880_v63 = vadd.f32 %v2317_v39, %v2123_v20  ;;  %v1871_v44 = vpop.f32.mrb[17].mxu1 }
 0x5c4   : > { %v1872_v45 = vadd.f32 %v2123_v20, %v1871_v44  ;;  %v2318_v28 = vpop.f32.mrb[18].mxu1 }
 0x5c5   : > { %v1936_v60 = vadd.f32 %v1880_v63, %v3336_v31  ;;  %v1883_v9 = vadd.f32 %v2318_v28, %v2123_v20  ;;  %v1874_v61 = vpop.f32.mrb[19].mxu1 }
 0x5c6   : > { %v1934_v56 = vadd.f32 %v1872_v45, %v3342_v26  ;;  %v1875_v59 = vadd.f32 %v2123_v20, %v1874_v61 }
 0x5c7   : > { %1952 = vst [vmem:[%s3571_s25 + $0x10] sm:$0xff] %v1936_v60  ;;  %v1937_v62 = vadd.f32 %v1883_v9, %v3350_v32 }
 0x5c8   : > { %1950 = vst [vmem:[%s3571_s25] sm:$0xff] %v1934_v56  ;;  %v1935_v10 = vadd.f32 %v1875_v59, %v3355_v38 }
 0x5c9   : > { %1953 = vst [vmem:[%s3571_s25 + $0x18] sm:$0xff] %v1937_v62 }
 0x5ca   : > { %1951 = vst [vmem:[%s3571_s25 + $0x8] sm:$0xff] %v1935_v10 }
 0x5d2   : > { %v2321_v31 = vpop.f32.mrb[20].mxu1 }
 0x5d3   : > { %v1896_v26 = vadd.f32 %v2321_v31, %v2123_v20  ;;  %v1887_v16 = vpop.f32.mrb[21].mxu1 }
 0x5d4   : > { %v1888_v14 = vadd.f32 %v2123_v20, %v1887_v16  ;;  %v2322_v18 = vpop.f32.mrb[22].mxu1 }
 0x5d5   : > { %v1940_v8 = vadd.f32 %v1896_v26, %v3369_v13  ;;  %v1899_v34 = vadd.f32 %v2322_v18, %v2123_v20  ;;  %v1890_v42 = vpop.f32.mrb[23].mxu1 }
 0x5d6   : > { %v1938_v6 = vadd.f32 %v1888_v14, %v3382_v55  ;;  %v1891_v32 = vadd.f32 %v2123_v20, %v1890_v42 }
 0x5d7   : > { %1956 = vst [vmem:[%s3571_s25 + $0x30] sm:$0xff] %v1940_v8  ;;  %v1941_v38 = vadd.f32 %v1899_v34, %v3375_v49 }
 0x5d8   : > { %1954 = vst [vmem:[%s3571_s25 + $0x20] sm:$0xff] %v1938_v6  ;;  %v1939_v2 = vadd.f32 %v1891_v32, %v3387_v58 }
 0x5d9   : > { %1957 = vst [vmem:[%s3571_s25 + $0x38] sm:$0xff] %v1941_v38 }
 0x5da   : > { %1955 = vst [vmem:[%s3571_s25 + $0x28] sm:$0xff] %v1939_v2 }
 0x5e2   : > { %v2325_v27 = vpop.f32.mrb[24].mxu1 }
 0x5e3   : > { %v1912_v41 = vadd.f32 %v2325_v27, %v2123_v20  ;;  %v1903_v13 = vpop.f32.mrb[25].mxu1 }
 0x5e4   : > { %v1904_v30 = vadd.f32 %v2123_v20, %v1903_v13  ;;  %v2326_v43 = vpop.f32.mrb[26].mxu1 }
 0x5e5   : > { %v1944_v55 = vadd.f32 %v1912_v41, %v3405_v1  ;;  %v1915_v17 = vadd.f32 %v2326_v43, %v2123_v20  ;;  %v1906_v3 = vpop.f32.mrb[27].mxu1 }
 0x5e6   : > { %v1942_v49 = vadd.f32 %v1904_v30, %v3416_v33  ;;  %v1907_v51 = vadd.f32 %v2123_v20, %v1906_v3 }
 0x5e7   : > { %1960 = vst [vmem:[%s3571_s25 + $0x50] sm:$0xff] %v1944_v55  ;;  %v1945_v58 = vadd.f32 %v1915_v17, %v3411_v19 }
 0x5e8   : > { %1958 = vst [vmem:[%s3571_s25 + $0x40] sm:$0xff] %v1942_v49  ;;  %v1943_v29 = vadd.f32 %v1907_v51, %v3421_v35 }
 0x5e9   : > { %1961 = vst [vmem:[%s3571_s25 + $0x58] sm:$0xff] %v1945_v58 }
 0x5ea   : > { %1959 = vst [vmem:[%s3571_s25 + $0x48] sm:$0xff] %v1943_v29 }
 0x5f1   : > { %v2329_v11 = vpop.f32.mrb[28].mxu1 }
 0x5f2   : > { %v1928_v15 = vadd.f32 %v2329_v11, %v2123_v20  ;;  %v1919_v1 = vpop.f32.mrb[29].mxu1 }
 0x5f3   : > { %v1920_v57 = vadd.f32 %v2123_v20, %v1919_v1  ;;  %v2330_v21 = vpop.f32.mrb[30].mxu1 }
 0x5f4   : > { %v1948_v33 = vadd.f32 %v1928_v15, %v3439_v47  ;;  %v1931_v19 = vadd.f32 %v2330_v21, %v2123_v20  ;;  %v1922_v4 = vpop.f32.mrb[31].mxu1 }
 0x5f5   : > { %v1946_v35 = vadd.f32 %v1920_v57, %v3450_v53  ;;  %v1923_v0 = vadd.f32 %v2123_v20, %v1922_v4 }
 0x5f6   : > { %1964 = vst [vmem:[%s3571_s25 + $0x70] sm:$0xff] %v1948_v33  ;;  %v1949_v22 = vadd.f32 %v1931_v19, %v3445_v52 }
 0x5f7   : > { %1962 = vst [vmem:[%s3571_s25 + $0x60] sm:$0xff] %v1946_v35  ;;  %v1947_v47 = vadd.f32 %v1923_v0, %v3455_v54 }
 0x5f8   : > { %1965 = vst [vmem:[%s3571_s25 + $0x78] sm:$0xff] %v1949_v22 }
 0x5f9   : > { %1963 = vst [vmem:[%s3571_s25 + $0x68] sm:$0xff] %v1947_v47 }
 0x5fa   : > { %2719 = shalt.err (!%p2716_p0)
}
 0x5fb   : > { %s2720_s14 = scalar_lea.hbm %s3604_s26, 2048  ;;  %s2724_s15 = scalar_lea.hbm %s3664_s9, 4096 }
 0x5fc   : > { %p2721_p10 = scmp.ne.s32.totalorder %s3604_s26, %s2720_s14  ;;  %p2725_p4 = scmp.lt.u32.totalorder %s3604_s26, %s3664_s9 }
 0x5fd   : > { %p2726_p12 = scmp.lt.u32.totalorder %s2724_s15, %s2720_s14  ;;  %p2728_p8 = scmp.lt.u32.totalorder %s2720_s14, %s3604_s26 }
 0x5fe   : > { %p2722_p2 = pnand %p2721_p10, %p3690_p11 }
 0x5ff   : > { %p2727_p7 = por %p2726_p12, %p2725_p4 }
 0x600   : > { %p2723_p3 = pneg %p2722_p2 }
 0x601   : > { %p2729_p13 = por %p2728_p8, %p2727_p7 }
 0x603   : > { %p2730_p1 = pnand %p2729_p13, %p2723_p3 }
 0x605   : > { %2733 = shalt.err (!%p2730_p1)
}
 0x606   : > { %s2790_s22 = smov 128   ;;  %s2791_s25 = smov 8  }
 0x607   : > { %2347 = dma.vmem_to_hbm [thread:$0]  (%p3690_p11), %s3606_s29, 2048, %s3604_s26, %s3614_s13, %s2790_s22, %s2790_s22, %s2791_s25  }
 0x608 PF: > { %s3691_s27 = sld [smem:[#allocation15_spill]]  ;;  %s3692_s23 = sld [smem:[#allocation19_spill]] }
 0x609   : > { %p2374_p6 = scmp.ge.s32.totalorder %s2780_s12, 2 }
 0x60e   : > { %s1995_s28 = sand.u32 1, %s3691_s27   ;;  %p3693_p9 = scmp.ne.s32.totalorder %s3692_s23, 0 }
 0x60f   : > { %s1996_s30 = scalar_lea.sflag [#allocation4], %s1995_s28 }
 0x610   : > { %p2363_p5 = pnand %p2374_p6, %p3693_p9 }
 0x612   : > { %2763 = dma.done.wait (!%p2363_p5), %s1996_s30, 2048  }
 0x613   : > { %2765 = vsyncadd (!%p2363_p5), %s1996_s30, 4294965248  ;;  %s3694_s12 = sld [smem:[#allocation17_spill]]  ;;  %s3695_s18 = sld [smem:[#allocation16_spill]] }
 0x614   : > { %s3696_s11 = sld [smem:[#allocation18_spill]]  ;;  %s3697_s30 = smov %s2772_s10 }
 0x619   : > { %p22_p0 = scmp.ge.s32.totalorder %s3694_s12, 4   ;;  %s3698_s10 = smov %s3695_s18 }
 0x61b   :  { %24 = sbr.rel (!%p22_p0) target bundleno = 6 (0x6), region = 108 }
 0x622   :  { %2001 = vsyncpa [#allocation3], 1 }
 0x623   :  { %2003 = vsyncpa [#allocation3 + $0x1], 1 }
 0x624   :  { %2004 = vsyncpa [#allocation6], 1 }
 0x625   :  { %2005 = vsyncpa [#allocation9], 1 }
 0x626   :  { %2006 = vsyncpa [#allocation4], 1 }
 0x627   :  { %2008 = vsyncpa [#allocation4 + $0x1], 1 }

</bundles_post_ra>
